<compile_context>
chip_gen: v6e
topology: v6e:2x2x1
jax: 0.10.0
libtpu: 0.0.40
codegen_flags: <defaults>
</compile_context>

<pallas_src>
import functools
import numpy as np
import jax
import jax.numpy as jnp
from jax.experimental import pallas as pl
from jax.experimental.pallas import tpu as pltpu

KERNEL_SIZE_RES = 7
DILATIONS = (1, 3, 9)


# ----------------------------- Pallas kernel --------------------------------

def _elu(v):
    return jnp.where(v > 0, v, jnp.exp(jnp.minimum(v, 0.0)) - 1.0)


def encoder_block_kernel(x_ref, w1_ref, b1_ref, w2_ref, b2_ref, wd_ref, bd_ref,
                         o_ref, ims_ref, *, stride, mm_dtype):
    bb, t_len, c_in = x_ref.shape
    c_out = o_ref.shape[-1]
    k_res = KERNEL_SIZE_RES
    k_d = 2 * stride
    t_out = t_len // stride
    n_rows = bb * t_len
    n_out = bb * t_out

    def shift_time(v, s):
        # v: (Bb, T, C) -> w with w[:, t] = v[:, t - s]  (zeros for t < s).
        if s == 0:
            return v
        if s >= t_len:
            return jnp.zeros_like(v)
        zpad = jnp.zeros((bb, s, v.shape[-1]), v.dtype)
        return jnp.concatenate([zpad, v[:, : t_len - s, :]], axis=1)

    def im2col(v, n_taps, dilation):
        # Lane-block k holds v[:, t - (n_taps-1-k)*dilation, :] (causal pad),
        # built entirely in registers (no masked scratch stores).
        taps = [shift_time(v, (n_taps - 1 - k) * dilation) for k in range(n_taps)]
        return jnp.concatenate(taps, axis=2)                     # (Bb, T, K*C)

    h = x_ref[...].astype(jnp.float32)                           # (Bb, T, Cin)

    # --- three residual units (dilations 1, 3, 9): one fused matmul per conv ---
    for i, d in enumerate(DILATIONS):
        im = im2col(h, k_res, d).reshape(n_rows, k_res * c_in)   # (Bb*T, 7*Cin)
        u = jnp.dot(im.astype(mm_dtype), w1_ref[i],
                    preferred_element_type=jnp.float32)
        u = _elu(u + b1_ref[i])
        u = jnp.dot(u.astype(mm_dtype), w2_ref[i],
                    preferred_element_type=jnp.float32)
        u = _elu(u + b2_ref[i])
        h = h + u.reshape(bb, t_len, c_in)

    # --- strided causal downsampling conv (kernel 2*stride, stride) + ELU ---
    # Stage the full-rate im2col slab once, then subsample rows BEFORE the
    # matmul.  Since T % stride == 0, wanted flat rows b*T + t_o*stride are
    # exactly rows 0, stride, 2*stride, ... of the staged slab.
    ims_ref[...] = im2col(h, k_d, 1).reshape(n_rows, k_d * c_in)
    imd = ims_ref[pl.ds(0, n_out, stride), :]                    # (Bb*T_out, Kd*Cin)
    y = jnp.dot(imd.astype(mm_dtype), wd_ref[...],
                preferred_element_type=jnp.float32)
    y = _elu(y + bd_ref[...])
    o_ref[...] = y.reshape(bb, t_out, c_out).astype(o_ref.dtype)


# ------------------------------- wrapper -------------------------------------

def encoder_block(x_btc, params, stride, *, batch_block=None,
                  matmul_dtype=jnp.bfloat16):
    B, T, Cin = x_btc.shape
    Cout, _, Kd = params["wd"].shape
    assert Kd == 2 * stride
    assert T % stride == 0, "T must be divisible by stride for this kernel"
    T_out = T // stride
    K = KERNEL_SIZE_RES

    if batch_block is None:
        # >= 2 grid steps whenever B >= 2 so v7x can shard the parallel batch
        # axis across both TensorCores; still fat enough (up to 32 items) to
        # amortize the ~0.35us per-step overhead on v5e/v6e.
        batch_block = min(32, max(1, B // 2))
        while B % batch_block:
            batch_block -= 1
    assert B % batch_block == 0

    # PyTorch Conv1d weight (Cout, Cin, K) -> im2col layout (K*Cin, Cout)
    def conv_w(w):
        co, ci, k = w.shape
        return jnp.transpose(w, (2, 1, 0)).reshape(k * ci, co)

    mm = matmul_dtype
    w1t = jnp.stack([conv_w(w) for w in params["w1"]]).astype(mm)     # (3, 7*Cin, Cin)
    b1t = jnp.stack([b.reshape(1, Cin) for b in params["b1"]])        # (3, 1, Cin) f32
    w2t = jnp.stack([w[:, :, 0].T for w in params["w2"]]).astype(mm)  # (3, Cin, Cin)
    b2t = jnp.stack([b.reshape(1, Cin) for b in params["b2"]])        # (3, 1, Cin) f32
    wdt = conv_w(params["wd"]).astype(mm)                             # (Kd*Cin, Cout)
    bdt = params["bd"].reshape(1, Cout)                               # (1, Cout) f32

    kernel = functools.partial(encoder_block_kernel, stride=stride, mm_dtype=mm)

    # VMEM budget from actual per-block usage (lane-padded to 128, f32), with
    # double-buffered pipeline blocks, one staging scratch and generous slack;
    # clamped so a big-batch config still fits v7x's smaller (64 MiB) VMEM.
    lane_bytes = 128 * 4
    est = (2 * batch_block * T * lane_bytes          # x pipeline buffers
           + 2 * batch_block * T_out * lane_bytes    # output pipeline buffers
           + batch_block * T * lane_bytes            # im2col staging scratch
           + (2 << 20))                              # weights + register spill slack
    vmem_limit = int(min(64 << 20, max(16 << 20, 4 * est)))

    grid_spec = pltpu.PrefetchScalarGridSpec(
        num_scalar_prefetch=0,
        grid=(B // batch_block,),
        in_specs=[
            pl.BlockSpec((batch_block, T, Cin), lambda b: (b, 0, 0)),
            pl.BlockSpec(w1t.shape, lambda b: (0, 0, 0)),
            pl.BlockSpec(b1t.shape, lambda b: (0, 0, 0)),
            pl.BlockSpec(w2t.shape, lambda b: (0, 0, 0)),
            pl.BlockSpec(b2t.shape, lambda b: (0, 0, 0)),
            pl.BlockSpec(wdt.shape, lambda b: (0, 0)),
            pl.BlockSpec(bdt.shape, lambda b: (0, 0)),
        ],
        out_specs=pl.BlockSpec((batch_block, T_out, Cout), lambda b: (b, 0, 0)),
        scratch_shapes=[
            # full-rate downsample im2col staging (subsampled before the matmul)
            pltpu.VMEM((batch_block * T, Kd * Cin), jnp.float32),
        ],
    )

    return pl.pallas_call(
        kernel,
        out_shape=jax.ShapeDtypeStruct((B, T_out, Cout), jnp.float32),
        grid_spec=grid_spec,
        compiler_params=pltpu.CompilerParams(
            dimension_semantics=("parallel",),       # batch iterations independent
            vmem_limit_bytes=vmem_limit),
    )(x_btc, w1t, b1t, w2t, b2t, wdt, bdt)


# --------------------- deterministic parameter init --------------------------

def init_params(key, in_ch, out_ch, stride):
    keys = jax.random.split(key, 16)

    def uni(k, shape, fan_in):
        bound = 1.0 / float(np.sqrt(fan_in))
        return jax.random.uniform(k, shape, jnp.float32, -bound, bound)

    params = {"w1": [], "b1": [], "w2": [], "b2": []}
    idx = 0
    for _ in range(3):
        params["w1"].append(uni(keys[idx], (in_ch, in_ch, KERNEL_SIZE_RES),
                                in_ch * KERNEL_SIZE_RES)); idx += 1
        params["b1"].append(uni(keys[idx], (in_ch,), in_ch * KERNEL_SIZE_RES)); idx += 1
        params["w2"].append(uni(keys[idx], (in_ch, in_ch, 1), in_ch)); idx += 1
        params["b2"].append(uni(keys[idx], (in_ch,), in_ch)); idx += 1
    k_d = 2 * stride
    params["wd"] = uni(keys[idx], (out_ch, in_ch, k_d), in_ch * k_d); idx += 1
    params["bd"] = uni(keys[idx], (out_ch,), in_ch * k_d)
    return params


# ------------------------- numpy reference (PyTorch) --------------------------

def np_elu(x):
    return np.where(x > 0, x, np.exp(np.minimum(x, 0.0)) - 1.0)


def np_causal_conv1d(x, w, b, stride=1, dilation=1):
    x = np.asarray(x, np.float32); w = np.asarray(w, np.float32); b = np.asarray(b, np.float32)
    B, Cin, T = x.shape
    Cout, _, K = w.shape
    pad = dilation * (K - 1)
    xp = np.concatenate([np.zeros((B, Cin, pad), np.float32), x], axis=-1)
    T_out = (T - 1) // stride + 1
    y = np.zeros((B, Cout, T_out), np.float32)
    for t in range(T_out):
        seg = xp[:, :, t * stride: t * stride + pad + 1: dilation]   # (B, Cin, K)
        y[:, :, t] = np.einsum("bck,ock->bo", seg, w) + b
    return y


def ref_forward(x_nct, params, stride):
    h = np.asarray(x_nct, np.float32)
    for i, d in enumerate(DILATIONS):
        u = np_elu(np_causal_conv1d(h, params["w1"][i], params["b1"][i], 1, d))
        u = np_elu(np_causal_conv1d(u, params["w2"][i], params["b2"][i], 1, 1))
        h = h + u
    y = np_causal_conv1d(h, params["wd"], params["bd"], stride, 1)
    return np_elu(y)


# ---------------------------------- main --------------------------------------

if __name__ == "__main__":
    key = jax.random.PRNGKey(0)
    kx, kp = jax.random.split(key)

    B, Cin, Cout, T, stride = 2, 8, 16, 64, 2
    x_nct = jax.random.normal(kx, (B, Cin, T), jnp.float32)     # PyTorch NCW
    params = init_params(kp, Cin, Cout, stride)

    x_btc = jnp.transpose(x_nct, (0, 2, 1))                     # kernel layout (B, T, C)
    y_ref = np.transpose(ref_forward(np.asarray(x_nct), params, stride), (0, 2, 1))

    # 1) Exact-math config (f32 MXU operands): strict reference equivalence.
    #    batch_block=2 also exercises the multi-item-per-step code path.
    y_f32 = jax.block_until_ready(
        encoder_block(x_btc, params, stride, batch_block=2,
                      matmul_dtype=jnp.float32))
    np.testing.assert_allclose(np.asarray(y_f32), y_ref, rtol=1e-4, atol=1e-4)

    # 2) Production config: bf16 MXU operands with f32 accumulation, default
    #    batch_block -> grid of 2 parallel steps (uses both v7x TensorCores).
    #    bf16 operand rounding at these fan-ins sits well inside 3e-2.
    y_bf16 = jax.block_until_ready(encoder_block(x_btc, params, stride))
    np.testing.assert_allclose(np.asarray(y_bf16), y_ref, rtol=3e-2, atol=3e-2)

    print("KERNEL_OK")
</pallas_src>

<mosaic_0001>
module attributes {stable_mosaic.version = 11 : i64} {
  func.func @encoder_block_kernel(%arg0: i32, %arg1: memref<2x64x8xf32, #tpu.memory_space<vmem>>, %arg2: memref<3x56x8xf32, #tpu.memory_space<vmem>>, %arg3: memref<3x1x8xf32, #tpu.memory_space<vmem>>, %arg4: memref<3x8x8xf32, #tpu.memory_space<vmem>>, %arg5: memref<3x1x8xf32, #tpu.memory_space<vmem>>, %arg6: memref<32x16xf32, #tpu.memory_space<vmem>>, %arg7: memref<1x16xf32, #tpu.memory_space<vmem>>, %arg8: memref<2x32x16xf32, #tpu.memory_space<vmem>>, %arg9: memref<128x32xf32, #tpu.memory_space<vmem>>) attributes {dimension_semantics = [#tpu.dimension_semantics<parallel>], iteration_bounds = array<i64: 1>, scalar_prefetch = 0 : i64, scratch_operands = 1 : i64, tpu.core_type = #tpu.core_type<tc>, window_params = [{transform_indices = @transform_0, window_bounds = array<i64: 2, 64, 8>}, {pipeline_mode = #tpu.pipeline_mode<synchronous>, transform_indices = @transform_1, window_bounds = array<i64: 3, 56, 8>}, {pipeline_mode = #tpu.pipeline_mode<synchronous>, transform_indices = @transform_2, window_bounds = array<i64: 3, 1, 8>}, {pipeline_mode = #tpu.pipeline_mode<synchronous>, transform_indices = @transform_3, window_bounds = array<i64: 3, 8, 8>}, {pipeline_mode = #tpu.pipeline_mode<synchronous>, transform_indices = @transform_4, window_bounds = array<i64: 3, 1, 8>}, {pipeline_mode = #tpu.pipeline_mode<synchronous>, transform_indices = @transform_5, window_bounds = array<i64: 32, 16>}, {pipeline_mode = #tpu.pipeline_mode<synchronous>, transform_indices = @transform_6, window_bounds = array<i64: 1, 16>}, {transform_indices = @transform_7, window_bounds = array<i64: 2, 32, 16>}]} {
    %c0 = arith.constant 0 : index
    %c0_0 = arith.constant 0 : index
    %c0_1 = arith.constant 0 : index
    %0 = vector.load %arg1[%c0, %c0_0, %c0_1] : memref<2x64x8xf32, #tpu.memory_space<vmem>>, vector<2x64x8xf32>
    %cst = arith.constant 0.000000e+00 : f32
    %1 = vector.broadcast %cst : f32 to vector<2x6x8xf32>
    %2 = vector.extract_strided_slice %0 {offsets = [0, 0, 0], sizes = [2, 58, 8], strides = [1, 1, 1]} : vector<2x64x8xf32> to vector<2x58x8xf32>
    %3 = tpu.concatenate %1, %2 in 1 : vector<2x6x8xf32>, vector<2x58x8xf32> -> vector<2x64x8xf32>
    %cst_2 = arith.constant 0.000000e+00 : f32
    %4 = vector.broadcast %cst_2 : f32 to vector<2x5x8xf32>
    %5 = vector.extract_strided_slice %0 {offsets = [0, 0, 0], sizes = [2, 59, 8], strides = [1, 1, 1]} : vector<2x64x8xf32> to vector<2x59x8xf32>
    %6 = tpu.concatenate %4, %5 in 1 : vector<2x5x8xf32>, vector<2x59x8xf32> -> vector<2x64x8xf32>
    %cst_3 = arith.constant 0.000000e+00 : f32
    %7 = vector.broadcast %cst_3 : f32 to vector<2x4x8xf32>
    %8 = vector.extract_strided_slice %0 {offsets = [0, 0, 0], sizes = [2, 60, 8], strides = [1, 1, 1]} : vector<2x64x8xf32> to vector<2x60x8xf32>
    %9 = tpu.concatenate %7, %8 in 1 : vector<2x4x8xf32>, vector<2x60x8xf32> -> vector<2x64x8xf32>
    %cst_4 = arith.constant 0.000000e+00 : f32
    %10 = vector.broadcast %cst_4 : f32 to vector<2x3x8xf32>
    %11 = vector.extract_strided_slice %0 {offsets = [0, 0, 0], sizes = [2, 61, 8], strides = [1, 1, 1]} : vector<2x64x8xf32> to vector<2x61x8xf32>
    %12 = tpu.concatenate %10, %11 in 1 : vector<2x3x8xf32>, vector<2x61x8xf32> -> vector<2x64x8xf32>
    %cst_5 = arith.constant 0.000000e+00 : f32
    %13 = vector.broadcast %cst_5 : f32 to vector<2x2x8xf32>
    %14 = vector.extract_strided_slice %0 {offsets = [0, 0, 0], sizes = [2, 62, 8], strides = [1, 1, 1]} : vector<2x64x8xf32> to vector<2x62x8xf32>
    %15 = tpu.concatenate %13, %14 in 1 : vector<2x2x8xf32>, vector<2x62x8xf32> -> vector<2x64x8xf32>
    %cst_6 = arith.constant 0.000000e+00 : f32
    %16 = vector.broadcast %cst_6 : f32 to vector<2x1x8xf32>
    %17 = vector.extract_strided_slice %0 {offsets = [0, 0, 0], sizes = [2, 63, 8], strides = [1, 1, 1]} : vector<2x64x8xf32> to vector<2x63x8xf32>
    %18 = tpu.concatenate %16, %17 in 1 : vector<2x1x8xf32>, vector<2x63x8xf32> -> vector<2x64x8xf32>
    %19 = tpu.concatenate %3, %6, %9, %12, %15, %18, %0 in 2 : vector<2x64x8xf32>, vector<2x64x8xf32>, vector<2x64x8xf32>, vector<2x64x8xf32>, vector<2x64x8xf32>, vector<2x64x8xf32>, vector<2x64x8xf32> -> vector<2x64x56xf32>
    %20 = vector.shape_cast %19 : vector<2x64x56xf32> to vector<128x56xf32>
    %c0_7 = arith.constant 0 : index
    %c0_8 = arith.constant 0 : index
    %c0_9 = arith.constant 0 : index
    %21 = vector.load %arg2[%c0_7, %c0_8, %c0_9] : memref<3x56x8xf32, #tpu.memory_space<vmem>>, vector<1x56x8xf32>
    %22 = vector.shape_cast %21 : vector<1x56x8xf32> to vector<56x8xf32>
    %cst_10 = arith.constant dense<0.000000e+00> : vector<128x8xf32>
    %23 = tpu.matmul %20, %22, %cst_10 {dimension_numbers = #tpu.dot_dimension_numbers<[1], [0], [0], [1], [0, 0, 1, 1], [], []>} : vector<128x56xf32>, vector<56x8xf32>, vector<128x8xf32> -> vector<128x8xf32>
    %c0_11 = arith.constant 0 : index
    %c0_12 = arith.constant 0 : index
    %c0_13 = arith.constant 0 : index
    %24 = vector.load %arg3[%c0_11, %c0_12, %c0_13] : memref<3x1x8xf32, #tpu.memory_space<vmem>>, vector<1x1x8xf32>
    %25 = vector.shape_cast %24 : vector<1x1x8xf32> to vector<1x8xf32>
    %26 = vector.broadcast %25 : vector<1x8xf32> to vector<128x8xf32>
    %27 = arith.addf %23, %26 : vector<128x8xf32>
    %cst_14 = arith.constant 0.000000e+00 : f32
    %28 = vector.broadcast %cst_14 : f32 to vector<128x8xf32>
    %29 = arith.cmpf ogt, %27, %28 : vector<128x8xf32>
    %cst_15 = arith.constant 0.000000e+00 : f32
    %30 = vector.broadcast %cst_15 : f32 to vector<128x8xf32>
    %31 = arith.minimumf %27, %30 : vector<128x8xf32>
    %32 = math.exp %31 : vector<128x8xf32>
    %cst_16 = arith.constant 1.000000e+00 : f32
    %33 = vector.broadcast %cst_16 : f32 to vector<128x8xf32>
    %34 = arith.subf %32, %33 : vector<128x8xf32>
    %35 = arith.select %29, %27, %34 : vector<128x8xi1>, vector<128x8xf32>
    %c0_17 = arith.constant 0 : index
    %c0_18 = arith.constant 0 : index
    %c0_19 = arith.constant 0 : index
    %36 = vector.load %arg4[%c0_17, %c0_18, %c0_19] : memref<3x8x8xf32, #tpu.memory_space<vmem>>, vector<1x8x8xf32>
    %37 = vector.shape_cast %36 : vector<1x8x8xf32> to vector<8x8xf32>
    %cst_20 = arith.constant dense<0.000000e+00> : vector<128x8xf32>
    %38 = tpu.matmul %35, %37, %cst_20 {dimension_numbers = #tpu.dot_dimension_numbers<[1], [0], [0], [1], [0, 0, 1, 1], [], []>} : vector<128x8xf32>, vector<8x8xf32>, vector<128x8xf32> -> vector<128x8xf32>
    %c0_21 = arith.constant 0 : index
    %c0_22 = arith.constant 0 : index
    %c0_23 = arith.constant 0 : index
    %39 = vector.load %arg5[%c0_21, %c0_22, %c0_23] : memref<3x1x8xf32, #tpu.memory_space<vmem>>, vector<1x1x8xf32>
    %40 = vector.shape_cast %39 : vector<1x1x8xf32> to vector<1x8xf32>
    %41 = vector.broadcast %40 : vector<1x8xf32> to vector<128x8xf32>
    %42 = arith.addf %38, %41 : vector<128x8xf32>
    %cst_24 = arith.constant 0.000000e+00 : f32
    %43 = vector.broadcast %cst_24 : f32 to vector<128x8xf32>
    %44 = arith.cmpf ogt, %42, %43 : vector<128x8xf32>
    %cst_25 = arith.constant 0.000000e+00 : f32
    %45 = vector.broadcast %cst_25 : f32 to vector<128x8xf32>
    %46 = arith.minimumf %42, %45 : vector<128x8xf32>
    %47 = math.exp %46 : vector<128x8xf32>
    %cst_26 = arith.constant 1.000000e+00 : f32
    %48 = vector.broadcast %cst_26 : f32 to vector<128x8xf32>
    %49 = arith.subf %47, %48 : vector<128x8xf32>
    %50 = arith.select %44, %42, %49 : vector<128x8xi1>, vector<128x8xf32>
    %51 = vector.shape_cast %50 : vector<128x8xf32> to vector<2x64x8xf32>
    %52 = arith.addf %0, %51 : vector<2x64x8xf32>
    %cst_27 = arith.constant 0.000000e+00 : f32
    %53 = vector.broadcast %cst_27 : f32 to vector<2x18x8xf32>
    %54 = vector.extract_strided_slice %52 {offsets = [0, 0, 0], sizes = [2, 46, 8], strides = [1, 1, 1]} : vector<2x64x8xf32> to vector<2x46x8xf32>
    %55 = tpu.concatenate %53, %54 in 1 : vector<2x18x8xf32>, vector<2x46x8xf32> -> vector<2x64x8xf32>
    %cst_28 = arith.constant 0.000000e+00 : f32
    %56 = vector.broadcast %cst_28 : f32 to vector<2x15x8xf32>
    %57 = vector.extract_strided_slice %52 {offsets = [0, 0, 0], sizes = [2, 49, 8], strides = [1, 1, 1]} : vector<2x64x8xf32> to vector<2x49x8xf32>
    %58 = tpu.concatenate %56, %57 in 1 : vector<2x15x8xf32>, vector<2x49x8xf32> -> vector<2x64x8xf32>
    %cst_29 = arith.constant 0.000000e+00 : f32
    %59 = vector.broadcast %cst_29 : f32 to vector<2x12x8xf32>
    %60 = vector.extract_strided_slice %52 {offsets = [0, 0, 0], sizes = [2, 52, 8], strides = [1, 1, 1]} : vector<2x64x8xf32> to vector<2x52x8xf32>
    %61 = tpu.concatenate %59, %60 in 1 : vector<2x12x8xf32>, vector<2x52x8xf32> -> vector<2x64x8xf32>
    %cst_30 = arith.constant 0.000000e+00 : f32
    %62 = vector.broadcast %cst_30 : f32 to vector<2x9x8xf32>
    %63 = vector.extract_strided_slice %52 {offsets = [0, 0, 0], sizes = [2, 55, 8], strides = [1, 1, 1]} : vector<2x64x8xf32> to vector<2x55x8xf32>
    %64 = tpu.concatenate %62, %63 in 1 : vector<2x9x8xf32>, vector<2x55x8xf32> -> vector<2x64x8xf32>
    %cst_31 = arith.constant 0.000000e+00 : f32
    %65 = vector.broadcast %cst_31 : f32 to vector<2x6x8xf32>
    %66 = vector.extract_strided_slice %52 {offsets = [0, 0, 0], sizes = [2, 58, 8], strides = [1, 1, 1]} : vector<2x64x8xf32> to vector<2x58x8xf32>
    %67 = tpu.concatenate %65, %66 in 1 : vector<2x6x8xf32>, vector<2x58x8xf32> -> vector<2x64x8xf32>
    %cst_32 = arith.constant 0.000000e+00 : f32
    %68 = vector.broadcast %cst_32 : f32 to vector<2x3x8xf32>
    %69 = vector.extract_strided_slice %52 {offsets = [0, 0, 0], sizes = [2, 61, 8], strides = [1, 1, 1]} : vector<2x64x8xf32> to vector<2x61x8xf32>
    %70 = tpu.concatenate %68, %69 in 1 : vector<2x3x8xf32>, vector<2x61x8xf32> -> vector<2x64x8xf32>
    %71 = tpu.concatenate %55, %58, %61, %64, %67, %70, %52 in 2 : vector<2x64x8xf32>, vector<2x64x8xf32>, vector<2x64x8xf32>, vector<2x64x8xf32>, vector<2x64x8xf32>, vector<2x64x8xf32>, vector<2x64x8xf32> -> vector<2x64x56xf32>
    %72 = vector.shape_cast %71 : vector<2x64x56xf32> to vector<128x56xf32>
    %c1 = arith.constant 1 : index
    %c0_33 = arith.constant 0 : index
    %c0_34 = arith.constant 0 : index
    %73 = vector.load %arg2[%c1, %c0_33, %c0_34] : memref<3x56x8xf32, #tpu.memory_space<vmem>>, vector<1x56x8xf32>
    %74 = vector.shape_cast %73 : vector<1x56x8xf32> to vector<56x8xf32>
    %cst_35 = arith.constant dense<0.000000e+00> : vector<128x8xf32>
    %75 = tpu.matmul %72, %74, %cst_35 {dimension_numbers = #tpu.dot_dimension_numbers<[1], [0], [0], [1], [0, 0, 1, 1], [], []>} : vector<128x56xf32>, vector<56x8xf32>, vector<128x8xf32> -> vector<128x8xf32>
    %c1_36 = arith.constant 1 : index
    %c0_37 = arith.constant 0 : index
    %c0_38 = arith.constant 0 : index
    %76 = vector.load %arg3[%c1_36, %c0_37, %c0_38] : memref<3x1x8xf32, #tpu.memory_space<vmem>>, vector<1x1x8xf32>
    %77 = vector.shape_cast %76 : vector<1x1x8xf32> to vector<1x8xf32>
    %78 = vector.broadcast %77 : vector<1x8xf32> to vector<128x8xf32>
    %79 = arith.addf %75, %78 : vector<128x8xf32>
    %cst_39 = arith.constant 0.000000e+00 : f32
    %80 = vector.broadcast %cst_39 : f32 to vector<128x8xf32>
    %81 = arith.cmpf ogt, %79, %80 : vector<128x8xf32>
    %cst_40 = arith.constant 0.000000e+00 : f32
    %82 = vector.broadcast %cst_40 : f32 to vector<128x8xf32>
    %83 = arith.minimumf %79, %82 : vector<128x8xf32>
    %84 = math.exp %83 : vector<128x8xf32>
    %cst_41 = arith.constant 1.000000e+00 : f32
    %85 = vector.broadcast %cst_41 : f32 to vector<128x8xf32>
    %86 = arith.subf %84, %85 : vector<128x8xf32>
    %87 = arith.select %81, %79, %86 : vector<128x8xi1>, vector<128x8xf32>
    %c1_42 = arith.constant 1 : index
    %c0_43 = arith.constant 0 : index
    %c0_44 = arith.constant 0 : index
    %88 = vector.load %arg4[%c1_42, %c0_43, %c0_44] : memref<3x8x8xf32, #tpu.memory_space<vmem>>, vector<1x8x8xf32>
    %89 = vector.shape_cast %88 : vector<1x8x8xf32> to vector<8x8xf32>
    %cst_45 = arith.constant dense<0.000000e+00> : vector<128x8xf32>
    %90 = tpu.matmul %87, %89, %cst_45 {dimension_numbers = #tpu.dot_dimension_numbers<[1], [0], [0], [1], [0, 0, 1, 1], [], []>} : vector<128x8xf32>, vector<8x8xf32>, vector<128x8xf32> -> vector<128x8xf32>
    %c1_46 = arith.constant 1 : index
    %c0_47 = arith.constant 0 : index
    %c0_48 = arith.constant 0 : index
    %91 = vector.load %arg5[%c1_46, %c0_47, %c0_48] : memref<3x1x8xf32, #tpu.memory_space<vmem>>, vector<1x1x8xf32>
    %92 = vector.shape_cast %91 : vector<1x1x8xf32> to vector<1x8xf32>
    %93 = vector.broadcast %92 : vector<1x8xf32> to vector<128x8xf32>
    %94 = arith.addf %90, %93 : vector<128x8xf32>
    %cst_49 = arith.constant 0.000000e+00 : f32
    %95 = vector.broadcast %cst_49 : f32 to vector<128x8xf32>
    %96 = arith.cmpf ogt, %94, %95 : vector<128x8xf32>
    %cst_50 = arith.constant 0.000000e+00 : f32
    %97 = vector.broadcast %cst_50 : f32 to vector<128x8xf32>
    %98 = arith.minimumf %94, %97 : vector<128x8xf32>
    %99 = math.exp %98 : vector<128x8xf32>
    %cst_51 = arith.constant 1.000000e+00 : f32
    %100 = vector.broadcast %cst_51 : f32 to vector<128x8xf32>
    %101 = arith.subf %99, %100 : vector<128x8xf32>
    %102 = arith.select %96, %94, %101 : vector<128x8xi1>, vector<128x8xf32>
    %103 = vector.shape_cast %102 : vector<128x8xf32> to vector<2x64x8xf32>
    %104 = arith.addf %52, %103 : vector<2x64x8xf32>
    %cst_52 = arith.constant 0.000000e+00 : f32
    %105 = vector.broadcast %cst_52 : f32 to vector<2x54x8xf32>
    %106 = vector.extract_strided_slice %104 {offsets = [0, 0, 0], sizes = [2, 10, 8], strides = [1, 1, 1]} : vector<2x64x8xf32> to vector<2x10x8xf32>
    %107 = tpu.concatenate %105, %106 in 1 : vector<2x54x8xf32>, vector<2x10x8xf32> -> vector<2x64x8xf32>
    %cst_53 = arith.constant 0.000000e+00 : f32
    %108 = vector.broadcast %cst_53 : f32 to vector<2x45x8xf32>
    %109 = vector.extract_strided_slice %104 {offsets = [0, 0, 0], sizes = [2, 19, 8], strides = [1, 1, 1]} : vector<2x64x8xf32> to vector<2x19x8xf32>
    %110 = tpu.concatenate %108, %109 in 1 : vector<2x45x8xf32>, vector<2x19x8xf32> -> vector<2x64x8xf32>
    %cst_54 = arith.constant 0.000000e+00 : f32
    %111 = vector.broadcast %cst_54 : f32 to vector<2x36x8xf32>
    %112 = vector.extract_strided_slice %104 {offsets = [0, 0, 0], sizes = [2, 28, 8], strides = [1, 1, 1]} : vector<2x64x8xf32> to vector<2x28x8xf32>
    %113 = tpu.concatenate %111, %112 in 1 : vector<2x36x8xf32>, vector<2x28x8xf32> -> vector<2x64x8xf32>
    %cst_55 = arith.constant 0.000000e+00 : f32
    %114 = vector.broadcast %cst_55 : f32 to vector<2x27x8xf32>
    %115 = vector.extract_strided_slice %104 {offsets = [0, 0, 0], sizes = [2, 37, 8], strides = [1, 1, 1]} : vector<2x64x8xf32> to vector<2x37x8xf32>
    %116 = tpu.concatenate %114, %115 in 1 : vector<2x27x8xf32>, vector<2x37x8xf32> -> vector<2x64x8xf32>
    %cst_56 = arith.constant 0.000000e+00 : f32
    %117 = vector.broadcast %cst_56 : f32 to vector<2x18x8xf32>
    %118 = vector.extract_strided_slice %104 {offsets = [0, 0, 0], sizes = [2, 46, 8], strides = [1, 1, 1]} : vector<2x64x8xf32> to vector<2x46x8xf32>
    %119 = tpu.concatenate %117, %118 in 1 : vector<2x18x8xf32>, vector<2x46x8xf32> -> vector<2x64x8xf32>
    %cst_57 = arith.constant 0.000000e+00 : f32
    %120 = vector.broadcast %cst_57 : f32 to vector<2x9x8xf32>
    %121 = vector.extract_strided_slice %104 {offsets = [0, 0, 0], sizes = [2, 55, 8], strides = [1, 1, 1]} : vector<2x64x8xf32> to vector<2x55x8xf32>
    %122 = tpu.concatenate %120, %121 in 1 : vector<2x9x8xf32>, vector<2x55x8xf32> -> vector<2x64x8xf32>
    %123 = tpu.concatenate %107, %110, %113, %116, %119, %122, %104 in 2 : vector<2x64x8xf32>, vector<2x64x8xf32>, vector<2x64x8xf32>, vector<2x64x8xf32>, vector<2x64x8xf32>, vector<2x64x8xf32>, vector<2x64x8xf32> -> vector<2x64x56xf32>
    %124 = vector.shape_cast %123 : vector<2x64x56xf32> to vector<128x56xf32>
    %c2 = arith.constant 2 : index
    %c0_58 = arith.constant 0 : index
    %c0_59 = arith.constant 0 : index
    %125 = vector.load %arg2[%c2, %c0_58, %c0_59] : memref<3x56x8xf32, #tpu.memory_space<vmem>>, vector<1x56x8xf32>
    %126 = vector.shape_cast %125 : vector<1x56x8xf32> to vector<56x8xf32>
    %cst_60 = arith.constant dense<0.000000e+00> : vector<128x8xf32>
    %127 = tpu.matmul %124, %126, %cst_60 {dimension_numbers = #tpu.dot_dimension_numbers<[1], [0], [0], [1], [0, 0, 1, 1], [], []>} : vector<128x56xf32>, vector<56x8xf32>, vector<128x8xf32> -> vector<128x8xf32>
    %c2_61 = arith.constant 2 : index
    %c0_62 = arith.constant 0 : index
    %c0_63 = arith.constant 0 : index
    %128 = vector.load %arg3[%c2_61, %c0_62, %c0_63] : memref<3x1x8xf32, #tpu.memory_space<vmem>>, vector<1x1x8xf32>
    %129 = vector.shape_cast %128 : vector<1x1x8xf32> to vector<1x8xf32>
    %130 = vector.broadcast %129 : vector<1x8xf32> to vector<128x8xf32>
    %131 = arith.addf %127, %130 : vector<128x8xf32>
    %cst_64 = arith.constant 0.000000e+00 : f32
    %132 = vector.broadcast %cst_64 : f32 to vector<128x8xf32>
    %133 = arith.cmpf ogt, %131, %132 : vector<128x8xf32>
    %cst_65 = arith.constant 0.000000e+00 : f32
    %134 = vector.broadcast %cst_65 : f32 to vector<128x8xf32>
    %135 = arith.minimumf %131, %134 : vector<128x8xf32>
    %136 = math.exp %135 : vector<128x8xf32>
    %cst_66 = arith.constant 1.000000e+00 : f32
    %137 = vector.broadcast %cst_66 : f32 to vector<128x8xf32>
    %138 = arith.subf %136, %137 : vector<128x8xf32>
    %139 = arith.select %133, %131, %138 : vector<128x8xi1>, vector<128x8xf32>
    %c2_67 = arith.constant 2 : index
    %c0_68 = arith.constant 0 : index
    %c0_69 = arith.constant 0 : index
    %140 = vector.load %arg4[%c2_67, %c0_68, %c0_69] : memref<3x8x8xf32, #tpu.memory_space<vmem>>, vector<1x8x8xf32>
    %141 = vector.shape_cast %140 : vector<1x8x8xf32> to vector<8x8xf32>
    %cst_70 = arith.constant dense<0.000000e+00> : vector<128x8xf32>
    %142 = tpu.matmul %139, %141, %cst_70 {dimension_numbers = #tpu.dot_dimension_numbers<[1], [0], [0], [1], [0, 0, 1, 1], [], []>} : vector<128x8xf32>, vector<8x8xf32>, vector<128x8xf32> -> vector<128x8xf32>
    %c2_71 = arith.constant 2 : index
    %c0_72 = arith.constant 0 : index
    %c0_73 = arith.constant 0 : index
    %143 = vector.load %arg5[%c2_71, %c0_72, %c0_73] : memref<3x1x8xf32, #tpu.memory_space<vmem>>, vector<1x1x8xf32>
    %144 = vector.shape_cast %143 : vector<1x1x8xf32> to vector<1x8xf32>
    %145 = vector.broadcast %144 : vector<1x8xf32> to vector<128x8xf32>
    %146 = arith.addf %142, %145 : vector<128x8xf32>
    %cst_74 = arith.constant 0.000000e+00 : f32
    %147 = vector.broadcast %cst_74 : f32 to vector<128x8xf32>
    %148 = arith.cmpf ogt, %146, %147 : vector<128x8xf32>
    %cst_75 = arith.constant 0.000000e+00 : f32
    %149 = vector.broadcast %cst_75 : f32 to vector<128x8xf32>
    %150 = arith.minimumf %146, %149 : vector<128x8xf32>
    %151 = math.exp %150 : vector<128x8xf32>
    %cst_76 = arith.constant 1.000000e+00 : f32
    %152 = vector.broadcast %cst_76 : f32 to vector<128x8xf32>
    %153 = arith.subf %151, %152 : vector<128x8xf32>
    %154 = arith.select %148, %146, %153 : vector<128x8xi1>, vector<128x8xf32>
    %155 = vector.shape_cast %154 : vector<128x8xf32> to vector<2x64x8xf32>
    %156 = arith.addf %104, %155 : vector<2x64x8xf32>
    %cst_77 = arith.constant 0.000000e+00 : f32
    %157 = vector.broadcast %cst_77 : f32 to vector<2x3x8xf32>
    %158 = vector.extract_strided_slice %156 {offsets = [0, 0, 0], sizes = [2, 61, 8], strides = [1, 1, 1]} : vector<2x64x8xf32> to vector<2x61x8xf32>
    %159 = tpu.concatenate %157, %158 in 1 : vector<2x3x8xf32>, vector<2x61x8xf32> -> vector<2x64x8xf32>
    %cst_78 = arith.constant 0.000000e+00 : f32
    %160 = vector.broadcast %cst_78 : f32 to vector<2x2x8xf32>
    %161 = vector.extract_strided_slice %156 {offsets = [0, 0, 0], sizes = [2, 62, 8], strides = [1, 1, 1]} : vector<2x64x8xf32> to vector<2x62x8xf32>
    %162 = tpu.concatenate %160, %161 in 1 : vector<2x2x8xf32>, vector<2x62x8xf32> -> vector<2x64x8xf32>
    %cst_79 = arith.constant 0.000000e+00 : f32
    %163 = vector.broadcast %cst_79 : f32 to vector<2x1x8xf32>
    %164 = vector.extract_strided_slice %156 {offsets = [0, 0, 0], sizes = [2, 63, 8], strides = [1, 1, 1]} : vector<2x64x8xf32> to vector<2x63x8xf32>
    %165 = tpu.concatenate %163, %164 in 1 : vector<2x1x8xf32>, vector<2x63x8xf32> -> vector<2x64x8xf32>
    %166 = tpu.concatenate %159, %162, %165, %156 in 2 : vector<2x64x8xf32>, vector<2x64x8xf32>, vector<2x64x8xf32>, vector<2x64x8xf32> -> vector<2x64x32xf32>
    %167 = vector.shape_cast %166 : vector<2x64x32xf32> to vector<128x32xf32>
    %c0_80 = arith.constant 0 : index
    %c0_81 = arith.constant 0 : index
    %168 = vector.load %arg9[%c0_80, %c0_81] : memref<128x32xf32, #tpu.memory_space<vmem>>, vector<128x32xf32>
    tpu.vector_store %arg9[%c0_80, %c0_81], %167 {strides = array<i32>} : memref<128x32xf32, #tpu.memory_space<vmem>>, vector<128x32xf32>,
    %c0_82 = arith.constant 0 : index
    %c0_83 = arith.constant 0 : index
    %169 = tpu.strided_load %arg9[%c0_82, %c0_83] {strides = array<i32: 2, 1>} : memref<128x32xf32, #tpu.memory_space<vmem>>, vector<64x32xf32>
    %c0_84 = arith.constant 0 : index
    %c0_85 = arith.constant 0 : index
    %170 = vector.load %arg6[%c0_84, %c0_85] : memref<32x16xf32, #tpu.memory_space<vmem>>, vector<32x16xf32>
    %cst_86 = arith.constant dense<0.000000e+00> : vector<64x16xf32>
    %171 = tpu.matmul %169, %170, %cst_86 {dimension_numbers = #tpu.dot_dimension_numbers<[1], [0], [0], [1], [0, 0, 1, 1], [], []>} : vector<64x32xf32>, vector<32x16xf32>, vector<64x16xf32> -> vector<64x16xf32>
    %c0_87 = arith.constant 0 : index
    %c0_88 = arith.constant 0 : index
    %172 = vector.load %arg7[%c0_87, %c0_88] : memref<1x16xf32, #tpu.memory_space<vmem>>, vector<1x16xf32>
    %173 = vector.broadcast %172 : vector<1x16xf32> to vector<64x16xf32>
    %174 = arith.addf %171, %173 : vector<64x16xf32>
    %cst_89 = arith.constant 0.000000e+00 : f32
    %175 = vector.broadcast %cst_89 : f32 to vector<64x16xf32>
    %176 = arith.cmpf ogt, %174, %175 : vector<64x16xf32>
    %cst_90 = arith.constant 0.000000e+00 : f32
    %177 = vector.broadcast %cst_90 : f32 to vector<64x16xf32>
    %178 = arith.minimumf %174, %177 : vector<64x16xf32>
    %179 = math.exp %178 : vector<64x16xf32>
    %cst_91 = arith.constant 1.000000e+00 : f32
    %180 = vector.broadcast %cst_91 : f32 to vector<64x16xf32>
    %181 = arith.subf %179, %180 : vector<64x16xf32>
    %182 = arith.select %176, %174, %181 : vector<64x16xi1>, vector<64x16xf32>
    %183 = vector.shape_cast %182 : vector<64x16xf32> to vector<2x32x16xf32>
    %c0_92 = arith.constant 0 : index
    %c0_93 = arith.constant 0 : index
    %c0_94 = arith.constant 0 : index
    %184 = vector.load %arg8[%c0_92, %c0_93, %c0_94] : memref<2x32x16xf32, #tpu.memory_space<vmem>>, vector<2x32x16xf32>
    tpu.vector_store %arg8[%c0_92, %c0_93, %c0_94], %183 {strides = array<i32>} : memref<2x32x16xf32, #tpu.memory_space<vmem>>, vector<2x32x16xf32>,
    return
  }
  func.func @transform_0(%arg0: i32) -> (i32, i32, i32) {
    %c0_i32 = arith.constant 0 : i32
    %c0_i32_0 = arith.constant 0 : i32
    %c0_i32_1 = arith.constant 0 : i32
    return %arg0, %c0_i32, %c0_i32_0 : i32, i32, i32
  }
  func.func @transform_1(%arg0: i32) -> (i32, i32, i32) {
    %c0_i32 = arith.constant 0 : i32
    %c0_i32_0 = arith.constant 0 : i32
    %c0_i32_1 = arith.constant 0 : i32
    %c0_i32_2 = arith.constant 0 : i32
    return %c0_i32, %c0_i32_0, %c0_i32_1 : i32, i32, i32
  }
  func.func @transform_2(%arg0: i32) -> (i32, i32, i32) {
    %c0_i32 = arith.constant 0 : i32
    %c0_i32_0 = arith.constant 0 : i32
    %c0_i32_1 = arith.constant 0 : i32
    %c0_i32_2 = arith.constant 0 : i32
    return %c0_i32, %c0_i32_0, %c0_i32_1 : i32, i32, i32
  }
  func.func @transform_3(%arg0: i32) -> (i32, i32, i32) {
    %c0_i32 = arith.constant 0 : i32
    %c0_i32_0 = arith.constant 0 : i32
    %c0_i32_1 = arith.constant 0 : i32
    %c0_i32_2 = arith.constant 0 : i32
    return %c0_i32, %c0_i32_0, %c0_i32_1 : i32, i32, i32
  }
  func.func @transform_4(%arg0: i32) -> (i32, i32, i32) {
    %c0_i32 = arith.constant 0 : i32
    %c0_i32_0 = arith.constant 0 : i32
    %c0_i32_1 = arith.constant 0 : i32
    %c0_i32_2 = arith.constant 0 : i32
    return %c0_i32, %c0_i32_0, %c0_i32_1 : i32, i32, i32
  }
  func.func @transform_5(%arg0: i32) -> (i32, i32) {
    %c0_i32 = arith.constant 0 : i32
    %c0_i32_0 = arith.constant 0 : i32
    %c0_i32_1 = arith.constant 0 : i32
    return %c0_i32, %c0_i32_0 : i32, i32
  }
  func.func @transform_6(%arg0: i32) -> (i32, i32) {
    %c0_i32 = arith.constant 0 : i32
    %c0_i32_0 = arith.constant 0 : i32
    %c0_i32_1 = arith.constant 0 : i32
    return %c0_i32, %c0_i32_0 : i32, i32
  }
  func.func @transform_7(%arg0: i32) -> (i32, i32, i32) {
    %c0_i32 = arith.constant 0 : i32
    %c0_i32_0 = arith.constant 0 : i32
    %c0_i32_1 = arith.constant 0 : i32
    return %arg0, %c0_i32, %c0_i32_0 : i32, i32, i32
  }
}

</mosaic_0001>

<bundles_post_ra>
// kernel: tpu_custom_call.1
= control target key start
LH: loop header
LB: loop body
LE: loop exit
PB: predicated region body
PF: predicated region fallthrough
CT: control target
= control target key end

     0   :  { %vm142_vm0 = vcmask 1043456   ;;  %vm7123_vm1 = vcmask 1044480   ;;  %s4922_s28 = smov 16   ;;  %s4923_s29 = smov 8   ;;  %vm177_vm2 = vcmask 1042432   ;;  %vm212_vm3 = vcmask 1041408   ;;  %s7115_s0 = inlined_call_operand.vmem [shape: f32[2,64,8], index: 0, kind: input, shape index: {}]   ;;  %s7116_s1 = inlined_call_operand.vmem [shape: f32[3,56,8], index: 1, kind: input, shape index: {}]   ;;  %s7117_s3 = inlined_call_operand.vmem [shape: f32[3,8,8], index: 3, kind: input, shape index: {}]   ;;  %s7118_s2 = inlined_call_operand.vmem [shape: f32[3,1,8], index: 2, kind: input, shape index: {}]   ;;  %s7119_s4 = inlined_call_operand.vmem [shape: f32[3,1,8], index: 4, kind: input, shape index: {}]   ;;  %s7120_s5 = inlined_call_operand.vmem [shape: f32[32,16], index: 5, kind: input, shape index: {}]   ;;  %s7121_s6 = inlined_call_operand.vmem [shape: f32[1,16], index: 6, kind: input, shape index: {}]   ;;  %s7122_s7 = inlined_call_operand.vmem [shape: f32[2,32,16], index: 7, kind: output, shape index: {}]  }
   0x1   :  { %v4972_v0 = vld [vmem:[%s7115_s0] sm:$0xff]  ;;  %v4977_v1 = vld [vmem:[%s7115_s0 + $0x8] sm:$0xff]  ;;  %v4994_v12 = vld [vmem:[%s7115_s0 + $0x10] sm:$0xff]  ;;  %s4924_s13 = smov 24   ;;  %vm247_vm4 = vcmask 1040384   ;;  %s4925_s20 = smov 32  }
   0x2   :  { %v143_v2 = vrot.slane %v4972_v0, 4  ;;  %v108_v3 = vrot.slane %v4972_v0, 3  ;;  %v144_v4 = vrot.slane %v4977_v1, 4  ;;  %v109_v5 = vrot.slane %v4977_v1, 3  ;;  %v688_v17 = vld [vmem:[%s7116_s1 + $0x30] sm:$0xff]  ;;  %v687_v18 = vld [vmem:[%s7116_s1 + $0x28] sm:$0xff] }
   0x3   :  { %v178_v10 = vrot.slane %v4972_v0, 5  ;;  %v179_v11 = vrot.slane %v4977_v1, 5  ;;  %v111_v15 = vrot.slane %v4994_v12, 3  ;;  %v213_v16 = vrot.slane %v4972_v0, 6  ;;  %4479 = vmatprep.subr.mxu0 %v688_v17  ;;  %v686_v19 = vld [vmem:[%s7116_s1 + $0x20] sm:$0xff]  ;;  %v5022_v24 = vld [vmem:[%s7115_s0 + $0x18] sm:$0xff] }
   0x4   :  { %v175_v6 = vsel %vm142_vm0, 0.0, %v143_v2  ;;  %v140_v7 = vsel %vm7123_vm1, 0.0, %v108_v3  ;;  %v145_v8 = vsel %vm142_vm0, %v143_v2, %v144_v4  ;;  %v110_v9 = vsel %vm7123_vm1, %v108_v3, %v109_v5  ;;  %4480 = vmatpush3.msra.mxu0 %v688_v17  ;;  %v685_v25 = vld [vmem:[%s7116_s1 + $0x18] sm:$0xff]  ;;  %v684_v30 = vld [vmem:[%s7116_s1 + $0x10] sm:$0xff]  ;;  %s4926_s23 = smov 40   ;;  %v683_v31 = vld [vmem:[%s7116_s1 + $0x8] sm:$0xff] }
   0x5   :  { %334 = vrot.lane.b32.xlu1 %v175_v6, %s4922_s28  ;;  %284 = vrot.lane.b32.xlu0 %v140_v7, %s4923_s29  ;;  %v180_v13 = vsel %vm177_vm2, %v178_v10, %v179_v11  ;;  %v210_v14 = vsel %vm177_vm2, 0.0, %v178_v10  ;;  %v112_v20 = vsel %vm7123_vm1, %v109_v5, %v111_v15  ;;  %v245_v21 = vsel %vm212_vm3, 0.0, %v213_v16  ;;  %v682_v35 = vld [vmem:[%s7116_s1] sm:$0xff]  ;;  %s4927_s30 = smov 48   ;;  %v5080_v50 = vld [vmem:[%s7115_s0 + $0x28] sm:$0xff] }
   0x6   :  { %v248_v22 = vrot.slane %v4972_v0, 7  ;;  %v214_v23 = vrot.slane %v4977_v1, 6  ;;  %4481 = vmatprep.subr.mxu0 %v687_v18  ;;  %v146_v28 = vrot.slane %v4994_v12, 4  ;;  %v113_v29 = vrot.slane %v5022_v24, 3  ;;  %v5063_v42 = vld [vmem:[%s7115_s0 + $0x20] sm:$0xff]  ;;  %v5107_v2 = vld [vmem:[%s7115_s0 + $0x30] sm:$0xff] }
   0x7   :  { %4482 = vmatpush3.msra.mxu0 %v687_v18  ;;  %v249_v34 = vrot.slane %v4977_v1, 7  ;;  %v181_v37 = vrot.slane %v4994_v12, 5  ;;  %v148_v38 = vrot.slane %v5022_v24, 4  ;;  %v183_v41 = vrot.slane %v5022_v24, 5  ;;  %v5124_v10 = vld [vmem:[%s7115_s0 + $0x38] sm:$0xff] }
   0x8   :  { %4483 = vmatprep.subr.mxu0 %v686_v19  ;;  %v280_v26 = vsel %vm247_vm4, 0.0, %v248_v22  ;;  %v215_v27 = vsel %vm212_vm3, %v213_v16, %v214_v23  ;;  %v147_v32 = vsel %vm142_vm0, %v144_v4, %v146_v28  ;;  %v114_v33 = vsel %vm7123_vm1, %v111_v15, %v113_v29 }
   0x9   :  { %336 = vrot.lane.b32.xlu1 %v145_v8, %s4922_s28  ;;  %286 = vrot.lane.b32.xlu0 %v110_v9, %s4923_s29  ;;  %v250_v36 = vsel %vm247_vm4, %v248_v22, %v249_v34  ;;  %v182_v39 = vsel %vm177_vm2, %v179_v11, %v181_v37  ;;  %v149_v40 = vsel %vm142_vm0, %v146_v28, %v148_v38  ;;  %v115_v44 = vrot.slane %v5063_v42, 3 }
   0xa   :  { %4484 = vmatpush3.msra.mxu0 %v686_v19  ;;  %v184_v43 = vsel %vm177_vm2, %v181_v37, %v183_v41  ;;  %v216_v45 = vrot.slane %v4994_v12, 6  ;;  %v251_v48 = vrot.slane %v4994_v12, 7  ;;  %v218_v49 = vrot.slane %v5022_v24, 6 }
   0xb   :  { %4485 = vmatprep.subr.mxu0 %v685_v25  ;;  %v116_v46 = vsel %vm7123_vm1, %v113_v29, %v115_v44  ;;  %v150_v53 = vrot.slane %v5063_v42, 4  ;;  %v117_v54 = vrot.slane %v5080_v50, 3  ;;  %v253_v57 = vrot.slane %v5022_v24, 7 }
   0xc   :  { %4486 = vmatpush3.msra.mxu0 %v685_v25  ;;  %v217_v47 = vsel %vm212_vm3, %v214_v23, %v216_v45  ;;  %v252_v51 = vsel %vm247_vm4, %v249_v34, %v251_v48  ;;  %v219_v52 = vsel %vm212_vm3, %v216_v45, %v218_v49  ;;  %v185_v59 = vrot.slane %v5063_v42, 5  ;;  %v5168_v34 = vld [vmem:[%s7115_s0 + $0x48] sm:$0xff] }
   0xd   :  { %386 = vrot.lane.b32.xlu1 %v180_v13, %s4924_s13  ;;  %384 = vrot.lane.b32.xlu0 %v210_v14, %s4924_s13  ;;  %v151_v55 = vsel %vm142_vm0, %v148_v38, %v150_v53  ;;  %v118_v56 = vsel %vm7123_vm1, %v115_v44, %v117_v54  ;;  %v254_v58 = vsel %vm247_vm4, %v251_v48, %v253_v57  ;;  %v152_v60 = vrot.slane %v5080_v50, 4 }
   0xe   :  { %4487 = vmatprep.subr.mxu0 %v684_v30  ;;  %v186_v61 = vsel %vm177_vm2, %v183_v41, %v185_v59  ;;  %v187_v63 = vrot.slane %v5080_v50, 5  ;;  %v119_v4 = vrot.slane %v5107_v2, 3  ;;  %v220_v5 = vrot.slane %v5063_v42, 6 }
   0xf   :  { %4488 = vmatpush3.msra.mxu0 %v684_v30  ;;  %v153_v62 = vsel %vm142_vm0, %v150_v53, %v152_v60  ;;  %v255_v8 = vrot.slane %v5063_v42, 7  ;;  %v222_v9 = vrot.slane %v5080_v50, 6  ;;  %v154_v14 = vrot.slane %v5107_v2, 4 }
  0x10   :  { %4489 = vmatprep.subr.mxu0 %v683_v31  ;;  %v188_v3 = vsel %vm177_vm2, %v185_v59, %v187_v63  ;;  %v120_v6 = vsel %vm7123_vm1, %v117_v54, %v119_v4  ;;  %v221_v7 = vsel %vm212_vm3, %v218_v49, %v220_v5  ;;  %v121_v15 = vrot.slane %v5124_v10, 3  ;;  %v5195_v49 = vld [vmem:[%s7115_s0 + $0x50] sm:$0xff] }
  0x11   :  { %288 = vrot.lane.b32.xlu1 %v112_v20, %s4923_s29  ;;  %434 = vrot.lane.b32.xlu0 %v245_v21, %s4925_s20  ;;  %v256_v11 = vsel %vm247_vm4, %v253_v57, %v255_v8  ;;  %v223_v13 = vsel %vm212_vm3, %v220_v5, %v222_v9  ;;  %v155_v16 = vsel %vm142_vm0, %v152_v60, %v154_v14  ;;  %v257_v18 = vrot.slane %v5080_v50, 7 }
  0x12   :  { %4490 = vmatpush3.msra.mxu0 %v683_v31  ;;  %v122_v17 = vsel %vm7123_vm1, %v119_v4, %v121_v15  ;;  %v189_v20 = vrot.slane %v5107_v2, 5  ;;  %v156_v21 = vrot.slane %v5124_v10, 4  ;;  %v191_v25 = vrot.slane %v5124_v10, 5 }
  0x13   :  { %4491 = vmatprep.subr.mxu0 %v682_v35  ;;  %v258_v19 = vsel %vm247_vm4, %v255_v8, %v257_v18  ;;  %v224_v29 = vrot.slane %v5107_v2, 6  ;;  %v124_v38 = vrot.slane %v5168_v34, 3  ;;  %v261_v41 = vrot.slane %v5124_v10, 7 }
  0x14   :  { %4492 = vmatpush3.msra.mxu0 %v682_v35  ;;  %v190_v22 = vsel %vm177_vm2, %v187_v63, %v189_v20  ;;  %v157_v23 = vsel %vm142_vm0, %v154_v14, %v156_v21  ;;  %v159_v45 = vrot.slane %v5168_v34, 4  ;;  %v194_v48 = vrot.slane %v5168_v34, 5 }
  0x15   :  { %484 = vrot.lane.b32.xlu1 %v280_v26, %s4926_s23  ;;  %436 = vrot.lane.b32.xlu0 %v215_v27, %s4925_s20  ;;  %v5151_v26 = vld [vmem:[%s7115_s0 + $0x40] sm:$0xff]  ;;  %v192_v27 = vsel %vm177_vm2, %v189_v20, %v191_v25  ;;  %v225_v31 = vsel %vm212_vm3, %v222_v9, %v224_v29  ;;  %v229_v57 = vrot.slane %v5168_v34, 6  ;;  %v264_v4 = vrot.slane %v5168_v34, 7 }
  0x16   :  { %v123_v28 = vrot.slane %v5151_v26, 3  ;;  %v158_v37 = vrot.slane %v5151_v26, 4  ;;  %v193_v44 = vrot.slane %v5151_v26, 5  ;;  %v228_v53 = vrot.slane %v5151_v26, 6 }
  0x17   :  { %v196_v8 = vrot.slane %v5195_v49, 5  ;;  %v59_v20 = vrot.slane %v4972_v0, 2  ;;  %vm58_vm5 = vcmask 1045504   ;;  %vm580_vm6 = vcmask 64512  }
  0x18   :  { %v141_v30 = vsel %vm7123_vm1, 0.0, %v123_v28  ;;  %v230_v60 = vsel %vm212_vm3, %v228_v53, %v229_v57  ;;  %vm597_vm7 = vcmask 130048   ;;  %vm614_vm8 = vcmask 195584  }
  0x19   :  { %338 = vrot.lane.b32.xlu1 %v147_v32, %s4922_s28  ;;  %290 = vrot.lane.b32.xlu0 %v114_v33, %s4923_s29  ;;  %v259_v32 = vrot.slane %v5107_v2, 7  ;;  %v226_v33 = vrot.slane %v5124_v10, 6  ;;  %v197_v14 = vsel %vm177_vm2, %v194_v48, %v196_v8  ;;  %vm631_vm9 = vcmask 261120  }
  0x1a   :  { %vm648_vm10 = vcmask 326656   ;;  %vm665_vm11 = vcmask 392192   ;;  %vm696_vm12 = vcmask 457728  }
  0x1b   :  { %v260_v35 = vsel %vm247_vm4, %v257_v18, %v259_v32 }
  0x1d   :  { %532 = vrot.lane.b32.xlu1 %v4972_v0, %s4927_s30  ;;  %486 = vrot.lane.b32.xlu0 %v250_v36, %s4926_s23  ;;  %v227_v36 = vsel %vm212_vm3, %v224_v29, %v226_v33 }
  0x21   :  { %388 = vrot.lane.b32.xlu1 %v182_v39, %s4924_s13  ;;  %340 = vrot.lane.b32.xlu0 %v149_v40, %s4922_s28  ;;  %v176_v39 = vsel %vm142_vm0, 0.0, %v158_v37  ;;  %v125_v40 = vsel %vm7123_vm1, %v123_v28, %v124_v38  ;;  %v105_v28 = vsel %vm58_vm5, 0.0, %v59_v20 }
  0x25   :  { %390 = vrot.lane.b32.xlu1 %v184_v43, %s4924_s13  ;;  %534 = vrot.lane.b32.xlu0 %v4977_v1, %s4927_s30  ;;  %v262_v43 = vsel %vm247_vm4, %v259_v32, %v261_v41 }
  0x29   :  { %292 = vrot.lane.b32.xlu1 %v116_v46, %s4923_s29  ;;  %438 = vrot.lane.b32.xlu0 %v217_v47, %s4925_s20  ;;  %v211_v46 = vsel %vm177_vm2, 0.0, %v193_v44  ;;  %v160_v47 = vsel %vm142_vm0, %v158_v37, %v159_v45  ;;  %v60_v37 = vrot.slane %v4977_v1, 2 }
  0x2d   :  { %488 = vrot.lane.b32.xlu1 %v252_v51, %s4926_s23  ;;  %440 = vrot.lane.b32.xlu0 %v219_v52, %s4925_s20  ;;  %v195_v51 = vsel %vm177_vm2, %v193_v44, %v194_v48  ;;  %v126_v52 = vrot.slane %v5195_v49, 3 }
  0x2f   :  { %v127_v54 = vsel %vm7123_vm1, %v124_v38, %v126_v52 }
  0x31   :  { %342 = vrot.lane.b32.xlu1 %v151_v55, %s4922_s28  ;;  %294 = vrot.lane.b32.xlu0 %v118_v56, %s4923_s29  ;;  %v246_v55 = vsel %vm212_vm3, 0.0, %v228_v53  ;;  %v263_v56 = vrot.slane %v5151_v26, 7 }
  0x33   :  { %v281_v59 = vsel %vm247_vm4, 0.0, %v263_v56 }
  0x35   :  { %536 = vrot.lane.b32.xlu1 %v4994_v12, %s4927_s30  ;;  %490 = vrot.lane.b32.xlu0 %v254_v58, %s4926_s23  ;;  %v5212_v58 = vld [vmem:[%s7115_s0 + $0x58] sm:$0xff] }
  0x36   :  { %v163_v9 = vrot.slane %v5212_v58, 4 }
  0x39   :  { %392 = vrot.lane.b32.xlu1 %v186_v61, %s4924_s13  ;;  %344 = vrot.lane.b32.xlu0 %v153_v62, %s4922_s28  ;;  %v161_v61 = vrot.slane %v5195_v49, 4  ;;  %v128_v62 = vrot.slane %v5212_v58, 3 }
  0x3b   :  { %v162_v63 = vsel %vm142_vm0, %v159_v45, %v161_v61  ;;  %v164_v15 = vsel %vm142_vm0, %v161_v61, %v163_v9  ;;  %v61_v45 = vsel %vm58_vm5, %v59_v20, %v60_v37 }
  0x3d   :  { %394 = vrot.lane.b32.xlu1 %v188_v3, %s4924_s13  ;;  %538 = vrot.lane.b32.xlu0 %v5022_v24, %s4927_s30  ;;  %v129_v3 = vsel %vm7123_vm1, %v126_v52, %v128_v62  ;;  %v268_v52 = vrot.slane %v5212_v58, 7 }
  0x41   :  { %296 = vrot.lane.b32.xlu1 %v120_v6, %s4923_s29  ;;  %442 = vrot.lane.b32.xlu0 %v221_v7, %s4925_s20  ;;  %v265_v7 = vsel %vm247_vm4, %v263_v56, %v264_v4 }
  0x45   :  { %492 = vrot.lane.b32.xlu1 %v256_v11, %s4926_s23  ;;  %444 = vrot.lane.b32.xlu0 %v223_v13, %s4925_s20 }
  0x49   :  { %346 = vrot.lane.b32.xlu1 %v155_v16, %s4922_s28  ;;  %298 = vrot.lane.b32.xlu0 %v122_v17, %s4923_s29  ;;  %v198_v16 = vrot.slane %v5212_v58, 5 }
  0x4b   :  { %v199_v21 = vsel %vm177_vm2, %v196_v8, %v198_v16 }
  0x4d   :  { %540 = vrot.lane.b32.xlu1 %v5063_v42, %s4927_s30  ;;  %494 = vrot.lane.b32.xlu0 %v258_v19, %s4926_s23  ;;  %v5243_v19 = vld [vmem:[%s7115_s0 + $0x60] sm:$0xff] }
  0x4e   :  { %v235_v20 = vrot.slane %v5243_v19, 6 }
  0x51   :  { %396 = vrot.lane.b32.xlu1 %v190_v22, %s4924_s13  ;;  %348 = vrot.lane.b32.xlu0 %v157_v23, %s4922_s28  ;;  %v130_v22 = vrot.slane %v5243_v19, 3  ;;  %v231_v23 = vrot.slane %v5195_v49, 6 }
  0x53   :  { %v131_v0 = vsel %vm7123_vm1, %v128_v62, %v130_v22  ;;  %v232_v29 = vsel %vm212_vm3, %v229_v57, %v231_v23 }
  0x55   :  { %398 = vrot.lane.b32.xlu1 %v192_v27, %s4924_s13  ;;  %542 = vrot.lane.b32.xlu0 %v5080_v50, %s4927_s30 }
  0x59   :  { %300 = vrot.lane.b32.xlu1 %v141_v30, %s4923_s29  ;;  %446 = vrot.lane.b32.xlu0 %v225_v31, %s4925_s20  ;;  %v266_v30 = vrot.slane %v5195_v49, 7  ;;  %v233_v31 = vrot.slane %v5212_v58, 6 }
  0x5b   :  { %v267_v38 = vsel %vm247_vm4, %v264_v4, %v266_v30 }
  0x5d   :  { %496 = vrot.lane.b32.xlu1 %v260_v35, %s4926_s23  ;;  %448 = vrot.lane.b32.xlu0 %v227_v36, %s4925_s20  ;;  %v5266_v35 = vld [vmem:[%s7115_s0 + $0x68] sm:$0xff] }
  0x5e   :  { %v132_v41 = vrot.slane %v5266_v35, 3  ;;  %v167_v61 = vrot.slane %v5266_v35, 4  ;;  %v202_v8 = vrot.slane %v5266_v35, 5 }
  0x61   :  { %350 = vrot.lane.b32.xlu1 %v176_v39, %s4922_s28  ;;  %302 = vrot.lane.b32.xlu0 %v125_v40, %s4923_s29  ;;  %v234_v39 = vsel %vm212_vm3, %v231_v23, %v233_v31  ;;  %v165_v40 = vrot.slane %v5243_v19, 4 }
  0x63   :  { %v166_v48 = vsel %vm142_vm0, %v163_v9, %v165_v40 }
  0x65   :  { %544 = vrot.lane.b32.xlu1 %v5107_v2, %s4927_s30  ;;  %498 = vrot.lane.b32.xlu0 %v262_v43, %s4926_s23 }
  0x69   :  { %400 = vrot.lane.b32.xlu1 %v211_v46, %s4924_s13  ;;  %352 = vrot.lane.b32.xlu0 %v160_v47, %s4922_s28 }
  0x6d   :  { %402 = vrot.lane.b32.xlu1 %v195_v51, %s4924_s13  ;;  %546 = vrot.lane.b32.xlu0 %v5124_v10, %s4927_s30  ;;  %v133_v51 = vsel %vm7123_vm1, %v130_v22, %v132_v41 }
  0x71   :  { %304 = vrot.lane.b32.xlu1 %v127_v54, %s4923_s29  ;;  %450 = vrot.lane.b32.xlu0 %v246_v55, %s4925_s20 }
  0x75   :  { %500 = vrot.lane.b32.xlu1 %v281_v59, %s4926_s23  ;;  %452 = vrot.lane.b32.xlu0 %v230_v60, %s4925_s20  ;;  %v269_v59 = vsel %vm247_vm4, %v266_v30, %v268_v52  ;;  %v200_v60 = vrot.slane %v5243_v19, 5 }
  0x77   :  { %v335_v5 = vpop.permute.xlu1 %334  ;;  %v285_v6 = vpop.permute.xlu0 %284 }
  0x78   :  { %v581_v36 = vsel %vm580_vm6, %v105_v28, %v285_v6  ;;  %v201_v6 = vsel %vm177_vm2, %v198_v16, %v200_v60  ;;  %v203_v16 = vsel %vm177_vm2, %v200_v60, %v202_v8  ;;  %v270_v28 = vrot.slane %v5243_v19, 7 }
  0x79   :  { %354 = vrot.lane.b32.xlu1 %v162_v63, %s4922_s28  ;;  %306 = vrot.lane.b32.xlu0 %v129_v3, %s4923_s29  ;;  %v598_v44 = vsel %vm597_vm7, %v581_v36, %v335_v5 }
  0x7b   :  { %v5230_v11 = vpop.permute.xlu1 %336  ;;  %v287_v13 = vpop.permute.xlu0 %286 }
  0x7c   :  { %v582_v57 = vsel %vm580_vm6, %v61_v45, %v287_v13 }
  0x7d   :  { %548 = vrot.lane.b32.xlu1 %v5151_v26, %s4927_s30  ;;  %502 = vrot.lane.b32.xlu0 %v265_v7, %s4926_s23  ;;  %v599_v3 = vsel %vm597_vm7, %v582_v57, %v5230_v11  ;;  %v168_v7 = vsel %vm142_vm0, %v165_v40, %v167_v61 }
  0x7f   :  { %v5238_v17 = vpop.permute.xlu1 %386  ;;  %v385_v18 = vpop.permute.xlu0 %384 }
  0x80   :  { %v615_v46 = vsel %vm614_vm8, %v598_v44, %v385_v18  ;;  %v616_v4 = vsel %vm614_vm8, %v599_v3, %v5238_v17  ;;  %v62_v17 = vrot.slane %v4994_v12, 2 }
  0x81   :  { %404 = vrot.lane.b32.xlu1 %v197_v14, %s4924_s13  ;;  %356 = vrot.lane.b32.xlu0 %v164_v15, %s4922_s28  ;;  %v5319_v14 = vld [vmem:[%s7115_s0 + $0x70] sm:$0xff] }
  0x82   :  { %v134_v18 = vrot.slane %v5319_v14, 3  ;;  %v63_v23 = vsel %vm58_vm5, %v60_v37, %v62_v17  ;;  %v169_v37 = vrot.slane %v5319_v14, 4 }
  0x83   :  { %v5253_v25 = vpop.permute.xlu1 %288  ;;  %v435_v27 = vpop.permute.xlu0 %434 }
  0x84   :  { %v632_v47 = vsel %vm631_vm9, %v615_v46, %v435_v27  ;;  %v135_v12 = vsel %vm7123_vm1, %v132_v41, %v134_v18  ;;  %v236_v27 = vsel %vm212_vm3, %v233_v31, %v235_v20  ;;  %v271_v31 = vsel %vm247_vm4, %v268_v52, %v270_v28 }
  0x85   :  { %406 = vrot.lane.b32.xlu1 %v199_v21, %s4924_s13  ;;  %550 = vrot.lane.b32.xlu0 %v5168_v34, %s4927_s30  ;;  %v170_v46 = vsel %vm142_vm0, %v167_v61, %v169_v37 }
  0x87   :  { %v485_v32 = vpop.permute.xlu1 %484  ;;  %v437_v33 = vpop.permute.xlu0 %436 }
  0x88   :  { %v649_v53 = vsel %vm648_vm10, %v632_v47, %v485_v32  ;;  %v633_v5 = vsel %vm631_vm9, %v616_v4, %v437_v33  ;;  %v5346_v32 = vld [vmem:[%s7115_s0 + $0x78] sm:$0xff]  ;;  %v583_v33 = vsel %vm580_vm6, %v63_v23, %v5253_v25  ;;  %v64_v25 = vrot.slane %v5022_v24, 2 }
  0x89   :  { %308 = vrot.lane.b32.xlu1 %v131_v0, %s4923_s29  ;;  %454 = vrot.lane.b32.xlu0 %v232_v29, %s4925_s20  ;;  %v237_v0 = vrot.slane %v5266_v35, 6  ;;  %v276_v23 = vrot.slane %v5346_v32, 7 }
  0x8a   :  { %v65_v24 = vsel %vm58_vm5, %v62_v17, %v64_v25 }
  0x8b   :  { %v5278_v43 = vpop.permute.xlu1 %338  ;;  %v5280_v1 = vpop.permute.xlu0 %290  ;;  %v238_v36 = vsel %vm212_vm3, %v235_v20, %v237_v0 }
  0x8c   :  { %v600_v41 = vsel %vm597_vm7, %v583_v33, %v5278_v43  ;;  %v584_v57 = vsel %vm580_vm6, %v65_v24, %v5280_v1 }
  0x8d   :  { %504 = vrot.lane.b32.xlu1 %v267_v38, %s4926_s23  ;;  %456 = vrot.lane.b32.xlu0 %v234_v39, %s4925_s20  ;;  %v136_v38 = vrot.slane %v5346_v32, 3 }
  0x8f   :  { %v533_v54 = vpop.permute.xlu1 %532  ;;  %v487_v55 = vpop.permute.xlu0 %486  ;;  %v137_v47 = vsel %vm7123_vm1, %v134_v18, %v136_v38 }
  0x90   :  { %v666_v56 = vsel %vm665_vm11, %v649_v53, %v533_v54  ;;  %v650_v9 = vsel %vm648_vm10, %v633_v5, %v487_v55  ;;  %v204_v55 = vrot.slane %v5319_v14, 5  ;;  %v206_v5 = vrot.slane %v5346_v32, 5 }
  0x91   :  { %358 = vrot.lane.b32.xlu1 %v166_v48, %s4922_s28  ;;  %310 = vrot.lane.b32.xlu0 %v133_v51, %s4923_s29  ;;  %v272_v48 = vrot.slane %v5266_v35, 7 }
  0x92   :  { %4493 = vmatprep.mubr.msk.f32.mxu0 %vm696_vm12, %v666_v56  ;;  %v171_v56 = vrot.slane %v5346_v32, 4  ;;  %v205_v4 = vsel %vm177_vm2, %v202_v8, %v204_v55  ;;  %v207_v8 = vsel %vm177_vm2, %v204_v55, %v206_v5 }
  0x93   :  { %v389_v62 = vpop.permute.xlu1 %388  ;;  %v5300_v63 = vpop.permute.xlu0 %340  ;;  %v273_v54 = vsel %vm247_vm4, %v270_v28, %v272_v48 }
  0x94   :  { %v617_v44 = vsel %vm614_vm8, %v600_v41, %v389_v62  ;;  %v601_v61 = vsel %vm597_vm7, %v584_v57, %v5300_v63  ;;  %v172_v1 = vsel %vm142_vm0, %v169_v37, %v171_v56 }
  0x95   :  { %552 = vrot.lane.b32.xlu1 %v5195_v49, %s4927_s30  ;;  %506 = vrot.lane.b32.xlu0 %v269_v59, %s4926_s23 }
  0x97   :  { %v391_v11 = vpop.permute.xlu1 %390  ;;  %v535_v13 = vpop.permute.xlu0 %534 }
  0x98   :  { %v667_v15 = vsel %vm665_vm11, %v650_v9, %v535_v13  ;;  %v618_v62 = vsel %vm614_vm8, %v601_v61, %v391_v11  ;;  %v66_v11 = vrot.slane %v5063_v42, 2  ;;  %v239_v13 = vrot.slane %v5319_v14, 6 }
  0x99   :  { %408 = vrot.lane.b32.xlu1 %v201_v6, %s4924_s13  ;;  %360 = vrot.lane.b32.xlu0 %v168_v7, %s4922_s28 }
  0x9a   :  { %4494 = vmatmul.mubr.msk.f32.vlgmr.msra.gmra.mxu0 %vm696_vm12, %v667_v15  ;;  %v241_v15 = vrot.slane %v5346_v32, 6  ;;  %v67_v18 = vsel %vm58_vm5, %v64_v25, %v66_v11  ;;  %v240_v20 = vsel %vm212_vm3, %v237_v0, %v239_v13 }
  0x9b   :  { %v5331_v21 = vpop.permute.xlu1 %292  ;;  %v439_v22 = vpop.permute.xlu0 %438 }
  0x9c   :  { %v634_v45 = vsel %vm631_vm9, %v617_v44, %v439_v22  ;;  %v242_v42 = vsel %vm212_vm3, %v239_v13, %v241_v15  ;;  %v274_v22 = vrot.slane %v5319_v14, 7  ;;  %v585_v28 = vsel %vm580_vm6, %v67_v18, %v5331_v21 }
  0x9d   :  { %410 = vrot.lane.b32.xlu1 %v203_v16, %s4924_s13  ;;  %554 = vrot.lane.b32.xlu0 %v5212_v58, %s4927_s30 }
  0x9f   :  { %v489_v29 = vpop.permute.xlu1 %488  ;;  %v441_v30 = vpop.permute.xlu0 %440 }
  0xa0   :  { %v651_v51 = vsel %vm648_vm10, %v634_v45, %v489_v29  ;;  %v635_v3 = vsel %vm631_vm9, %v618_v62, %v441_v30  ;;  %v277_v29 = vsel %vm247_vm4, %v274_v22, %v276_v23  ;;  %v275_v30 = vsel %vm247_vm4, %v272_v48, %v274_v22 }
  0xa1   :  { %312 = vrot.lane.b32.xlu1 %v135_v12, %s4923_s29  ;;  %458 = vrot.lane.b32.xlu0 %v236_v27, %s4925_s20  ;;  %v74_v22 = vrot.slane %v5151_v26, 2 }
  0xa3   :  { %v5356_v39 = vpop.permute.xlu1 %342  ;;  %v5358_v40 = vpop.permute.xlu0 %294 }
  0xa4   :  { %v602_v0 = vsel %vm597_vm7, %v585_v28, %v5356_v39 }
  0xa5   :  { %508 = vrot.lane.b32.xlu1 %v271_v31, %s4926_s23  ;;  %460 = vrot.lane.b32.xlu0 %v238_v36, %s4925_s20  ;;  %v68_v36 = vrot.slane %v5080_v50, 2 }
  0xa7   :  { %v537_v52 = vpop.permute.xlu1 %536  ;;  %v491_v43 = vpop.permute.xlu0 %490  ;;  %v69_v44 = vsel %vm58_vm5, %v66_v11, %v68_v36 }
  0xa8   :  { %v668_v53 = vsel %vm665_vm11, %v651_v51, %v537_v52  ;;  %v652_v6 = vsel %vm648_vm10, %v635_v3, %v491_v43  ;;  %v586_v50 = vsel %vm580_vm6, %v69_v44, %v5358_v40 }
  0xa9   :  { %362 = vrot.lane.b32.xlu1 %v170_v46, %s4922_s28  ;;  %314 = vrot.lane.b32.xlu0 %v137_v47, %s4923_s29 }
  0xaa   :  { %4496 = vmatprep.mubr.msk.f32.mxu0 %vm696_vm12, %v668_v53 }
  0xab   :  { %v393_v59 = vpop.permute.xlu1 %392  ;;  %v345_v60 = vpop.permute.xlu0 %344 }
  0xac   :  { %v619_v37 = vsel %vm614_vm8, %v602_v0, %v393_v59  ;;  %v603_v47 = vsel %vm597_vm7, %v586_v50, %v345_v60 }
  0xad   :  { %556 = vrot.lane.b32.xlu1 %v5243_v19, %s4927_s30  ;;  %510 = vrot.lane.b32.xlu0 %v273_v54, %s4926_s23  ;;  %v70_v54 = vrot.slane %v5107_v2, 2 }
  0xaf   :  { %v395_v63 = vpop.permute.xlu1 %394  ;;  %v539_v7 = vpop.permute.xlu0 %538  ;;  %v71_v56 = vsel %vm58_vm5, %v68_v36, %v70_v54  ;;  %v75_v36 = vrot.slane %v5168_v34, 2 }
  0xb0   :  { %v669_v9 = vsel %vm665_vm11, %v652_v6, %v539_v7  ;;  %v620_v48 = vsel %vm614_vm8, %v603_v47, %v395_v63 }
  0xb1   :  { %412 = vrot.lane.b32.xlu1 %v205_v4, %s4924_s13  ;;  %364 = vrot.lane.b32.xlu0 %v172_v1, %s4922_s28  ;;  %v72_v4 = vrot.slane %v5124_v10, 2 }
  0xb2   :  { %4497 = vmatmul.mubr.msk.f32.gmra.mxu0 %vm696_vm12, %v669_v9 }
  0xb3   :  { %v297_v17 = vpop.permute.xlu1 %296  ;;  %v443_v16 = vpop.permute.xlu0 %442  ;;  %v73_v7 = vsel %vm58_vm5, %v70_v54, %v72_v4 }
  0xb4   :  { %v636_v21 = vsel %vm631_vm9, %v619_v37, %v443_v16  ;;  %v587_v60 = vsel %vm580_vm6, %v71_v56, %v297_v17 }
  0xb5   :  { %414 = vrot.lane.b32.xlu1 %v207_v8, %s4924_s13  ;;  %558 = vrot.lane.b32.xlu0 %v5266_v35, %s4927_s30 }
  0xb7   :  { %v493_v12 = vpop.permute.xlu1 %492  ;;  %v445_v27 = vpop.permute.xlu0 %444 }
  0xb8   :  { %v653_v38 = vsel %vm648_vm10, %v636_v21, %v493_v12  ;;  %v637_v51 = vsel %vm631_vm9, %v620_v48, %v445_v27  ;;  %v106_v27 = vsel %vm58_vm5, 0.0, %v74_v22 }
  0xb9   :  { %464 = vrot.lane.b32.xlu1 %v242_v42, %s4925_s20  ;;  %462 = vrot.lane.b32.xlu0 %v240_v20, %s4925_s20 }
  0xbb   :  { %v347_v33 = vpop.permute.xlu1 %346  ;;  %v299_v31 = vpop.permute.xlu0 %298 }
  0xbc   :  { %v604_v3 = vsel %vm597_vm7, %v587_v60, %v347_v33  ;;  %v588_v11 = vsel %vm580_vm6, %v73_v7, %v299_v31 }
  0xbd   :  { %514 = vrot.lane.b32.xlu1 %v277_v29, %s4926_s23  ;;  %512 = vrot.lane.b32.xlu0 %v275_v30, %s4926_s23 }
  0xbf   :  { %v541_v41 = vpop.permute.xlu1 %540  ;;  %v495_v25 = vpop.permute.xlu0 %494 }
  0xc0   :  { %v670_v45 = vsel %vm665_vm11, %v653_v38, %v541_v41  ;;  %v654_v52 = vsel %vm648_vm10, %v637_v51, %v495_v25  ;;  %v76_v25 = vsel %vm58_vm5, %v74_v22, %v75_v36 }
  0xc1   :  { %562 = vrot.lane.b32.xlu1 %v5346_v32, %s4927_s30  ;;  %560 = vrot.lane.b32.xlu0 %v5319_v14, %s4927_s30 }
  0xc2   :  { %4499 = vmatprep.mubr.msk.f32.mxu0 %vm696_vm12, %v670_v45  ;;  %v986_v45 = vld [vmem:[%s7117_s3] sm:$0xff] }
  0xc3   :  { %v397_v39 = vpop.permute.xlu1 %396  ;;  %v349_v46 = vpop.permute.xlu0 %348  ;;  %4517 = vmatprep.subr.mxu1 %v986_v45 }
  0xc4   :  { %v621_v1 = vsel %vm614_vm8, %v604_v3, %v397_v39  ;;  %v605_v10 = vsel %vm597_vm7, %v588_v11, %v349_v46  ;;  %4518 = vmatpush3.msra.mxu1 %v986_v45  ;;  %v79_v3 = vrot.slane %v5212_v58, 2  ;;  %v85_v45 = vrot.slane %v5319_v14, 2 }
  0xc7   :  { %v399_v43 = vpop.permute.xlu1 %398  ;;  %v543_v24 = vpop.permute.xlu0 %542 }
  0xc8   :  { %v671_v53 = vsel %vm665_vm11, %v654_v52, %v543_v24  ;;  %v622_v15 = vsel %vm614_vm8, %v605_v10, %v399_v43 }
  0xc9   :  { %4500 = vmatmul.mubr.msk.f32.gmra.mxu0 %vm696_vm12, %v671_v53  ;;  %v77_v53 = vrot.slane %v5195_v49, 2 }
  0xcb   :  { %v301_v55 = vpop.permute.xlu1 %300  ;;  %v447_v40 = vpop.permute.xlu0 %446 }
  0xcc   :  { %v638_v5 = vsel %vm631_vm9, %v621_v1, %v447_v40  ;;  %v589_v30 = vsel %vm580_vm6, %v106_v27, %v301_v55  ;;  %v78_v40 = vsel %vm58_vm5, %v75_v36, %v77_v53 }
  0xcf   :  { %v497_v57 = vpop.permute.xlu1 %496  ;;  %v449_v59 = vpop.permute.xlu0 %448 }
  0xd0   :  { %v655_v2 = vsel %vm648_vm10, %v638_v5, %v497_v57  ;;  %v639_v17 = vsel %vm631_vm9, %v622_v15, %v449_v59 }
  0xd3   :  { %v351_v61 = vpop.permute.xlu1 %350  ;;  %v303_v62 = vpop.permute.xlu0 %302 }
  0xd4   :  { %v606_v0 = vsel %vm597_vm7, %v589_v30, %v351_v61  ;;  %v590_v34 = vsel %vm580_vm6, %v76_v25, %v303_v62 }
  0xd7   :  { %v545_v6 = vpop.permute.xlu1 %544  ;;  %v499_v63 = vpop.permute.xlu0 %498 }
  0xd8   :  { %v672_v9 = vsel %vm665_vm11, %v655_v2, %v545_v6  ;;  %v656_v16 = vsel %vm648_vm10, %v639_v17, %v499_v63  ;;  %v80_v6 = vsel %vm58_vm5, %v77_v53, %v79_v3 }
  0xd9   :  { %4502 = vmatprep.mubr.msk.f32.mxu0 %vm696_vm12, %v672_v9 }
  0xdb   :  { %v401_v8 = vpop.permute.xlu1 %400  ;;  %v353_v13 = vpop.permute.xlu0 %352 }
  0xdc   :  { %v623_v37 = vsel %vm614_vm8, %v606_v0, %v401_v8  ;;  %v607_v46 = vsel %vm597_vm7, %v590_v34, %v353_v13 }
  0xdf   :  { %v403_v18 = vpop.permute.xlu1 %402  ;;  %v547_v42 = vpop.permute.xlu0 %546 }
  0xe0   :  { %v673_v20 = vsel %vm665_vm11, %v656_v16, %v547_v42  ;;  %v624_v47 = vsel %vm614_vm8, %v607_v46, %v403_v18  ;;  %v81_v18 = vrot.slane %v5243_v19, 2 }
  0xe1   :  { %4503 = vmatmul.mubr.msk.f32.gmra.mxu0 %vm696_vm12, %v673_v20 }
  0xe2   :  { %v82_v22 = vsel %vm58_vm5, %v79_v3, %v81_v18 }
  0xe3   :  { %v305_v23 = vpop.permute.xlu1 %304  ;;  %v451_v12 = vpop.permute.xlu0 %450 }
  0xe4   :  { %v640_v21 = vsel %vm631_vm9, %v623_v37, %v451_v12  ;;  %v591_v59 = vsel %vm580_vm6, %v78_v40, %v305_v23 }
  0xe7   :  { %v501_v28 = vpop.permute.xlu1 %500  ;;  %v453_v29 = vpop.permute.xlu0 %452 }
  0xe8   :  { %v657_v26 = vsel %vm648_vm10, %v640_v21, %v501_v28  ;;  %v641_v48 = vsel %vm631_vm9, %v624_v47, %v453_v29  ;;  %v87_v47 = vrot.slane %v5346_v32, 2 }
  0xeb   :  { %v355_v33 = vpop.permute.xlu1 %354  ;;  %v307_v31 = vpop.permute.xlu0 %306 }
  0xec   :  { %v608_v62 = vsel %vm597_vm7, %v591_v59, %v355_v33  ;;  %v592_v7 = vsel %vm580_vm6, %v80_v6, %v307_v31  ;;  %v83_v33 = vrot.slane %v5266_v35, 2 }
  0xee   :  { %v84_v21 = vsel %vm58_vm5, %v81_v18, %v83_v33 }
  0xef   :  { %v549_v38 = vpop.permute.xlu1 %548  ;;  %v503_v41 = vpop.permute.xlu0 %502 }
  0xf0   :  { %v674_v44 = vsel %vm665_vm11, %v657_v26, %v549_v38  ;;  %v658_v51 = vsel %vm648_vm10, %v641_v48, %v503_v41 }
  0xf1   :  { %4505 = vmatprep.mubr.msk.f32.mxu0 %vm696_vm12, %v674_v44 }
  0xf3   :  { %v405_v50 = vpop.permute.xlu1 %404  ;;  %v357_v39 = vpop.permute.xlu0 %356 }
  0xf4   :  { %v625_v4 = vsel %vm614_vm8, %v608_v62, %v405_v50  ;;  %v609_v58 = vsel %vm597_vm7, %v592_v7, %v357_v39 }
  0xf7   :  { %v407_v52 = vpop.permute.xlu1 %406  ;;  %v551_v43 = vpop.permute.xlu0 %550 }
  0xf8   :  { %v675_v24 = vsel %vm665_vm11, %v658_v51, %v551_v43  ;;  %v626_v8 = vsel %vm614_vm8, %v609_v58, %v407_v52  ;;  %v86_v51 = vsel %vm58_vm5, %v83_v33, %v85_v45 }
  0xf9   :  { %4506 = vmatmul.mubr.msk.f32.gmra.mxu0 %vm696_vm12, %v675_v24  ;;  %v88_v24 = vsel %vm58_vm5, %v85_v45, %v87_v47 }
  0xfb   :  { %v309_v54 = vpop.permute.xlu1 %308  ;;  %v455_v55 = vpop.permute.xlu0 %454 }
  0xfc   :  { %v642_v1 = vsel %vm631_vm9, %v625_v4, %v455_v55  ;;  %v593_v27 = vsel %vm580_vm6, %v82_v22, %v309_v54 }
  0xff   :  { %v505_v56 = vpop.permute.xlu1 %504  ;;  %v457_v57 = vpop.permute.xlu0 %456 }
 0x100   :  { %v659_v49 = vsel %vm648_vm10, %v642_v1, %v505_v56  ;;  %v643_v13 = vsel %vm631_vm9, %v626_v8, %v457_v57 }
 0x103   :  { %v359_v60 = vpop.permute.xlu1 %358  ;;  %v311_v61 = vpop.permute.xlu0 %310 }
 0x104   :  { %v610_v30 = vsel %vm597_vm7, %v593_v27, %v359_v60  ;;  %v594_v38 = vsel %vm580_vm6, %v84_v21, %v311_v61 }
 0x107   :  { %v553_v5 = vpop.permute.xlu1 %552  ;;  %v507_v2 = vpop.permute.xlu0 %506 }
 0x108   :  { %v676_v63 = vsel %vm665_vm11, %v659_v49, %v553_v5  ;;  %v660_v10 = vsel %vm648_vm10, %v643_v13, %v507_v2  ;;  %v5535_v5 = vld [vmem:[%s7118_s2] ss:$0 sm:$0xff] }
 0x109   :  { %4508 = vmatprep.mubr.msk.f32.mxu0 %vm696_vm12, %v676_v63 }
 0x10b   :  { %v409_v9 = vpop.permute.xlu1 %408  ;;  %v361_v11 = vpop.permute.xlu0 %360 }
 0x10c   :  { %v627_v31 = vsel %vm614_vm8, %v610_v30, %v409_v9  ;;  %v611_v35 = vsel %vm597_vm7, %v594_v38, %v361_v11 }
 0x10f   :  { %v411_v15 = vpop.permute.xlu1 %410  ;;  %v555_v17 = vpop.permute.xlu0 %554 }
 0x110   :  { %v677_v16 = vsel %vm665_vm11, %v660_v10, %v555_v17  ;;  %v628_v44 = vsel %vm614_vm8, %v611_v35, %v411_v15 }
 0x111   :  { %4509 = vmatmul.mubr.msk.f32.gmra.mxu0 %vm696_vm12, %v677_v16 }
 0x113   :  { %v313_v42 = vpop.permute.xlu1 %312  ;;  %v459_v20 = vpop.permute.xlu0 %458 }
 0x114   :  { %v644_v0 = vsel %vm631_vm9, %v627_v31, %v459_v20  ;;  %v595_v14 = vsel %vm580_vm6, %v86_v51, %v313_v42 }
 0x117   :  { %v509_v23 = vpop.permute.xlu1 %508  ;;  %v461_v12 = vpop.permute.xlu0 %460 }
 0x118   :  { %v661_v19 = vsel %vm648_vm10, %v644_v0, %v509_v23  ;;  %v645_v34 = vsel %vm631_vm9, %v628_v44, %v461_v12 }
 0x11b   :  { %v363_v28 = vpop.permute.xlu1 %362  ;;  %v315_v29 = vpop.permute.xlu0 %314 }
 0x11c   :  { %v596_v53 = vsel %vm580_vm6, %v88_v24, %v315_v29  ;;  %v612_v40 = vsel %vm597_vm7, %v595_v14, %v363_v28 }
 0x11f   :  { %v557_v36 = vpop.permute.xlu1 %556  ;;  %v511_v37 = vpop.permute.xlu0 %510 }
 0x120   :  { %v678_v26 = vsel %vm665_vm11, %v661_v19, %v557_v36  ;;  %v662_v50 = vsel %vm648_vm10, %v645_v34, %v511_v37 }
 0x121   :  { %4511 = vmatprep.mubr.msk.f32.mxu0 %vm696_vm12, %v678_v26 }
 0x123   :  { %v413_v41 = vpop.permute.xlu1 %412  ;;  %v365_v25 = vpop.permute.xlu0 %364 }
 0x124   :  { %v613_v32 = vsel %vm597_vm7, %v596_v53, %v365_v25  ;;  %v629_v56 = vsel %vm614_vm8, %v612_v40, %v413_v41 }
 0x127   :  { %v415_v39 = vpop.permute.xlu1 %414  ;;  %v559_v46 = vpop.permute.xlu0 %558 }
 0x128   :  { %v679_v48 = vsel %vm665_vm11, %v662_v50, %v559_v46  ;;  %v630_v57 = vsel %vm614_vm8, %v613_v32, %v415_v39 }
 0x129   :  { %4512 = vmatmul.mubr.msk.f32.gmra.mxu0 %vm696_vm12, %v679_v48 }
 0x12b   :  { %v465_v52 = vpop.permute.xlu1 %464  ;;  %v463_v43 = vpop.permute.xlu0 %462 }
 0x12c   :  { %v647_v59 = vsel %vm631_vm9, %v630_v57, %v465_v52  ;;  %v646_v60 = vsel %vm631_vm9, %v629_v56, %v463_v43 }
 0x12f   :  { %v515_v54 = vpop.permute.xlu1 %514  ;;  %v513_v55 = vpop.permute.xlu0 %512 }
 0x130   :  { %v664_v61 = vsel %vm648_vm10, %v647_v59, %v515_v54  ;;  %v663_v62 = vsel %vm648_vm10, %v646_v60, %v513_v55 }
 0x133   :  { %v563_v3 = vpop.permute.xlu1 %562  ;;  %v561_v4 = vpop.permute.xlu0 %560 }
 0x134   :  { %v681_v1 = vsel %vm665_vm11, %v664_v61, %v563_v3  ;;  %v680_v49 = vsel %vm665_vm11, %v663_v62, %v561_v4 }
 0x135   :  { %4514 = vmatprep.mubr.msk.f32.mxu0 %vm696_vm12, %v680_v49 }
 0x136   :  { %4515 = vmatmul.mubr.msk.f32.gmra.mxu0 %vm696_vm12, %v681_v1 }
 0x15a   :  { %v4495_v2 = vpop.f32.mrf.mxu0 }
 0x15b   :  { %v817_v6 = vadd.f32 %v4495_v2, %v5535_v5 }
 0x15c   :  { %v811_v63 = vpop.f32.mrf.mxu0 }
 0x15d   :  { %v907_v7 = vmin.f32 %v817_v6, 0.0  ;;  %v812_v9 = vadd.f32 %v5535_v5, %v811_v63  ;;  %vm891_vm14 = vcmp.gt.f32.partialorder %v817_v6, 0.0 }
 0x15f   :  { %v924_v11 = vmul.f32 1.442695, %v907_v7  ;;  %v906_v58 = vmin.f32 %v812_v9, 0.0  ;;  %vm890_vm13 = vcmp.gt.f32.partialorder %v812_v9, 0.0 }
 0x161   :  { %4698 = vpow2.f32 %v924_v11  ;;  %v922_v8 = vmul.f32 1.442695, %v906_v58 }
 0x163   :  { %4700 = vpow2.f32 %v922_v8 }
 0x16e   :  { %v4699_v13 = vpop.eup %4698 }
 0x16f   :  { %v4130_v15 = vadd.f32 -1.0, %v4699_v13 }
 0x170   :  { %v4701_v10 = vpop.eup %4700 }
 0x171   :  { %v4129_v17 = vadd.f32 -1.0, %v4701_v10  ;;  %v971_v22 = vsel %vm891_vm14, %v817_v6, %v4130_v15  ;;  %v4928_v6 = vmov 0.0  }
 0x172   :  { %v4498_v16 = vpop.f32.mrf.mxu0  ;;  %1513 = vrot.lane.b32.xlu0 %v4928_v6, %s4923_s29 }
 0x173   :  { %v827_v18 = vadd.f32 %v4498_v16, %v5535_v5  ;;  %v970_v42 = vsel %vm890_vm13, %v812_v9, %v4129_v17 }
 0x174   :  { %v821_v20 = vpop.f32.mrf.mxu0  ;;  %4519 = vmatprep.mubr.msk.f32.mxu1 %vm580_vm6, %v970_v42 }
 0x175   :  { %v909_v23 = vmin.f32 %v827_v18, 0.0  ;;  %v822_v12 = vadd.f32 %v5535_v5, %v821_v20  ;;  %4520 = vmatmul.mubr.msk.f32.vlgmr.msra.gmra.mxu1 %vm580_vm6, %v971_v22  ;;  %vm893_vm13 = vcmp.gt.f32.partialorder %v827_v18, 0.0 }
 0x176   :  { %1560 = vrot.lane.b32.xlu0 %v4928_v6, %s4922_s28 }
 0x177   :  { %v928_v27 = vmul.f32 1.442695, %v909_v23  ;;  %v908_v28 = vmin.f32 %v822_v12, 0.0  ;;  %vm892_vm15 = vcmp.gt.f32.partialorder %v822_v12, 0.0 }
 0x179   :  { %4702 = vpow2.f32 %v928_v27  ;;  %v926_v29 = vmul.f32 1.442695, %v908_v28 }
 0x17a   :  { %1607 = vrot.lane.b32.xlu0 %v4928_v6, %s4924_s13 }
 0x17b   :  { %4704 = vpow2.f32 %v926_v29 }
 0x186   :  { %v4703_v30 = vpop.eup %4702 }
 0x187   :  { %v4132_v31 = vadd.f32 -1.0, %v4703_v30 }
 0x188   :  { %v4705_v33 = vpop.eup %4704 }
 0x189   :  { %v4501_v0 = vpop.f32.mrf.mxu0  ;;  %v4131_v19 = vadd.f32 -1.0, %v4705_v33  ;;  %v973_v41 = vsel %vm893_vm13, %v827_v18, %v4132_v31 }
 0x18a   :  { %v837_v36 = vadd.f32 %v4501_v0, %v5535_v5 }
 0x18b   :  { %v831_v37 = vpop.f32.mrf.mxu0  ;;  %v972_v21 = vsel %vm892_vm15, %v822_v12, %v4131_v19 }
 0x18c   :  { %v911_v26 = vmin.f32 %v837_v36, 0.0  ;;  %v832_v38 = vadd.f32 %v5535_v5, %v831_v37  ;;  %4522 = vmatprep.mubr.msk.f32.mxu1 %vm580_vm6, %v972_v21  ;;  %vm895_vm15 = vcmp.gt.f32.partialorder %v837_v36, 0.0 }
 0x18d   :  { %4523 = vmatmul.mubr.msk.f32.gmra.mxu1 %vm580_vm6, %v973_v41 }
 0x18e   :  { %v932_v25 = vmul.f32 1.442695, %v911_v26  ;;  %v910_v35 = vmin.f32 %v832_v38, 0.0  ;;  %vm894_vm14 = vcmp.gt.f32.partialorder %v832_v38, 0.0 }
 0x190   :  { %4706 = vpow2.f32 %v932_v25  ;;  %v930_v44 = vmul.f32 1.442695, %v910_v35 }
 0x192   :  { %4708 = vpow2.f32 %v930_v44 }
 0x19d   :  { %v4707_v45 = vpop.eup %4706 }
 0x19e   :  { %v4134_v50 = vadd.f32 -1.0, %v4707_v45 }
 0x19f   :  { %v4709_v34 = vpop.eup %4708 }
 0x1a0   :  { %v4133_v39 = vadd.f32 -1.0, %v4709_v34  ;;  %v975_v52 = vsel %vm895_vm15, %v837_v36, %v4134_v50 }
 0x1a1   :  { %v4504_v46 = vpop.f32.mrf.mxu0 }
 0x1a2   :  { %v847_v47 = vadd.f32 %v4504_v46, %v5535_v5  ;;  %v974_v48 = vsel %vm894_vm14, %v832_v38, %v4133_v39 }
 0x1a3   :  { %v841_v51 = vpop.f32.mrf.mxu0  ;;  %4525 = vmatprep.mubr.msk.f32.mxu1 %vm580_vm6, %v974_v48 }
 0x1a4   :  { %v913_v43 = vmin.f32 %v847_v47, 0.0  ;;  %v842_v24 = vadd.f32 %v5535_v5, %v841_v51  ;;  %4526 = vmatmul.mubr.msk.f32.gmra.mxu1 %vm580_vm6, %v975_v52  ;;  %vm897_vm14 = vcmp.gt.f32.partialorder %v847_v47, 0.0 }
 0x1a6   :  { %v936_v14 = vmul.f32 1.442695, %v913_v43  ;;  %v912_v53 = vmin.f32 %v842_v24, 0.0  ;;  %vm896_vm13 = vcmp.gt.f32.partialorder %v842_v24, 0.0 }
 0x1a8   :  { %4710 = vpow2.f32 %v936_v14  ;;  %v934_v54 = vmul.f32 1.442695, %v912_v53 }
 0x1aa   :  { %4712 = vpow2.f32 %v934_v54  ;;  %v5578_v54 = vld [vmem:[%s7119_s4] ss:$0 sm:$0xff] }
 0x1b5   :  { %v4711_v55 = vpop.eup %4710 }
 0x1b6   :  { %v4136_v32 = vadd.f32 -1.0, %v4711_v55 }
 0x1b7   :  { %v4713_v40 = vpop.eup %4712 }
 0x1b8   :  { %v4135_v56 = vadd.f32 -1.0, %v4713_v40  ;;  %v977_v62 = vsel %vm897_vm14, %v847_v47, %v4136_v32 }
 0x1b9   :  { %v4507_v57 = vpop.f32.mrf.mxu0 }
 0x1ba   :  { %v857_v59 = vadd.f32 %v4507_v57, %v5535_v5  ;;  %v976_v60 = vsel %vm896_vm13, %v842_v24, %v4135_v56 }
 0x1bb   :  { %v851_v61 = vpop.f32.mrf.mxu0  ;;  %4528 = vmatprep.mubr.msk.f32.mxu1 %vm580_vm6, %v976_v60 }
 0x1bc   :  { %v915_v3 = vmin.f32 %v857_v59, 0.0  ;;  %v852_v4 = vadd.f32 %v5535_v5, %v851_v61  ;;  %4529 = vmatmul.mubr.msk.f32.gmra.mxu1 %vm580_vm6, %v977_v62  ;;  %vm899_vm13 = vcmp.gt.f32.partialorder %v857_v59, 0.0 }
 0x1be   :  { %v940_v1 = vmul.f32 1.442695, %v915_v3  ;;  %v914_v49 = vmin.f32 %v852_v4, 0.0  ;;  %vm898_vm15 = vcmp.gt.f32.partialorder %v852_v4, 0.0 }
 0x1c0   :  { %4714 = vpow2.f32 %v940_v1  ;;  %v938_v2 = vmul.f32 1.442695, %v914_v49 }
 0x1c2   :  { %4716 = vpow2.f32 %v938_v2  ;;  %v4906_v2 = vld [vmem:[%s7115_s0 + $0x8] sm:$0xff] }
 0x1cd   :  { %v4715_v63 = vpop.eup %4714 }
 0x1ce   :  { %v4138_v9 = vadd.f32 -1.0, %v4715_v63 }
 0x1cf   :  { %v4717_v7 = vpop.eup %4716 }
 0x1d0   :  { %v4137_v11 = vadd.f32 -1.0, %v4717_v7  ;;  %v979_v15 = vsel %vm899_vm13, %v857_v59, %v4138_v9 }
 0x1d1   :  { %v4510_v58 = vpop.f32.mrf.mxu0 }
 0x1d2   :  { %v867_v8 = vadd.f32 %v4510_v58, %v5535_v5  ;;  %v978_v13 = vsel %vm898_vm15, %v852_v4, %v4137_v11  ;;  %v4907_v58 = vld [vmem:[%s7115_s0] sm:$0xff] }
 0x1d3   :  { %v861_v10 = vpop.f32.mrf.mxu0  ;;  %4531 = vmatprep.mubr.msk.f32.mxu1 %vm580_vm6, %v978_v13 }
 0x1d4   :  { %v917_v17 = vmin.f32 %v867_v8, 0.0  ;;  %v862_v16 = vadd.f32 %v5535_v5, %v861_v10  ;;  %4532 = vmatmul.mubr.msk.f32.gmra.mxu1 %vm580_vm6, %v979_v15  ;;  %vm901_vm15 = vcmp.gt.f32.partialorder %v867_v8, 0.0 }
 0x1d6   :  { %v944_v18 = vmul.f32 1.442695, %v917_v17  ;;  %v916_v42 = vmin.f32 %v862_v16, 0.0  ;;  %vm900_vm14 = vcmp.gt.f32.partialorder %v862_v16, 0.0 }
 0x1d8   :  { %4718 = vpow2.f32 %v944_v18  ;;  %v942_v20 = vmul.f32 1.442695, %v916_v42 }
 0x1da   :  { %4720 = vpow2.f32 %v942_v20 }
 0x1e5   :  { %v4719_v22 = vpop.eup %4718 }
 0x1e6   :  { %v4140_v12 = vadd.f32 -1.0, %v4719_v22 }
 0x1e7   :  { %v4721_v23 = vpop.eup %4720 }
 0x1e8   :  { %v4139_v27 = vadd.f32 -1.0, %v4721_v23  ;;  %v981_v31 = vsel %vm901_vm15, %v867_v8, %v4140_v12 }
 0x1e9   :  { %v4513_v28 = vpop.f32.mrf.mxu0 }
 0x1ea   :  { %v877_v29 = vadd.f32 %v4513_v28, %v5535_v5  ;;  %v980_v30 = vsel %vm900_vm14, %v862_v16, %v4139_v27 }
 0x1eb   :  { %v871_v33 = vpop.f32.mrf.mxu0  ;;  %4534 = vmatprep.mubr.msk.f32.mxu1 %vm580_vm6, %v980_v30 }
 0x1ec   :  { %v919_v0 = vmin.f32 %v877_v29, 0.0  ;;  %v872_v19 = vadd.f32 %v5535_v5, %v871_v33  ;;  %4535 = vmatmul.mubr.msk.f32.gmra.mxu1 %vm580_vm6, %v981_v31  ;;  %vm903_vm14 = vcmp.gt.f32.partialorder %v877_v29, 0.0  ;;  %v4184_v33 = vld [vmem:[%s7116_s1 + $0x68] sm:$0xff] }
 0x1ed   :  { %4543 = vmatprep.subr.mxu1 %v4184_v33 }
 0x1ee   :  { %v948_v36 = vmul.f32 1.442695, %v919_v0  ;;  %v918_v37 = vmin.f32 %v872_v19, 0.0  ;;  %vm902_vm13 = vcmp.gt.f32.partialorder %v872_v19, 0.0  ;;  %4544 = vmatpush3.msra.mxu1 %v4184_v33 }
 0x1f0   :  { %4722 = vpow2.f32 %v948_v36  ;;  %v946_v21 = vmul.f32 1.442695, %v918_v37 }
 0x1f2   :  { %4724 = vpow2.f32 %v946_v21 }
 0x1f6   :  { %v4516_v26 = vpop.f32.mrf.mxu0 }
 0x1f7   :  { %v887_v38 = vadd.f32 %v4516_v26, %v5535_v5 }
 0x1f8   :  { %v881_v41 = vpop.f32.mrf.mxu0 }
 0x1f9   :  { %v921_v25 = vmin.f32 %v887_v38, 0.0  ;;  %v882_v35 = vadd.f32 %v5535_v5, %v881_v41  ;;  %vm905_vm1 = vcmp.gt.f32.partialorder %v887_v38, 0.0  ;;  %v4908_v41 = vld [vmem:[%s7115_s0 + $0x18] sm:$0xff] }
 0x1fb   :  { %v952_v44 = vmul.f32 1.442695, %v921_v25  ;;  %v920_v45 = vmin.f32 %v882_v35, 0.0  ;;  %vm904_vm15 = vcmp.gt.f32.partialorder %v882_v35, 0.0 }
 0x1fd   :  { %v4723_v34 = vpop.eup %4722  ;;  %4726 = vpow2.f32 %v952_v44  ;;  %v950_v50 = vmul.f32 1.442695, %v920_v45 }
 0x1fe   :  { %v4142_v46 = vadd.f32 -1.0, %v4723_v34 }
 0x1ff   :  { %v4725_v39 = vpop.eup %4724  ;;  %4728 = vpow2.f32 %v950_v50 }
 0x200   :  { %v4141_v47 = vadd.f32 -1.0, %v4725_v39  ;;  %v983_v51 = vsel %vm903_vm14, %v877_v29, %v4142_v46  ;;  %vm1349_vm14 = vcmask 1046528   ;;  %v4181_v39 = vld [vmem:[%s7116_s1 + $0x50] sm:$0xff] }
 0x202   :  { %v982_v48 = vsel %vm902_vm13, %v872_v19, %v4141_v47  ;;  %v4183_v19 = vld [vmem:[%s7116_s1 + $0x60] sm:$0xff] }
 0x203   :  { %4537 = vmatprep.mubr.msk.f32.mxu1 %vm580_vm6, %v982_v48  ;;  %4545 = vmatprep.subr.mxu1 %v4183_v19 }
 0x204   :  { %4538 = vmatmul.mubr.msk.f32.gmra.mxu1 %vm580_vm6, %v983_v51  ;;  %v4180_v51 = vld [vmem:[%s7116_s1 + $0x48] sm:$0xff] }
 0x205   :  { %4546 = vmatpush3.msra.mxu1 %v4183_v19 }
 0x20a   :  { %v4727_v52 = vpop.eup %4726 }
 0x20b   :  { %v4144_v5 = vadd.f32 -1.0, %v4727_v52 }
 0x20c   :  { %v4729_v43 = vpop.eup %4728 }
 0x20d   :  { %v4143_v24 = vadd.f32 -1.0, %v4729_v43  ;;  %v985_v53 = vsel %vm905_vm1, %v887_v38, %v4144_v5  ;;  %v4182_v38 = vld [vmem:[%s7116_s1 + $0x58] sm:$0xff] }
 0x20e   :  { %4547 = vmatprep.subr.mxu1 %v4182_v38 }
 0x20f   :  { %v984_v14 = vsel %vm904_vm15, %v882_v35, %v4143_v24  ;;  %4548 = vmatpush3.msra.mxu1 %v4182_v38 }
 0x210   :  { %4540 = vmatprep.mubr.msk.f32.mxu1 %vm580_vm6, %v984_v14  ;;  %4549 = vmatprep.subr.mxu1 %v4181_v39 }
 0x211   :  { %4541 = vmatmul.mubr.msk.f32.gmra.mxu1 %vm580_vm6, %v985_v53  ;;  %v4179_v53 = vld [vmem:[%s7116_s1 + $0x40] sm:$0xff] }
 0x212   :  { %4550 = vmatpush3.msra.mxu1 %v4181_v39 }
 0x213   :  { %4551 = vmatprep.subr.mxu1 %v4180_v51 }
 0x214   :  { %4552 = vmatpush3.msra.mxu1 %v4180_v51 }
 0x215   :  { %4553 = vmatprep.subr.mxu1 %v4179_v53 }
 0x216   :  { %4554 = vmatpush3.msra.mxu1 %v4179_v53 }
 0x235   :  { %v4521_v55 = vpop.f32.mrf.mxu1 }
 0x236   :  { %v1114_v40 = vadd.f32 %v4521_v55, %v5578_v54  ;;  %v4178_v55 = vld [vmem:[%s7116_s1 + $0x38] sm:$0xff] }
 0x237   :  { %v1108_v32 = vpop.f32.mrf.mxu1  ;;  %4555 = vmatprep.subr.mxu1 %v4178_v55 }
 0x238   :  { %v1204_v56 = vmin.f32 %v1114_v40, 0.0  ;;  %v1109_v57 = vadd.f32 %v5578_v54, %v1108_v32  ;;  %vm1188_vm1 = vcmp.gt.f32.partialorder %v1114_v40, 0.0  ;;  %4556 = vmatpush3.msra.mxu1 %v4178_v55 }
 0x23a   :  { %v1221_v59 = vmul.f32 1.442695, %v1204_v56  ;;  %v1203_v60 = vmin.f32 %v1109_v57, 0.0  ;;  %vm1187_vm13 = vcmp.gt.f32.partialorder %v1109_v57, 0.0 }
 0x23c   :  { %4730 = vpow2.f32 %v1221_v59  ;;  %v1219_v61 = vmul.f32 1.442695, %v1203_v60 }
 0x23e   :  { %4732 = vpow2.f32 %v1219_v61 }
 0x249   :  { %v4731_v62 = vpop.eup %4730 }
 0x24a   :  { %v4163_v3 = vadd.f32 -1.0, %v4731_v62 }
 0x24b   :  { %v4733_v4 = vpop.eup %4732 }
 0x24c   :  { %v1268_v1 = vsel %vm1188_vm1, %v1114_v40, %v4163_v3  ;;  %v4162_v49 = vadd.f32 -1.0, %v4733_v4  ;;  %v4909_v40 = vld [vmem:[%s7115_s0 + $0x10] sm:$0xff] }
 0x24d   :  { %v5585_v63 = vadd.f32 %v4906_v2, %v1268_v1  ;;  %v4524_v7 = vpop.f32.mrf.mxu1 }
 0x24e   :  { %v1267_v9 = vsel %vm1187_vm13, %v1109_v57, %v4162_v49  ;;  %v1124_v11 = vadd.f32 %v4524_v7, %v5578_v54 }
 0x24f   :  { %v5591_v8 = vadd.f32 %v4907_v58, %v1267_v9  ;;  %1754 = vrot.lane.b32.xlu0 %v5585_v63, %s4927_s30  ;;  %v1118_v13 = vpop.f32.mrf.mxu1  ;;  %v1351_v28 = vrot.slane %v5585_v63, 1  ;;  %v1381_v34 = vrot.slane %v5585_v63, 4  ;;  %v1411_v14 = vrot.slane %v5585_v63, 7 }
 0x250   :  { %v1206_v10 = vmin.f32 %v1124_v11, 0.0  ;;  %v1119_v15 = vadd.f32 %v5578_v54, %v1118_v13  ;;  %vm1190_vm15 = vcmp.gt.f32.partialorder %v1124_v11, 0.0  ;;  %v1443_v59 = vrot.slane %v5585_v63, 2  ;;  %v4910_v13 = vld [vmem:[%s7115_s0 + $0x28] sm:$0xff] }
 0x251   :  { %1752 = vrot.lane.b32.xlu1 %v5591_v8, %s4927_s30  ;;  %v1350_v17 = vrot.slane %v5591_v8, 1  ;;  %v1380_v22 = vrot.slane %v5591_v8, 4  ;;  %v1410_v12 = vrot.slane %v5591_v8, 7  ;;  %v1476_v30 = vrot.slane %v5591_v8, 5 }
 0x252   :  { %v1225_v16 = vmul.f32 1.442695, %v1206_v10  ;;  %v1205_v18 = vmin.f32 %v1119_v15, 0.0  ;;  %v1442_v50 = vrot.slane %v5591_v8, 2  ;;  %vm1189_vm1 = vcmp.gt.f32.partialorder %v1119_v15, 0.0 }
 0x253   :  { %v1378_v42 = vsel %vm1349_vm14, 0.0, %v1350_v17  ;;  %v1408_v23 = vsel %vm142_vm0, 0.0, %v1380_v22  ;;  %v1438_v27 = vsel %vm247_vm4, 0.0, %v1410_v12  ;;  %v1352_v29 = vsel %vm1349_vm14, %v1350_v17, %v1351_v28 }
 0x254   :  { %4734 = vpow2.f32 %v1225_v16  ;;  %v1223_v20 = vmul.f32 1.442695, %v1205_v18  ;;  %v1508_v26 = vsel %vm177_vm2, 0.0, %v1476_v30  ;;  %v1382_v48 = vsel %vm142_vm0, %v1380_v22, %v1381_v34 }
 0x255   :  { %1515 = vrot.lane.b32.xlu1 %v1378_v42, %s4923_s29  ;;  %v1474_v24 = vsel %vm58_vm5, 0.0, %v1442_v50  ;;  %v1412_v57 = vsel %vm247_vm4, %v1410_v12, %v1411_v14  ;;  %v1444_v60 = vsel %vm58_vm5, %v1442_v50, %v1443_v59  ;;  %v1477_v61 = vrot.slane %v5585_v63, 5 }
 0x256   :  { %4736 = vpow2.f32 %v1223_v20 }
 0x257   :  { %v1478_v3 = vsel %vm177_vm2, %v1476_v30, %v1477_v61 }
 0x259   :  { %1562 = vrot.lane.b32.xlu1 %v1408_v23, %s4922_s28 }
 0x25d   :  { %1609 = vrot.lane.b32.xlu1 %v1438_v27, %s4924_s13 }
 0x261   :  { %v4735_v31 = vpop.eup %4734  ;;  %1517 = vrot.lane.b32.xlu1 %v1352_v29, %s4923_s29 }
 0x262   :  { %v4165_v0 = vadd.f32 -1.0, %v4735_v31 }
 0x263   :  { %v4737_v36 = vpop.eup %4736 }
 0x264   :  { %v1270_v37 = vsel %vm1190_vm15, %v1124_v11, %v4165_v0  ;;  %v4527_v21 = vpop.f32.mrf.mxu1  ;;  %v4164_v35 = vadd.f32 -1.0, %v4737_v36 }
 0x265   :  { %v5628_v25 = vadd.f32 %v4908_v41, %v1270_v37  ;;  %v1134_v44 = vadd.f32 %v4527_v21, %v5578_v54  ;;  %1704 = vrot.lane.b32.xlu1 %v1508_v26, %s4926_s23  ;;  %v4911_v26 = vld [vmem:[%s7115_s0 + $0x20] sm:$0xff] }
 0x266   :  { %v1128_v45 = vpop.f32.mrf.mxu1  ;;  %v1269_v52 = vsel %vm1189_vm1, %v1119_v15, %v4164_v35 }
 0x267   :  { %v1208_v46 = vmin.f32 %v1134_v44, 0.0  ;;  %1758 = vrot.lane.b32.xlu0 %v5628_v25, %s4927_s30  ;;  %v5640_v47 = vadd.f32 %v5578_v54, %v1128_v45  ;;  %v5662_v32 = vadd.f32 %v4909_v40, %v1269_v52  ;;  %v1355_v49 = vrot.slane %v5628_v25, 1 }
 0x268   :  { %vm1192_vm13 = vcmp.gt.f32.partialorder %v1134_v44, 0.0  ;;  %v1385_v22 = vrot.slane %v5628_v25, 4  ;;  %v1415_v0 = vrot.slane %v5628_v25, 7  ;;  %v1447_v35 = vrot.slane %v5628_v25, 2 }
 0x269   :  { %v1229_v43 = vmul.f32 1.442695, %v1208_v46  ;;  %v1207_v5 = vmin.f32 %v5640_v47, 0.0  ;;  %1564 = vrot.lane.b32.xlu1 %v1382_v48, %s4922_s28  ;;  %v1413_v62 = vrot.slane %v5662_v32, 7  ;;  %v1353_v1 = vrot.slane %v5662_v32, 1  ;;  %v4912_v48 = vld [vmem:[%s7115_s0 + $0x38] sm:$0xff] }
 0x26a   :  { %v1479_v9 = vrot.slane %v5662_v32, 5  ;;  %v1383_v16 = vrot.slane %v5662_v32, 4  ;;  %vm1191_vm15 = vcmp.gt.f32.partialorder %v5640_v47, 0.0  ;;  %v1481_v45 = vrot.slane %v5628_v25, 5 }
 0x26b   :  { %4738 = vpow2.f32 %v1229_v43  ;;  %1654 = vrot.lane.b32.xlu0 %v1474_v24, %s4925_s20  ;;  %v1227_v56 = vmul.f32 1.442695, %v1207_v5  ;;  %v1414_v4 = vsel %vm247_vm4, %v1411_v14, %v1413_v62  ;;  %v1356_v7 = vsel %vm1349_vm14, %v1353_v1, %v1355_v49 }
 0x26c   :  { %v1480_v17 = vsel %vm177_vm2, %v1477_v61, %v1479_v9  ;;  %v1386_v29 = vsel %vm142_vm0, %v1383_v16, %v1385_v22  ;;  %v1354_v33 = vsel %vm1349_vm14, %v1351_v28, %v1353_v1  ;;  %v1416_v36 = vsel %vm247_vm4, %v1413_v62, %v1415_v0 }
 0x26d   :  { %1611 = vrot.lane.b32.xlu1 %v1412_v57, %s4924_s13  ;;  %4740 = vpow2.f32 %v1227_v56  ;;  %v1384_v37 = vsel %vm142_vm0, %v1381_v34, %v1383_v16  ;;  %v1445_v28 = vrot.slane %v5662_v32, 2  ;;  %v1482_v39 = vsel %vm177_vm2, %v1479_v9, %v1481_v45 }
 0x26f   :  { %1656 = vrot.lane.b32.xlu0 %v1444_v60, %s4925_s20  ;;  %v1446_v41 = vsel %vm58_vm5, %v1443_v59, %v1445_v28 }
 0x271   :  { %1756 = vrot.lane.b32.xlu1 %v5662_v32, %s4927_s30 }
 0x273   :  { %1706 = vrot.lane.b32.xlu0 %v1478_v3, %s4926_s23 }
 0x275   :  { %1613 = vrot.lane.b32.xlu1 %v1414_v4, %s4924_s13 }
 0x278   :  { %v4739_v2 = vpop.eup %4738 }
 0x279   :  { %v4167_v11 = vadd.f32 -1.0, %v4739_v2  ;;  %1521 = vrot.lane.b32.xlu1 %v1356_v7, %s4923_s29 }
 0x27a   :  { %v4741_v18 = vpop.eup %4740 }
 0x27b   :  { %v1272_v58 = vsel %vm1192_vm13, %v1134_v44, %v4167_v11  ;;  %v4166_v27 = vadd.f32 -1.0, %v4741_v18  ;;  %v1448_v44 = vsel %vm58_vm5, %v1445_v28, %v1447_v35 }
 0x27c   :  { %v5687_v10 = vadd.f32 %v4910_v13, %v1272_v58  ;;  %v4530_v15 = vpop.f32.mrf.mxu1  ;;  %v4913_v58 = vld [vmem:[%s7115_s0 + $0x30] sm:$0xff] }
 0x27d   :  { %v1144_v42 = vadd.f32 %v4530_v15, %v5578_v54  ;;  %1708 = vrot.lane.b32.xlu1 %v1480_v17, %s4926_s23  ;;  %v1271_v19 = vsel %vm1191_vm15, %v5640_v47, %v4166_v27 }
 0x27e   :  { %v1138_v20 = vpop.f32.mrf.mxu1  ;;  %1762 = vrot.lane.b32.xlu0 %v5687_v10, %s4927_s30  ;;  %v5719_v38 = vadd.f32 %v4911_v26, %v1271_v19  ;;  %v1359_v4 = vrot.slane %v5687_v10, 1  ;;  %v1451_v11 = vrot.slane %v5687_v10, 2  ;;  %v1485_v16 = vrot.slane %v5687_v10, 5 }
 0x27f   :  { %v1210_v23 = vmin.f32 %v1144_v42, 0.0  ;;  %v5697_v12 = vadd.f32 %v5578_v54, %v1138_v20  ;;  %vm1194_vm1 = vcmp.gt.f32.partialorder %v1144_v42, 0.0  ;;  %v1389_v18 = vrot.slane %v5687_v10, 4 }
 0x280   :  { %v1357_v46 = vrot.slane %v5719_v38, 1  ;;  %v1387_v24 = vrot.slane %v5719_v38, 4  ;;  %v1417_v14 = vrot.slane %v5719_v38, 7  ;;  %v1449_v61 = vrot.slane %v5719_v38, 2 }
 0x281   :  { %v1233_v30 = vmul.f32 1.442695, %v1210_v23  ;;  %1568 = vrot.lane.b32.xlu1 %v1386_v29, %s4922_s28  ;;  %v1209_v31 = vmin.f32 %v5697_v12, 0.0  ;;  %vm1193_vm13 = vcmp.gt.f32.partialorder %v5697_v12, 0.0  ;;  %v1483_v2 = vrot.slane %v5719_v38, 5 }
 0x282   :  { %1519 = vrot.lane.b32.xlu0 %v1354_v33, %s4923_s29  ;;  %v1358_v5 = vsel %vm1349_vm14, %v1355_v49, %v1357_v46  ;;  %v1388_v59 = vsel %vm142_vm0, %v1385_v22, %v1387_v24  ;;  %v1418_v60 = vsel %vm247_vm4, %v1415_v0, %v1417_v14  ;;  %v1450_v1 = vsel %vm58_vm5, %v1447_v35, %v1449_v61 }
 0x283   :  { %4742 = vpow2.f32 %v1233_v30  ;;  %v1231_v21 = vmul.f32 1.442695, %v1209_v31  ;;  %v1360_v49 = vsel %vm1349_vm14, %v1357_v46, %v1359_v4  ;;  %v1452_v15 = vsel %vm58_vm5, %v1449_v61, %v1451_v11 }
 0x284   :  { %v1484_v17 = vsel %vm177_vm2, %v1481_v45, %v1483_v2  ;;  %v1390_v20 = vsel %vm142_vm0, %v1387_v24, %v1389_v18  ;;  %v1419_v23 = vrot.slane %v5687_v10, 7 }
 0x285   :  { %1615 = vrot.lane.b32.xlu1 %v1416_v36, %s4924_s13  ;;  %4744 = vpow2.f32 %v1231_v21 }
 0x286   :  { %1566 = vrot.lane.b32.xlu0 %v1384_v37, %s4922_s28  ;;  %v1420_v30 = vsel %vm247_vm4, %v1417_v14, %v1419_v23  ;;  %v4915_v14 = vld [vmem:[%s7115_s0 + $0x40] sm:$0xff] }
 0x289   :  { %1760 = vrot.lane.b32.xlu1 %v5719_v38, %s4927_s30 }
 0x28a   :  { %1658 = vrot.lane.b32.xlu0 %v1446_v41, %s4925_s20  ;;  %v4914_v41 = vld [vmem:[%s7115_s0 + $0x48] sm:$0xff] }
 0x28e   :  { %1660 = vrot.lane.b32.xlu0 %v1448_v44, %s4925_s20 }
 0x290   :  { %v4743_v34 = vpop.eup %4742 }
 0x291   :  { %v4169_v50 = vadd.f32 -1.0, %v4743_v34 }
 0x292   :  { %1710 = vrot.lane.b32.xlu0 %v1482_v39, %s4926_s23  ;;  %v4745_v55 = vpop.eup %4744 }
 0x293   :  { %v1274_v47 = vsel %vm1194_vm1, %v1144_v42, %v4169_v50  ;;  %v4168_v62 = vadd.f32 -1.0, %v4745_v55  ;;  %v1486_v42 = vsel %vm177_vm2, %v1483_v2, %v1485_v16 }
 0x294   :  { %v5735_v51 = vadd.f32 %v4912_v48, %v1274_v47  ;;  %v4533_v52 = vpop.f32.mrf.mxu1 }
 0x295   :  { %v1154_v43 = vadd.f32 %v4533_v52, %v5578_v54  ;;  %v1273_v7 = vsel %vm1193_vm13, %v5697_v12, %v4168_v62 }
 0x296   :  { %v1148_v53 = vpop.f32.mrf.mxu1  ;;  %1523 = vrot.lane.b32.xlu0 %v1358_v5, %s4923_s29  ;;  %1766 = vrot.lane.b32.xlu1 %v5735_v51, %s4927_s30  ;;  %v5765_v13 = vadd.f32 %v4913_v58, %v1273_v7  ;;  %v1489_v5 = vrot.slane %v5735_v51, 5  ;;  %v1455_v24 = vrot.slane %v5735_v51, 2 }
 0x297   :  { %v1212_v40 = vmin.f32 %v1154_v43, 0.0  ;;  %v5745_v56 = vadd.f32 %v5578_v54, %v1148_v53  ;;  %vm1196_vm15 = vcmp.gt.f32.partialorder %v1154_v43, 0.0 }
 0x298   :  { %v1361_v22 = vrot.slane %v5765_v13, 1  ;;  %v1391_v33 = vrot.slane %v5765_v13, 4  ;;  %v1453_v37 = vrot.slane %v5765_v13, 2  ;;  %v1487_v34 = vrot.slane %v5765_v13, 5 }
 0x299   :  { %v1237_v57 = vmul.f32 1.442695, %v1212_v40  ;;  %v1211_v3 = vmin.f32 %v5745_v56, 0.0  ;;  %v1421_v50 = vrot.slane %v5765_v13, 7  ;;  %vm1195_vm1 = vcmp.gt.f32.partialorder %v5745_v56, 0.0 }
 0x29a   :  { %1570 = vrot.lane.b32.xlu0 %v1388_v59, %s4922_s28  ;;  %1617 = vrot.lane.b32.xlu1 %v1418_v60, %s4924_s13  ;;  %v1362_v29 = vsel %vm1349_vm14, %v1359_v4, %v1361_v22  ;;  %v1392_v36 = vsel %vm142_vm0, %v1389_v18, %v1391_v33  ;;  %v1454_v45 = vsel %vm58_vm5, %v1451_v11, %v1453_v37  ;;  %v1514_v4 = vpop.permute.xlu0 %1513 }
 0x29b   :  { %4746 = vpow2.f32 %v1237_v57  ;;  %v1235_v9 = vmul.f32 1.442695, %v1211_v3  ;;  %v1488_v47 = vsel %vm177_vm2, %v1485_v16, %v1487_v34  ;;  %v1422_v48 = vsel %vm247_vm4, %v1419_v23, %v1421_v50 }
 0x29c   :  { %v1490_v55 = vsel %vm177_vm2, %v1487_v34, %v1489_v5  ;;  %v1456_v40 = vsel %vm58_vm5, %v1453_v37, %v1455_v24  ;;  %v5888_v24 = vsel %vm580_vm6, 0.0, %v1514_v4  ;;  %v4918_v4 = vld [vmem:[%s7115_s0 + $0x68] sm:$0xff] }
 0x29d   :  { %4748 = vpow2.f32 %v1235_v9 }
 0x29e   :  { %1662 = vrot.lane.b32.xlu0 %v1450_v1, %s4925_s20  ;;  %1525 = vrot.lane.b32.xlu1 %v1360_v49, %s4923_s29  ;;  %v4916_v49 = vld [vmem:[%s7115_s0 + $0x58] sm:$0xff] }
 0x2a2   :  { %1664 = vrot.lane.b32.xlu0 %v1452_v15, %s4925_s20  ;;  %1712 = vrot.lane.b32.xlu1 %v1484_v17, %s4926_s23 }
 0x2a6   :  { %1714 = vrot.lane.b32.xlu0 %v1486_v42, %s4926_s23  ;;  %1572 = vrot.lane.b32.xlu1 %v1390_v20, %s4922_s28  ;;  %v1561_v20 = vpop.permute.xlu0 %1560 }
 0x2a8   :  { %v4747_v12 = vpop.eup %4746 }
 0x2a9   :  { %v4171_v27 = vadd.f32 -1.0, %v4747_v12 }
 0x2aa   :  { %1527 = vrot.lane.b32.xlu0 %v1362_v29, %s4923_s29  ;;  %1619 = vrot.lane.b32.xlu1 %v1420_v30, %s4924_s13  ;;  %v4749_v28 = vpop.eup %4748  ;;  %v1608_v37 = vpop.permute.xlu0 %1607 }
 0x2ab   :  { %v1276_v0 = vsel %vm1196_vm15, %v1154_v43, %v4171_v27  ;;  %v4170_v39 = vadd.f32 -1.0, %v4749_v28 }
 0x2ac   :  { %v4536_v31 = vpop.f32.mrf.mxu1  ;;  %v5793_v35 = vadd.f32 %v4914_v41, %v1276_v0 }
 0x2ad   :  { %v1164_v19 = vadd.f32 %v4536_v31, %v5578_v54  ;;  %v1275_v52 = vsel %vm1195_vm1, %v5745_v56, %v4170_v39 }
 0x2ae   :  { %1574 = vrot.lane.b32.xlu0 %v1392_v36, %s4922_s28  ;;  %1764 = vrot.lane.b32.xlu1 %v5765_v13, %s4927_s30  ;;  %v1158_v26 = vpop.f32.mrf.mxu1  ;;  %v5816_v53 = vadd.f32 %v4915_v14, %v1275_v52  ;;  %v1364_v18 = vrot.slane %v5793_v35, 1  ;;  %v1424_v39 = vrot.slane %v5793_v35, 7 }
 0x2af   :  { %v1214_v21 = vmin.f32 %v1164_v19, 0.0  ;;  %v5799_v46 = vadd.f32 %v5578_v54, %v1158_v26  ;;  %vm1198_vm13 = vcmp.gt.f32.partialorder %v1164_v19, 0.0  ;;  %v1458_v26 = vrot.slane %v5793_v35, 2 }
 0x2b0   :  { %v1393_v57 = vrot.slane %v5816_v53, 4  ;;  %v1423_v62 = vrot.slane %v5816_v53, 7  ;;  %v1363_v58 = vrot.slane %v5816_v53, 1  ;;  %v1491_v42 = vrot.slane %v5816_v53, 5 }
 0x2b1   :  { %v1241_v44 = vmul.f32 1.442695, %v1214_v21  ;;  %v1213_v43 = vmin.f32 %v5799_v46, 0.0  ;;  %v1457_v27 = vrot.slane %v5816_v53, 2  ;;  %v1394_v21 = vrot.slane %v5793_v35, 4 }
 0x2b2   :  { %1666 = vrot.lane.b32.xlu0 %v1454_v45, %s4925_s20  ;;  %1770 = vrot.lane.b32.xlu1 %v5793_v35, %s4927_s30  ;;  %v1409_v61 = vsel %vm142_vm0, 0.0, %v1393_v57  ;;  %v1439_v11 = vsel %vm247_vm4, 0.0, %v1423_v62  ;;  %v1365_v23 = vsel %vm1349_vm14, %v1363_v58, %v1364_v18  ;;  %v1379_v12 = vsel %vm1349_vm14, 0.0, %v1363_v58 }
 0x2b3   :  { %4750 = vpow2.f32 %v1241_v44  ;;  %v1239_v56 = vmul.f32 1.442695, %v1213_v43  ;;  %v1509_v31 = vsel %vm177_vm2, 0.0, %v1491_v42  ;;  %v1475_v0 = vsel %vm58_vm5, 0.0, %v1457_v27 }
 0x2b4   :  { %vm1197_vm15 = vcmp.gt.f32.partialorder %v5799_v46, 0.0  ;;  %v1395_v41 = vsel %vm142_vm0, %v1393_v57, %v1394_v21  ;;  %v1459_v44 = vsel %vm58_vm5, %v1457_v27, %v1458_v26 }
 0x2b5   :  { %4752 = vpow2.f32 %v1239_v56 }
 0x2b6   :  { %1716 = vrot.lane.b32.xlu0 %v1488_v47, %s4926_s23  ;;  %1621 = vrot.lane.b32.xlu1 %v1422_v48, %s4924_s13  ;;  %v1492_v47 = vrot.slane %v5793_v35, 5  ;;  %v4917_v48 = vld [vmem:[%s7115_s0 + $0x50] sm:$0xff] }
 0x2b8   :  { %v1493_v5 = vsel %vm177_vm2, %v1491_v42, %v1492_v47 }
 0x2ba   :  { %1718 = vrot.lane.b32.xlu0 %v1490_v55, %s4926_s23  ;;  %1668 = vrot.lane.b32.xlu1 %v1456_v40, %s4925_s20 }
 0x2be   :  { %1768 = vrot.lane.b32.xlu0 %v5816_v53, %s4927_s30 }
 0x2c0   :  { %v4751_v59 = vpop.eup %4750 }
 0x2c1   :  { %v4173_v60 = vadd.f32 -1.0, %v4751_v59  ;;  %v1755_v43 = vpop.permute.xlu0 %1754 }
 0x2c2   :  { %1576 = vrot.lane.b32.xlu0 %v1409_v61, %s4922_s28  ;;  %v4753_v30 = vpop.eup %4752 }
 0x2c3   :  { %v1278_v3 = vsel %vm1198_vm13, %v1164_v19, %v4173_v60  ;;  %v5828_v1 = vpop.permute.xlu1 %1752  ;;  %v4172_v19 = vadd.f32 -1.0, %v4753_v30  ;;  %v5895_v60 = vsel %vm597_vm7, %v5888_v24, %v1561_v20 }
 0x2c4   :  { %v5833_v2 = vadd.f32 %v4916_v49, %v1278_v3  ;;  %v4539_v7 = vpop.f32.mrf.mxu1 }
 0x2c5   :  { %v1174_v9 = vadd.f32 %v4539_v7, %v5578_v54  ;;  %v1277_v45 = vsel %vm1197_vm15, %v5799_v46, %v4172_v19  ;;  %v1425_v46 = vsel %vm247_vm4, %v1423_v62, %v1424_v39  ;;  %v5908_v7 = vsel %vm614_vm8, %v5895_v60, %v1608_v37 }
 0x2c6   :  { %1623 = vrot.lane.b32.xlu0 %v1439_v11, %s4924_s13  ;;  %1774 = vrot.lane.b32.xlu1 %v5833_v2, %s4927_s30  ;;  %v1168_v17 = vpop.f32.mrf.mxu1  ;;  %v5881_v52 = vadd.f32 %v4917_v48, %v1277_v45 }
 0x2c7   :  { %v1216_v15 = vmin.f32 %v1174_v9, 0.0  ;;  %v5841_v16 = vpop.permute.xlu1 %1515  ;;  %v5851_v29 = vadd.f32 %v5578_v54, %v1168_v17  ;;  %vm1200_vm1 = vcmp.gt.f32.partialorder %v1174_v9, 0.0 }
 0x2c8   :  { %v1426_v59 = vrot.slane %v5881_v52, 7  ;;  %v1801_v19 = vsel %vm580_vm6, 0.0, %v5841_v16  ;;  %v1460_v48 = vrot.slane %v5881_v52, 2 }
 0x2c9   :  { %v1245_v22 = vmul.f32 1.442695, %v1216_v15  ;;  %v1215_v36 = vmin.f32 %v5851_v29, 0.0  ;;  %vm1199_vm13 = vcmp.gt.f32.partialorder %v5851_v29, 0.0 }
 0x2ca   :  { %1531 = vrot.lane.b32.xlu0 %v1365_v23, %s4923_s29  ;;  %1529 = vrot.lane.b32.xlu1 %v1379_v12, %s4923_s29  ;;  %v1427_v58 = vsel %vm247_vm4, %v1424_v39, %v1426_v59 }
 0x2cb   :  { %4754 = vpow2.f32 %v1245_v22  ;;  %v5855_v33 = vpop.permute.xlu1 %1562  ;;  %v1243_v34 = vmul.f32 1.442695, %v1215_v36  ;;  %v1368_v22 = vrot.slane %v5833_v2, 1 }
 0x2cc   :  { %v1816_v37 = vsel %vm597_vm7, %v1801_v19, %v5855_v33 }
 0x2cd   :  { %4756 = vpow2.f32 %v1243_v34 }
 0x2ce   :  { %1720 = vrot.lane.b32.xlu0 %v1509_v31, %s4926_s23  ;;  %1670 = vrot.lane.b32.xlu1 %v1475_v0, %s4925_s20  ;;  %v1494_v31 = vrot.slane %v5881_v52, 5  ;;  %v1396_v0 = vrot.slane %v5881_v52, 4 }
 0x2cf   :  { %v1610_v28 = vpop.permute.xlu1 %1609 }
 0x2d0   :  { %v1495_v34 = vsel %vm177_vm2, %v1492_v47, %v1494_v31  ;;  %v1397_v39 = vsel %vm142_vm0, %v1394_v21, %v1396_v0  ;;  %v1398_v47 = vrot.slane %v5833_v2, 4 }
 0x2d1   :  { %v4542_v14 = vpop.f32.mrf.mxu1 }
 0x2d2   :  { %1578 = vrot.lane.b32.xlu0 %v1395_v41, %s4922_s28  ;;  %1672 = vrot.lane.b32.xlu1 %v1459_v44, %s4925_s20  ;;  %v5946_v44 = vadd.f32 %v4542_v14, %v5578_v54  ;;  %v1399_v21 = vsel %vm142_vm0, %v1396_v0, %v1398_v47 }
 0x2d3   :  { %v5874_v50 = vpop.permute.xlu1 %1517  ;;  %v1178_v62 = vpop.f32.mrf.mxu1 }
 0x2d4   :  { %v5915_v15 = vadd.f32 %v5578_v54, %v1178_v62  ;;  %v1218_v14 = vmin.f32 %v5946_v44, 0.0 }
 0x2d6   :  { %1625 = vrot.lane.b32.xlu0 %v1425_v46, %s4924_s13  ;;  %1722 = vrot.lane.b32.xlu1 %v1493_v5, %s4926_s23  ;;  %v1217_v36 = vmin.f32 %v5915_v15, 0.0  ;;  %vm1201_vm15 = vcmp.gt.f32.partialorder %v5915_v15, 0.0 }
 0x2d7   :  { %v1705_v55 = vpop.permute.xlu1 %1704 }
 0x2d8   :  { %v4755_v40 = vpop.eup %4754  ;;  %v1247_v33 = vmul.f32 1.442695, %v1217_v36 }
 0x2d9   :  { %v4175_v56 = vadd.f32 -1.0, %v4755_v40  ;;  %v5890_v57 = vpop.permute.xlu0 %1758 }
 0x2da   :  { %1772 = vrot.lane.b32.xlu0 %v5881_v52, %s4927_s30  ;;  %4758 = vpow2.f32 %v1247_v33 }
 0x2db   :  { %v1280_v61 = vsel %vm1200_vm1, %v1174_v9, %v4175_v56  ;;  %v5899_v3 = vpop.permute.xlu1 %1564  ;;  %v1366_v9 = vrot.slane %v5881_v52, 1  ;;  %v1462_v56 = vrot.slane %v5833_v2, 2  ;;  %vm1202_vm1 = vcmp.gt.f32.partialorder %v5946_v44, 0.0 }
 0x2dc   :  { %v5904_v49 = vadd.f32 %v4918_v4, %v1280_v61  ;;  %v1249_v61 = vmul.f32 1.442695, %v1218_v14  ;;  %v4919_v4 = vld [vmem:[%s7115_s0 + $0x60] sm:$0xff] }
 0x2dd   :  { %v1655_v11 = vpop.permute.xlu0 %1654  ;;  %v1369_v27 = vsel %vm1349_vm14, %v1366_v9, %v1368_v22  ;;  %v1367_v30 = vsel %vm1349_vm14, %v1364_v18, %v1366_v9  ;;  %v1831_v18 = vsel %vm614_vm8, %v1816_v37, %v1610_v28 }
 0x2de   :  { %v1845_v17 = vsel %vm631_vm9, %v5908_v7, %v1655_v11  ;;  %1627 = vrot.lane.b32.xlu0 %v1427_v58, %s4924_s13  ;;  %1778 = vrot.lane.b32.xlu1 %v5904_v49, %s4927_s30  ;;  %v1496_v58 = vrot.slane %v5833_v2, 5  ;;  %4760 = vpow2.f32 %v1249_v61  ;;  %v1372_v36 = vrot.slane %v5904_v49, 1 }
 0x2df   :  { %v1861_v42 = vsel %vm648_vm10, %v1845_v17, %v1705_v55  ;;  %v5923_v20 = vpop.permute.xlu1 %1611  ;;  %v1461_v55 = vsel %vm58_vm5, %v1458_v26, %v1460_v48  ;;  %v1463_v26 = vsel %vm58_vm5, %v1460_v48, %v1462_v56 }
 0x2e0   :  { %v1877_v23 = vsel %vm665_vm11, %v1861_v42, %v5828_v1  ;;  %v4757_v1 = vpop.eup %4756  ;;  %v1497_v17 = vsel %vm177_vm2, %v1494_v31, %v1496_v58 }
 0x2e1   :  { %v1657_v12 = vpop.permute.xlu0 %1656  ;;  %4557 = vmatprep.mubr.msk.f32.mxu1 %vm696_vm12, %v1877_v23  ;;  %v4174_v46 = vadd.f32 -1.0, %v4757_v1 }
 0x2e2   :  { %1535 = vrot.lane.b32.xlu0 %v1369_v27, %s4923_s29  ;;  %1533 = vrot.lane.b32.xlu1 %v1367_v30, %s4923_s29  ;;  %v1846_v45 = vsel %vm631_vm9, %v1831_v18, %v1657_v12 }
 0x2e3   :  { %v5942_v41 = vpop.permute.xlu1 %1756  ;;  %v1279_v40 = vsel %vm1199_vm13, %v5851_v29, %v4174_v46 }
 0x2e4   :  { %v5978_v11 = vadd.f32 %v4919_v4, %v1279_v40 }
 0x2e5   :  { %v1707_v16 = vpop.permute.xlu0 %1706 }
 0x2e6   :  { %v1862_v5 = vsel %vm648_vm10, %v1846_v45, %v1707_v16  ;;  %1724 = vrot.lane.b32.xlu0 %v1495_v34, %s4926_s23  ;;  %1580 = vrot.lane.b32.xlu1 %v1397_v39, %s4922_s28  ;;  %v1430_v42 = vrot.slane %v5978_v11, 7  ;;  %v1370_v23 = vrot.slane %v5978_v11, 1  ;;  %v1400_v31 = vrot.slane %v5978_v11, 4 }
 0x2e7   :  { %v1878_v54 = vsel %vm665_vm11, %v1862_v5, %v1755_v43  ;;  %v5958_v28 = vpop.permute.xlu1 %1613  ;;  %v1428_v43 = vrot.slane %v5833_v2, 7  ;;  %v4759_v19 = vpop.eup %4758  ;;  %v1498_v16 = vrot.slane %v5978_v11, 5  ;;  %v1464_v34 = vrot.slane %v5978_v11, 2 }
 0x2e8   :  { %4558 = vmatmul.mubr.msk.f32.vlgmr.msra.gmra.mxu1 %vm696_vm12, %v1878_v54  ;;  %v1371_v0 = vsel %vm1349_vm14, %v1368_v22, %v1370_v23  ;;  %v1373_v45 = vsel %vm1349_vm14, %v1370_v23, %v1372_v36  ;;  %v1401_v22 = vsel %vm142_vm0, %v1398_v47, %v1400_v31  ;;  %v4176_v48 = vadd.f32 -1.0, %v4759_v19 }
 0x2e9   :  { %v1429_v29 = vsel %vm247_vm4, %v1426_v59, %v1428_v43  ;;  %v1311_v59 = vrot.slane %v5591_v8, 6  ;;  %v1431_v30 = vsel %vm247_vm4, %v1428_v43, %v1430_v42  ;;  %v1312_v5 = vrot.slane %v5585_v63, 6 }
 0x2ea   :  { %1582 = vrot.lane.b32.xlu0 %v1399_v21, %s4922_s28  ;;  %1674 = vrot.lane.b32.xlu1 %v1461_v55, %s4925_s20  ;;  %v1465_v21 = vsel %vm58_vm5, %v1462_v56, %v1464_v34  ;;  %v1281_v55 = vsel %vm1201_vm15, %v5915_v15, %v4176_v48  ;;  %v1402_v56 = vrot.slane %v5904_v49, 4  ;;  %v1466_v15 = vrot.slane %v5904_v49, 2 }
 0x2eb   :  { %v5973_v62 = vpop.permute.xlu1 %1521  ;;  %v1345_v1 = vsel %vm212_vm3, 0.0, %v1311_v59  ;;  %v4761_v47 = vpop.eup %4760 }
 0x2ec   :  { %v1802_v39 = vsel %vm580_vm6, %v1345_v1, %v5874_v50  ;;  %v1499_v50 = vsel %vm177_vm2, %v1496_v58, %v1498_v16  ;;  %v4177_v4 = vadd.f32 -1.0, %v4761_v47  ;;  %v4920_v58 = vld [vmem:[%s7115_s0 + $0x70] sm:$0xff]  ;;  %v1403_v23 = vsel %vm142_vm0, %v1400_v31, %v1402_v56 }
 0x2ed   :  { %v1817_v46 = vsel %vm597_vm7, %v1802_v39, %v5899_v3  ;;  %v1313_v3 = vsel %vm212_vm3, %v1311_v59, %v1312_v5  ;;  %v1314_v47 = vrot.slane %v5662_v32, 6 }
 0x2ee   :  { %1629 = vrot.lane.b32.xlu0 %v1429_v29, %s4924_s13  ;;  %1676 = vrot.lane.b32.xlu1 %v1463_v26, %s4925_s20  ;;  %v1832_v33 = vsel %vm614_vm8, %v1817_v46, %v5923_v20 }
 0x2ef   :  { %v1709_v12 = vpop.permute.xlu1 %1708 }
 0x2f0   :  { %v5987_v9 = vpop.permute.xlu0 %1762 }
 0x2f2   :  { %1776 = vrot.lane.b32.xlu0 %v5978_v11, %s4927_s30  ;;  %1726 = vrot.lane.b32.xlu1 %v1497_v17, %s4926_s23  ;;  %v6045_v17 = vadd.f32 %v4920_v58, %v1281_v55 }
 0x2f3   :  { %v6005_v37 = vpop.permute.xlu1 %1568 }
 0x2f4   :  { %v1520_v27 = vpop.permute.xlu0 %1519 }
 0x2f5   :  { %v1803_v43 = vsel %vm580_vm6, %v1313_v3, %v1520_v27  ;;  %v1500_v27 = vrot.slane %v5904_v49, 5 }
 0x2f6   :  { %1631 = vrot.lane.b32.xlu0 %v1431_v30, %s4924_s13  ;;  %1537 = vrot.lane.b32.xlu1 %v1371_v0, %s4923_s29  ;;  %v1282_v30 = vsel %vm1202_vm1, %v5946_v44, %v4177_v4 }
 0x2f7   :  { %v6030_v40 = vpop.permute.xlu1 %1615 }
 0x2f8   :  { %v1567_v18 = vpop.permute.xlu0 %1566 }
 0x2f9   :  { %v1818_v29 = vsel %vm597_vm7, %v1803_v43, %v1567_v18  ;;  %v1316_v43 = vrot.slane %v5628_v25, 6 }
 0x2fa   :  { %1539 = vrot.lane.b32.xlu0 %v1373_v45, %s4923_s29  ;;  %1584 = vrot.lane.b32.xlu1 %v1401_v22, %s4922_s28  ;;  %v1833_v59 = vsel %vm614_vm8, %v1818_v29, %v5958_v28  ;;  %v1501_v45 = vsel %vm177_vm2, %v1498_v16, %v1500_v27  ;;  %v1434_v22 = vrot.slane %v6045_v17, 7  ;;  %v1374_v28 = vrot.slane %v6045_v17, 1 }
 0x2fb   :  { %v1761_v0 = vpop.permute.xlu1 %1760 }
 0x2fc   :  { %v1659_v54 = vpop.permute.xlu0 %1658  ;;  %v1375_v46 = vsel %vm1349_vm14, %v1372_v36, %v1374_v28  ;;  %v1502_v36 = vrot.slane %v6045_v17, 5  ;;  %v1318_v28 = vrot.slane %v5719_v38, 6 }
 0x2fd   :  { %v1847_v14 = vsel %vm631_vm9, %v1832_v33, %v1659_v54  ;;  %v1468_v33 = vrot.slane %v6045_v17, 2 }
 0x2fe   :  { %v1863_v20 = vsel %vm648_vm10, %v1847_v14, %v1709_v12  ;;  %1728 = vrot.lane.b32.xlu0 %v1499_v50, %s4926_s23  ;;  %1678 = vrot.lane.b32.xlu1 %v1465_v21, %s4925_s20  ;;  %v1432_v12 = vrot.slane %v5904_v49, 7 }
 0x2ff   :  { %v1879_v61 = vsel %vm665_vm11, %v1863_v20, %v5942_v41  ;;  %v1467_v41 = vsel %vm58_vm5, %v1464_v34, %v1466_v15  ;;  %v4921_v34 = vld [vmem:[%s7115_s0 + $0x78] sm:$0xff]  ;;  %v1315_v20 = vsel %vm212_vm3, %v1312_v5, %v1314_v47 }
 0x300   :  { %v1661_v26 = vpop.permute.xlu0 %1660  ;;  %4560 = vmatprep.mubr.msk.f32.mxu1 %vm696_vm12, %v1879_v61  ;;  %v1433_v1 = vsel %vm247_vm4, %v1430_v42, %v1432_v12  ;;  %v6072_v42 = vadd.f32 %v4921_v34, %v1282_v30  ;;  %v1435_v48 = vsel %vm247_vm4, %v1432_v12, %v1434_v22  ;;  %v1804_v29 = vsel %vm580_vm6, %v1315_v20, %v5973_v62 }
 0x301   :  { %v1848_v31 = vsel %vm631_vm9, %v1833_v59, %v1661_v26  ;;  %v1469_v26 = vsel %vm58_vm5, %v1466_v15, %v1468_v33  ;;  %v1819_v58 = vsel %vm597_vm7, %v1804_v29, %v6005_v37  ;;  %v1503_v37 = vsel %vm177_vm2, %v1500_v27, %v1502_v36 }
 0x302   :  { %1586 = vrot.lane.b32.xlu0 %v1403_v23, %s4922_s28  ;;  %1680 = vrot.lane.b32.xlu1 %v1467_v41, %s4925_s20  ;;  %v1470_v54 = vrot.slane %v6072_v42, 2  ;;  %v1504_v3 = vrot.slane %v6072_v42, 5  ;;  %v1317_v23 = vsel %vm212_vm3, %v1314_v47, %v1316_v43  ;;  %v1834_v5 = vsel %vm614_vm8, %v1819_v58, %v6030_v40 }
 0x304   :  { %v1711_v19 = vpop.permute.xlu0 %1710  ;;  %v1471_v21 = vsel %vm58_vm5, %v1468_v33, %v1470_v54 }
 0x305   :  { %v1864_v18 = vsel %vm648_vm10, %v1848_v31, %v1711_v19 }
 0x306   :  { %1633 = vrot.lane.b32.xlu0 %v1433_v1, %s4924_s13  ;;  %1730 = vrot.lane.b32.xlu1 %v1501_v45, %s4926_s23  ;;  %v1880_v44 = vsel %vm665_vm11, %v1864_v18, %v5890_v57  ;;  %v1404_v57 = vrot.slane %v6045_v17, 4 }
 0x307   :  { %4561 = vmatmul.mubr.msk.f32.gmra.mxu1 %vm696_vm12, %v1880_v44 }
 0x308   :  { %v1524_v16 = vpop.permute.xlu0 %1523  ;;  %v6075_v39 = vpop.permute.xlu1 %1766  ;;  %v1405_v55 = vsel %vm142_vm0, %v1402_v56, %v1404_v57  ;;  %v1505_v56 = vsel %vm177_vm2, %v1502_v36, %v1504_v3  ;;  %v1320_v57 = vrot.slane %v5687_v10, 6 }
 0x309   :  { %v1805_v41 = vsel %vm580_vm6, %v1317_v23, %v1524_v16  ;;  %v1319_v16 = vsel %vm212_vm3, %v1316_v43, %v1318_v28 }
 0x30a   :  { %1635 = vrot.lane.b32.xlu0 %v1435_v48, %s4924_s13  ;;  %1541 = vrot.lane.b32.xlu1 %v1375_v46, %s4923_s29 }
 0x30c   :  { %v1571_v14 = vpop.permute.xlu0 %1570  ;;  %v1618_v50 = vpop.permute.xlu1 %1617 }
 0x30d   :  { %v1820_v62 = vsel %vm597_vm7, %v1805_v41, %v1571_v14 }
 0x30e   :  { %1684 = vrot.lane.b32.xlu0 %v1471_v21, %s4925_s20  ;;  %1588 = vrot.lane.b32.xlu1 %v1405_v55, %s4922_s28  ;;  %v1835_v40 = vsel %vm614_vm8, %v1820_v62, %v1618_v50  ;;  %v1321_v50 = vsel %vm212_vm3, %v1318_v28, %v1320_v57 }
 0x310   :  { %v1663_v61 = vpop.permute.xlu0 %1662  ;;  %v1526_v4 = vpop.permute.xlu1 %1525 }
 0x311   :  { %v1849_v12 = vsel %vm631_vm9, %v1834_v5, %v1663_v61 }
 0x312   :  { %1734 = vrot.lane.b32.xlu0 %v1505_v56, %s4926_s23  ;;  %1682 = vrot.lane.b32.xlu1 %v1469_v26, %s4925_s20 }
 0x314   :  { %v1665_v59 = vpop.permute.xlu0 %1664  ;;  %v1713_v15 = vpop.permute.xlu1 %1712 }
 0x315   :  { %v1865_v30 = vsel %vm648_vm10, %v1849_v12, %v1713_v15  ;;  %v1850_v19 = vsel %vm631_vm9, %v1835_v40, %v1665_v59  ;;  %v4219_v12 = vld [vmem:[%s7117_s3 + $0x8] sm:$0xff] }
 0x316   :  { %1782 = vrot.lane.b32.xlu0 %v6072_v42, %s4927_s30  ;;  %1732 = vrot.lane.b32.xlu1 %v1503_v37, %s4926_s23  ;;  %v1881_v31 = vsel %vm665_vm11, %v1865_v30, %v1761_v0 }
 0x317   :  { %4563 = vmatprep.mubr.msk.f32.mxu1 %vm696_vm12, %v1881_v31  ;;  %4581 = vmatprep.subr.mxu0 %v4219_v12 }
 0x318   :  { %v1715_v1 = vpop.permute.xlu0 %1714  ;;  %v1573_v18 = vpop.permute.xlu1 %1572  ;;  %4582 = vmatpush3.msra.mxu0 %v4219_v12 }
 0x319   :  { %v1866_v45 = vsel %vm648_vm10, %v1850_v19, %v1715_v1 }
 0x31a   :  { %1780 = vrot.lane.b32.xlu1 %v6045_v17, %s4927_s30  ;;  %v1882_v27 = vsel %vm665_vm11, %v1866_v45, %v5987_v9  ;;  %2770 = vrot.lane.b32.xlu0 %v4928_v6, %s4926_s23  ;;  %v1806_v9 = vsel %vm580_vm6, %v1319_v16, %v1526_v4 }
 0x31b   :  { %4564 = vmatmul.mubr.msk.f32.gmra.mxu1 %vm696_vm12, %v1882_v27  ;;  %v1821_v33 = vsel %vm597_vm7, %v1806_v9, %v1573_v18 }
 0x31c   :  { %v1528_v0 = vpop.permute.xlu0 %1527  ;;  %v1620_v22 = vpop.permute.xlu1 %1619 }
 0x31d   :  { %v1836_v54 = vsel %vm614_vm8, %v1821_v33, %v1620_v22  ;;  %v1807_v55 = vsel %vm580_vm6, %v1321_v50, %v1528_v0  ;;  %v1322_v33 = vrot.slane %v5816_v53, 6 }
 0x31e   :  { %2729 = vrot.lane.b32.xlu1 %v4928_v6, %s4925_s20 }
 0x320   :  { %v1575_v44 = vpop.permute.xlu0 %1574  ;;  %v1765_v34 = vpop.permute.xlu1 %1764 }
 0x321   :  { %v1822_v3 = vsel %vm597_vm7, %v1807_v55, %v1575_v44 }
 0x324   :  { %v1667_v48 = vpop.permute.xlu0 %1666  ;;  %v1771_v46 = vpop.permute.xlu1 %1770 }
 0x325   :  { %v1851_v47 = vsel %vm631_vm9, %v1836_v54, %v1667_v48 }
 0x328   :  { %v1717_v14 = vpop.permute.xlu0 %1716  ;;  %v1622_v6 = vpop.permute.xlu1 %1621 }
 0x329   :  { %v1867_v21 = vsel %vm648_vm10, %v1851_v47, %v1717_v14  ;;  %v1837_v20 = vsel %vm614_vm8, %v1822_v3, %v1622_v6  ;;  %v1346_v47 = vsel %vm212_vm3, 0.0, %v1322_v33 }
 0x32a   :  { %v1883_v36 = vsel %vm665_vm11, %v1867_v21, %v1765_v34 }
 0x32b   :  { %4566 = vmatprep.mubr.msk.f32.mxu1 %vm696_vm12, %v1883_v36 }
 0x32c   :  { %v1719_v43 = vpop.permute.xlu0 %1718  ;;  %v1669_v61 = vpop.permute.xlu1 %1668 }
 0x32d   :  { %v1852_v4 = vsel %vm631_vm9, %v1837_v20, %v1669_v61 }
 0x32e   :  { %v1868_v29 = vsel %vm648_vm10, %v1852_v4, %v1719_v43 }
 0x32f   :  { %v1884_v56 = vsel %vm665_vm11, %v1868_v29, %v6075_v39 }
 0x330   :  { %v1769_v26 = vpop.permute.xlu0 %1768  ;;  %4567 = vmatmul.mubr.msk.f32.gmra.mxu1 %vm696_vm12, %v1884_v56 }
 0x334   :  { %v1577_v58 = vpop.permute.xlu0 %1576 }
 0x338   :  { %v1624_v23 = vpop.permute.xlu0 %1623  ;;  %v1775_v5 = vpop.permute.xlu1 %1774 }
 0x33c   :  { %v1532_v41 = vpop.permute.xlu0 %1531  ;;  %v1530_v62 = vpop.permute.xlu1 %1529 }
 0x33d   :  { %v1808_v30 = vsel %vm580_vm6, 0.0, %v1530_v62  ;;  %v1809_v14 = vsel %vm580_vm6, %v1346_v47, %v1532_v41 }
 0x33e   :  { %v1823_v40 = vsel %vm597_vm7, %v1808_v30, %v1577_v58  ;;  %v1325_v30 = vrot.slane %v5881_v52, 6 }
 0x33f   :  { %v1838_v18 = vsel %vm614_vm8, %v1823_v40, %v1624_v23 }
 0x340   :  { %v1721_v59 = vpop.permute.xlu0 %1720  ;;  %v1671_v15 = vpop.permute.xlu1 %1670 }
 0x341   :  { %v1853_v39 = vsel %vm631_vm9, %v5908_v7, %v1671_v15 }
 0x342   :  { %v1869_v37 = vsel %vm648_vm10, %v1853_v39, %v1721_v59 }
 0x343   :  { %v1885_v31 = vsel %vm665_vm11, %v1869_v37, %v1769_v26 }
 0x344   :  { %v1579_v19 = vpop.permute.xlu0 %1578  ;;  %v1673_v1 = vpop.permute.xlu1 %1672  ;;  %4569 = vmatprep.mubr.msk.f32.mxu1 %vm696_vm12, %v1885_v31 }
 0x345   :  { %v1854_v45 = vsel %vm631_vm9, %v1838_v18, %v1673_v1  ;;  %v1824_v6 = vsel %vm597_vm7, %v1809_v14, %v1579_v19  ;;  %v1327_v18 = vrot.slane %v5833_v2, 6 }
 0x348   :  { %v1626_v27 = vpop.permute.xlu0 %1625  ;;  %v1723_v0 = vpop.permute.xlu1 %1722 }
 0x349   :  { %v1870_v22 = vsel %vm648_vm10, %v1854_v45, %v1723_v0  ;;  %v1839_v50 = vsel %vm614_vm8, %v1824_v6, %v1626_v27  ;;  %v1328_v0 = vsel %vm212_vm3, %v1325_v30, %v1327_v18 }
 0x34a   :  { %v1886_v28 = vsel %vm665_vm11, %v1870_v22, %v1771_v46  ;;  %v1323_v46 = vrot.slane %v5793_v35, 6 }
 0x34b   :  { %4570 = vmatmul.mubr.msk.f32.gmra.mxu1 %vm696_vm12, %v1886_v28 }
 0x34c   :  { %v1773_v44 = vpop.permute.xlu0 %1772  ;;  %v1324_v3 = vsel %vm212_vm3, %v1322_v33, %v1323_v46  ;;  %v1326_v31 = vsel %vm212_vm3, %v1323_v46, %v1325_v30 }
 0x350   :  { %v1628_v34 = vpop.permute.xlu0 %1627  ;;  %v1779_v16 = vpop.permute.xlu1 %1778 }
 0x354   :  { %v1536_v48 = vpop.permute.xlu0 %1535  ;;  %v1534_v9 = vpop.permute.xlu1 %1533 }
 0x355   :  { %v1810_v43 = vsel %vm580_vm6, %v1324_v3, %v1534_v9  ;;  %v1811_v40 = vsel %vm580_vm6, %v1326_v31, %v1536_v48 }
 0x358   :  { %v1725_v57 = vpop.permute.xlu0 %1724  ;;  %v1581_v54 = vpop.permute.xlu1 %1580 }
 0x359   :  { %v1825_v4 = vsel %vm597_vm7, %v1810_v43, %v1581_v54 }
 0x35a   :  { %v1840_v26 = vsel %vm614_vm8, %v1825_v4, %v1628_v34 }
 0x35c   :  { %v1583_v21 = vpop.permute.xlu0 %1582  ;;  %v1675_v55 = vpop.permute.xlu1 %1674 }
 0x35d   :  { %v1855_v36 = vsel %vm631_vm9, %v1839_v50, %v1675_v55  ;;  %v1826_v19 = vsel %vm597_vm7, %v1811_v40, %v1583_v21  ;;  %v1329_v21 = vrot.slane %v5978_v11, 6  ;;  %v1331_v55 = vrot.slane %v5904_v49, 6 }
 0x35e   :  { %v1871_v20 = vsel %vm648_vm10, %v1855_v36, %v1725_v57 }
 0x35f   :  { %v1887_v61 = vsel %vm665_vm11, %v1871_v20, %v1773_v44  ;;  %v1332_v20 = vsel %vm212_vm3, %v1329_v21, %v1331_v55 }
 0x360   :  { %v1630_v29 = vpop.permute.xlu0 %1629  ;;  %v1677_v56 = vpop.permute.xlu1 %1676  ;;  %4572 = vmatprep.mubr.msk.f32.mxu1 %vm696_vm12, %v1887_v61 }
 0x361   :  { %v1856_v58 = vsel %vm631_vm9, %v1840_v26, %v1677_v56  ;;  %v1841_v1 = vsel %vm614_vm8, %v1826_v19, %v1630_v29 }
 0x364   :  { %v1777_v23 = vpop.permute.xlu0 %1776  ;;  %v1727_v41 = vpop.permute.xlu1 %1726 }
 0x365   :  { %v1872_v62 = vsel %vm648_vm10, %v1856_v58, %v1727_v41 }
 0x366   :  { %v1888_v12 = vsel %vm665_vm11, %v1872_v62, %v1775_v5 }
 0x367   :  { %4573 = vmatmul.mubr.msk.f32.gmra.mxu1 %vm696_vm12, %v1888_v12 }
 0x368   :  { %v1632_v59 = vpop.permute.xlu0 %1631  ;;  %v1538_v15 = vpop.permute.xlu1 %1537 }
 0x369   :  { %v1812_v28 = vsel %vm580_vm6, %v1328_v0, %v1538_v15 }
 0x36c   :  { %v1540_v39 = vpop.permute.xlu0 %1539  ;;  %v1585_v37 = vpop.permute.xlu1 %1584 }
 0x36d   :  { %v1827_v34 = vsel %vm597_vm7, %v1812_v28, %v1585_v37 }
 0x36e   :  { %v1842_v33 = vsel %vm614_vm8, %v1827_v34, %v1632_v59 }
 0x370   :  { %v1729_v45 = vpop.permute.xlu0 %1728  ;;  %v1679_v5 = vpop.permute.xlu1 %1678 }
 0x371   :  { %v1857_v27 = vsel %vm631_vm9, %v1841_v1, %v1679_v5 }
 0x372   :  { %v1873_v22 = vsel %vm648_vm10, %v1857_v27, %v1729_v45 }
 0x373   :  { %v1889_v44 = vsel %vm665_vm11, %v1873_v22, %v1777_v23 }
 0x374   :  { %v1587_v48 = vpop.permute.xlu0 %1586  ;;  %v1681_v9 = vpop.permute.xlu1 %1680  ;;  %4575 = vmatprep.mubr.msk.f32.mxu1 %vm696_vm12, %v1889_v44 }
 0x375   :  { %v1858_v57 = vsel %vm631_vm9, %v1842_v33, %v1681_v9 }
 0x378   :  { %v1634_v54 = vpop.permute.xlu0 %1633  ;;  %v1731_v47 = vpop.permute.xlu1 %1730 }
 0x379   :  { %v1874_v14 = vsel %vm648_vm10, %v1858_v57, %v1731_v47 }
 0x37a   :  { %v1890_v6 = vsel %vm665_vm11, %v1874_v14, %v1779_v16  ;;  %v1330_v16 = vsel %vm212_vm3, %v1327_v18, %v1329_v21 }
 0x37b   :  { %4576 = vmatmul.mubr.msk.f32.gmra.mxu1 %vm696_vm12, %v1890_v6  ;;  %v1813_v26 = vsel %vm580_vm6, %v1330_v16, %v1540_v39  ;;  %v6221_v39 = vld [vmem:[%s7118_s2 + $0x1] ss:$0 sm:$0xff] }
 0x37c   :  { %v1636_v50 = vpop.permute.xlu0 %1635  ;;  %v1542_v46 = vpop.permute.xlu1 %1541  ;;  %v1828_v23 = vsel %vm597_vm7, %v1813_v26, %v1587_v48 }
 0x37d   :  { %v1814_v43 = vsel %vm580_vm6, %v1332_v20, %v1542_v46  ;;  %v1843_v41 = vsel %vm614_vm8, %v1828_v23, %v1634_v54 }
 0x380   :  { %v1685_v36 = vpop.permute.xlu0 %1684  ;;  %v1589_v3 = vpop.permute.xlu1 %1588 }
 0x381   :  { %v1829_v61 = vsel %vm597_vm7, %v1814_v43, %v1589_v3 }
 0x382   :  { %v1844_v56 = vsel %vm614_vm8, %v1829_v61, %v1636_v50 }
 0x383   :  { %v1860_v62 = vsel %vm631_vm9, %v1844_v56, %v1685_v36 }
 0x384   :  { %v1683_v4 = vpop.permute.xlu1 %1682  ;;  %v1735_v29 = vpop.permute.xlu0 %1734 }
 0x385   :  { %v1859_v12 = vsel %vm631_vm9, %v1843_v41, %v1683_v4  ;;  %v1876_v37 = vsel %vm648_vm10, %v1860_v62, %v1735_v29 }
 0x388   :  { %v1733_v58 = vpop.permute.xlu1 %1732  ;;  %v1783_v59 = vpop.permute.xlu0 %1782 }
 0x389   :  { %v1875_v15 = vsel %vm648_vm10, %v1859_v12, %v1733_v58  ;;  %v1892_v40 = vsel %vm665_vm11, %v1876_v37, %v1783_v59 }
 0x38c   :  { %v1781_v30 = vpop.permute.xlu1 %1780 }
 0x38d   :  { %v1891_v31 = vsel %vm665_vm11, %v1875_v15, %v1781_v30 }
 0x38e   :  { %4578 = vmatprep.mubr.msk.f32.mxu1 %vm696_vm12, %v1891_v31 }
 0x38f   :  { %4579 = vmatmul.mubr.msk.f32.gmra.mxu1 %vm696_vm12, %v1892_v40 }
 0x3a8   :  { %v4559_v19 = vpop.f32.mrf.mxu1 }
 0x3a9   :  { %v2029_v1 = vadd.f32 %v4559_v19, %v6221_v39 }
 0x3aa   :  { %v2023_v18 = vpop.f32.mrf.mxu1 }
 0x3ab   :  { %v2119_v45 = vmin.f32 %v2029_v1, 0.0  ;;  %v2024_v5 = vadd.f32 %v6221_v39, %v2023_v18  ;;  %vm2103_vm13 = vcmp.gt.f32.partialorder %v2029_v1, 0.0 }
 0x3ad   :  { %v2136_v27 = vmul.f32 1.442695, %v2119_v45  ;;  %v2118_v0 = vmin.f32 %v2024_v5, 0.0  ;;  %vm2102_vm14 = vcmp.gt.f32.partialorder %v2024_v5, 0.0 }
 0x3af   :  { %4762 = vpow2.f32 %v2136_v27  ;;  %v2134_v22 = vmul.f32 1.442695, %v2118_v0 }
 0x3b1   :  { %4764 = vpow2.f32 %v2134_v22 }
 0x3bc   :  { %v4763_v28 = vpop.eup %4762 }
 0x3bd   :  { %v4204_v34 = vadd.f32 -1.0, %v4763_v28 }
 0x3be   :  { %v4765_v44 = vpop.eup %4764 }
 0x3bf   :  { %v4203_v48 = vadd.f32 -1.0, %v4765_v44  ;;  %v2183_v33 = vsel %vm2103_vm13, %v2029_v1, %v4204_v34 }
 0x3c1   :  { %v2182_v9 = vsel %vm2102_vm14, %v2024_v5, %v4203_v48 }
 0x3c2   :  { %4583 = vmatprep.mubr.msk.f32.mxu0 %vm580_vm6, %v2182_v9 }
 0x3c3   :  { %4584 = vmatmul.mubr.msk.f32.vlgmr.msra.gmra.mxu0 %vm580_vm6, %v2183_v33 }
 0x3c7   :  { %v4562_v57 = vpop.f32.mrf.mxu1 }
 0x3c8   :  { %v2039_v54 = vadd.f32 %v4562_v57, %v6221_v39 }
 0x3c9   :  { %v2033_v47 = vpop.f32.mrf.mxu1 }
 0x3ca   :  { %v2121_v14 = vmin.f32 %v2039_v54, 0.0  ;;  %v2034_v6 = vadd.f32 %v6221_v39, %v2033_v47  ;;  %vm2105_vm1 = vcmp.gt.f32.partialorder %v2039_v54, 0.0 }
 0x3cc   :  { %v2140_v50 = vmul.f32 1.442695, %v2121_v14  ;;  %v2120_v46 = vmin.f32 %v2034_v6, 0.0  ;;  %vm2104_vm15 = vcmp.gt.f32.partialorder %v2034_v6, 0.0 }
 0x3ce   :  { %4766 = vpow2.f32 %v2140_v50  ;;  %v2138_v21 = vmul.f32 1.442695, %v2120_v46 }
 0x3d0   :  { %4768 = vpow2.f32 %v2138_v21 }
 0x3db   :  { %v4767_v55 = vpop.eup %4766  ;;  %v4565_v36 = vpop.f32.mrf.mxu1 }
 0x3dc   :  { %v2049_v3 = vadd.f32 %v4565_v36, %v6221_v39  ;;  %v4206_v61 = vadd.f32 -1.0, %v4767_v55 }
 0x3dd   :  { %v4769_v20 = vpop.eup %4768  ;;  %v2043_v43 = vpop.f32.mrf.mxu1 }
 0x3de   :  { %v2123_v4 = vmin.f32 %v2049_v3, 0.0  ;;  %v2044_v29 = vadd.f32 %v6221_v39, %v2043_v43  ;;  %v4205_v16 = vadd.f32 -1.0, %v4769_v20  ;;  %v2185_v23 = vsel %vm2105_vm1, %v2039_v54, %v4206_v61 }
 0x3df   :  { %vm2107_vm13 = vcmp.gt.f32.partialorder %v2049_v3, 0.0 }
 0x3e0   :  { %v2144_v56 = vmul.f32 1.442695, %v2123_v4  ;;  %v2122_v26 = vmin.f32 %v2044_v29, 0.0  ;;  %v2184_v58 = vsel %vm2104_vm15, %v2034_v6, %v4205_v16  ;;  %vm2106_vm14 = vcmp.gt.f32.partialorder %v2044_v29, 0.0 }
 0x3e1   :  { %4586 = vmatprep.mubr.msk.f32.mxu0 %vm580_vm6, %v2184_v58 }
 0x3e2   :  { %4770 = vpow2.f32 %v2144_v56  ;;  %v2142_v41 = vmul.f32 1.442695, %v2122_v26  ;;  %4587 = vmatmul.mubr.msk.f32.gmra.mxu0 %vm580_vm6, %v2185_v23 }
 0x3e4   :  { %4772 = vpow2.f32 %v2142_v41 }
 0x3ef   :  { %v4771_v62 = vpop.eup %4770 }
 0x3f0   :  { %v4568_v12 = vpop.f32.mrf.mxu1  ;;  %v4208_v30 = vadd.f32 -1.0, %v4771_v62 }
 0x3f1   :  { %v4773_v59 = vpop.eup %4772  ;;  %v2059_v15 = vadd.f32 %v4568_v12, %v6221_v39 }
 0x3f2   :  { %v2053_v37 = vpop.f32.mrf.mxu1  ;;  %v4207_v31 = vadd.f32 -1.0, %v4773_v59  ;;  %v2187_v5 = vsel %vm2107_vm13, %v2049_v3, %v4208_v30 }
 0x3f3   :  { %v2125_v40 = vmin.f32 %v2059_v15, 0.0  ;;  %v2054_v19 = vadd.f32 %v6221_v39, %v2053_v37  ;;  %vm2109_vm1 = vcmp.gt.f32.partialorder %v2059_v15, 0.0 }
 0x3f4   :  { %v2186_v1 = vsel %vm2106_vm14, %v2044_v29, %v4207_v31 }
 0x3f5   :  { %v2148_v18 = vmul.f32 1.442695, %v2125_v40  ;;  %v2124_v45 = vmin.f32 %v2054_v19, 0.0  ;;  %4589 = vmatprep.mubr.msk.f32.mxu0 %vm580_vm6, %v2186_v1  ;;  %vm2108_vm15 = vcmp.gt.f32.partialorder %v2054_v19, 0.0 }
 0x3f6   :  { %4590 = vmatmul.mubr.msk.f32.gmra.mxu0 %vm580_vm6, %v2187_v5 }
 0x3f7   :  { %4774 = vpow2.f32 %v2148_v18  ;;  %v2146_v27 = vmul.f32 1.442695, %v2124_v45 }
 0x3f9   :  { %4776 = vpow2.f32 %v2146_v27 }
 0x404   :  { %v4775_v0 = vpop.eup %4774 }
 0x405   :  { %v4210_v28 = vadd.f32 -1.0, %v4775_v0 }
 0x406   :  { %v4777_v22 = vpop.eup %4776 }
 0x407   :  { %v4209_v44 = vadd.f32 -1.0, %v4777_v22  ;;  %v2189_v48 = vsel %vm2109_vm1, %v2059_v15, %v4210_v28 }
 0x409   :  { %v2188_v34 = vsel %vm2108_vm15, %v2054_v19, %v4209_v44 }
 0x40a   :  { %4592 = vmatprep.mubr.msk.f32.mxu0 %vm580_vm6, %v2188_v34 }
 0x40b   :  { %v4571_v9 = vpop.f32.mrf.mxu1  ;;  %4593 = vmatmul.mubr.msk.f32.gmra.mxu0 %vm580_vm6, %v2189_v48 }
 0x40c   :  { %v2069_v33 = vadd.f32 %v4571_v9, %v6221_v39 }
 0x40d   :  { %v2063_v57 = vpop.f32.mrf.mxu1 }
 0x40e   :  { %v2127_v54 = vmin.f32 %v2069_v33, 0.0  ;;  %v2064_v47 = vadd.f32 %v6221_v39, %v2063_v57  ;;  %vm2111_vm13 = vcmp.gt.f32.partialorder %v2069_v33, 0.0 }
 0x410   :  { %v2152_v14 = vmul.f32 1.442695, %v2127_v54  ;;  %v2126_v6 = vmin.f32 %v2064_v47, 0.0  ;;  %vm2110_vm14 = vcmp.gt.f32.partialorder %v2064_v47, 0.0 }
 0x412   :  { %4778 = vpow2.f32 %v2152_v14  ;;  %v2150_v50 = vmul.f32 1.442695, %v2126_v6 }
 0x414   :  { %4780 = vpow2.f32 %v2150_v50 }
 0x41f   :  { %v4779_v46 = vpop.eup %4778 }
 0x420   :  { %v4212_v55 = vadd.f32 -1.0, %v4779_v46 }
 0x421   :  { %v4781_v21 = vpop.eup %4780 }
 0x422   :  { %v4211_v36 = vadd.f32 -1.0, %v4781_v21  ;;  %v2191_v20 = vsel %vm2111_vm13, %v2069_v33, %v4212_v55 }
 0x424   :  { %v2190_v3 = vsel %vm2110_vm14, %v2064_v47, %v4211_v36  ;;  %v6258_v36 = vld [vmem:[%s7119_s4 + $0x1] ss:$0 sm:$0xff] }
 0x425   :  { %4595 = vmatprep.mubr.msk.f32.mxu0 %vm580_vm6, %v2190_v3 }
 0x426   :  { %4596 = vmatmul.mubr.msk.f32.gmra.mxu0 %vm580_vm6, %v2191_v20 }
 0x427   :  { %v4574_v43 = vpop.f32.mrf.mxu1 }
 0x428   :  { %v2079_v61 = vadd.f32 %v4574_v43, %v6221_v39 }
 0x429   :  { %v2073_v4 = vpop.f32.mrf.mxu1 }
 0x42a   :  { %v2129_v29 = vmin.f32 %v2079_v61, 0.0  ;;  %v2074_v16 = vadd.f32 %v6221_v39, %v2073_v4  ;;  %vm2113_vm1 = vcmp.gt.f32.partialorder %v2079_v61, 0.0 }
 0x42c   :  { %v2156_v56 = vmul.f32 1.442695, %v2129_v29  ;;  %v2128_v26 = vmin.f32 %v2074_v16, 0.0  ;;  %vm2112_vm15 = vcmp.gt.f32.partialorder %v2074_v16, 0.0 }
 0x42e   :  { %4782 = vpow2.f32 %v2156_v56  ;;  %v2154_v58 = vmul.f32 1.442695, %v2128_v26  ;;  %v4260_v26 = vld [vmem:[%s7116_s1 + $0xa0] sm:$0xff] }
 0x42f   :  { %4607 = vmatprep.subr.mxu1 %v4260_v26 }
 0x430   :  { %4784 = vpow2.f32 %v2154_v58  ;;  %4608 = vmatpush3.msra.mxu1 %v4260_v26  ;;  %v4259_v58 = vld [vmem:[%s7116_s1 + $0x98] sm:$0xff] }
 0x431   :  { %4609 = vmatprep.subr.mxu1 %v4259_v58 }
 0x432   :  { %4610 = vmatpush3.msra.mxu1 %v4259_v58 }
 0x43b   :  { %v4783_v23 = vpop.eup %4782  ;;  %v4577_v41 = vpop.f32.mrf.mxu1 }
 0x43c   :  { %v2089_v62 = vadd.f32 %v4577_v41, %v6221_v39  ;;  %v4214_v15 = vadd.f32 -1.0, %v4783_v23  ;;  %v4258_v23 = vld [vmem:[%s7116_s1 + $0x90] sm:$0xff]  ;;  %v4257_v41 = vld [vmem:[%s7116_s1 + $0x88] sm:$0xff] }
 0x43d   :  { %v4785_v12 = vpop.eup %4784  ;;  %v2083_v59 = vpop.f32.mrf.mxu1  ;;  %4611 = vmatprep.subr.mxu1 %v4258_v23 }
 0x43e   :  { %v2131_v30 = vmin.f32 %v2089_v62, 0.0  ;;  %v2084_v37 = vadd.f32 %v6221_v39, %v2083_v59  ;;  %v4213_v31 = vadd.f32 -1.0, %v4785_v12  ;;  %v2193_v18 = vsel %vm2113_vm1, %v2079_v61, %v4214_v15  ;;  %4612 = vmatpush3.msra.mxu1 %v4258_v23  ;;  %v4256_v12 = vld [vmem:[%s7116_s1 + $0x80] sm:$0xff] }
 0x43f   :  { %vm2115_vm13 = vcmp.gt.f32.partialorder %v2089_v62, 0.0  ;;  %4613 = vmatprep.subr.mxu1 %v4257_v41 }
 0x440   :  { %v2160_v40 = vmul.f32 1.442695, %v2131_v30  ;;  %v2130_v19 = vmin.f32 %v2084_v37, 0.0  ;;  %v2192_v1 = vsel %vm2112_vm15, %v2074_v16, %v4213_v31  ;;  %vm2114_vm14 = vcmp.gt.f32.partialorder %v2084_v37, 0.0  ;;  %4614 = vmatpush3.msra.mxu1 %v4257_v41  ;;  %v4255_v30 = vld [vmem:[%s7116_s1 + $0x78] sm:$0xff] }
 0x441   :  { %4598 = vmatprep.mubr.msk.f32.mxu0 %vm580_vm6, %v2192_v1  ;;  %4615 = vmatprep.subr.mxu1 %v4256_v12 }
 0x442   :  { %4786 = vpow2.f32 %v2160_v40  ;;  %v2158_v45 = vmul.f32 1.442695, %v2130_v19  ;;  %4599 = vmatmul.mubr.msk.f32.gmra.mxu0 %vm580_vm6, %v2193_v18  ;;  %4616 = vmatpush3.msra.mxu1 %v4256_v12  ;;  %v4254_v19 = vld [vmem:[%s7116_s1 + $0x70] sm:$0xff] }
 0x443   :  { %4617 = vmatprep.subr.mxu1 %v4255_v30 }
 0x444   :  { %4788 = vpow2.f32 %v2158_v45  ;;  %4618 = vmatpush3.msra.mxu1 %v4255_v30 }
 0x445   :  { %4619 = vmatprep.subr.mxu1 %v4254_v19 }
 0x446   :  { %4620 = vmatpush3.msra.mxu1 %v4254_v19 }
 0x44f   :  { %v4787_v5 = vpop.eup %4786  ;;  %v4580_v27 = vpop.f32.mrf.mxu1 }
 0x450   :  { %v2099_v0 = vadd.f32 %v4580_v27, %v6221_v39  ;;  %v4216_v44 = vadd.f32 -1.0, %v4787_v5 }
 0x451   :  { %v4789_v22 = vpop.eup %4788  ;;  %v2093_v28 = vpop.f32.mrf.mxu1 }
 0x452   :  { %v2133_v34 = vmin.f32 %v2099_v0, 0.0  ;;  %v2094_v48 = vadd.f32 %v6221_v39, %v2093_v28  ;;  %v4215_v9 = vadd.f32 -1.0, %v4789_v22  ;;  %v2195_v47 = vsel %vm2115_vm13, %v2089_v62, %v4216_v44 }
 0x453   :  { %vm2117_vm1 = vcmp.gt.f32.partialorder %v2099_v0, 0.0 }
 0x454   :  { %v2164_v33 = vmul.f32 1.442695, %v2133_v34  ;;  %v2132_v57 = vmin.f32 %v2094_v48, 0.0  ;;  %v2194_v54 = vsel %vm2114_vm14, %v2084_v37, %v4215_v9  ;;  %vm2116_vm15 = vcmp.gt.f32.partialorder %v2094_v48, 0.0 }
 0x455   :  { %4601 = vmatprep.mubr.msk.f32.mxu0 %vm580_vm6, %v2194_v54 }
 0x456   :  { %4790 = vpow2.f32 %v2164_v33  ;;  %v2162_v14 = vmul.f32 1.442695, %v2132_v57  ;;  %4602 = vmatmul.mubr.msk.f32.gmra.mxu0 %vm580_vm6, %v2195_v47 }
 0x458   :  { %4792 = vpow2.f32 %v2162_v14 }
 0x463   :  { %v4791_v6 = vpop.eup %4790 }
 0x464   :  { %v4218_v46 = vadd.f32 -1.0, %v4791_v6 }
 0x465   :  { %v4793_v50 = vpop.eup %4792 }
 0x466   :  { %v4217_v21 = vadd.f32 -1.0, %v4793_v50  ;;  %v2197_v55 = vsel %vm2117_vm1, %v2099_v0, %v4218_v46 }
 0x468   :  { %v2196_v39 = vsel %vm2116_vm15, %v2094_v48, %v4217_v21  ;;  %vm7124_vm15 = vcmask 1044480  }
 0x469   :  { %4604 = vmatprep.mubr.msk.f32.mxu0 %vm580_vm6, %v2196_v39 }
 0x46a   :  { %4605 = vmatmul.mubr.msk.f32.gmra.mxu0 %vm580_vm6, %v2197_v55 }
 0x483   :  { %v4585_v3 = vpop.f32.mrf.mxu0 }
 0x484   :  { %v2328_v20 = vadd.f32 %v4585_v3, %v6258_v36 }
 0x485   :  { %v2322_v43 = vpop.f32.mrf.mxu0 }
 0x486   :  { %v2418_v61 = vmin.f32 %v2328_v20, 0.0  ;;  %v2323_v4 = vadd.f32 %v6258_v36, %v2322_v43  ;;  %vm2402_vm14 = vcmp.gt.f32.partialorder %v2328_v20, 0.0 }
 0x488   :  { %v2435_v29 = vmul.f32 1.442695, %v2418_v61  ;;  %v2417_v16 = vmin.f32 %v2323_v4, 0.0  ;;  %vm2401_vm13 = vcmp.gt.f32.partialorder %v2323_v4, 0.0 }
 0x48a   :  { %4794 = vpow2.f32 %v2435_v29  ;;  %v2433_v56 = vmul.f32 1.442695, %v2417_v16 }
 0x48c   :  { %4796 = vpow2.f32 %v2433_v56 }
 0x497   :  { %v4795_v62 = vpop.eup %4794 }
 0x498   :  { %v4239_v59 = vadd.f32 -1.0, %v4795_v62 }
 0x499   :  { %v4797_v15 = vpop.eup %4796 }
 0x49a   :  { %v2482_v37 = vsel %vm2402_vm14, %v2328_v20, %v4239_v59  ;;  %v4238_v31 = vadd.f32 -1.0, %v4797_v15 }
 0x49b   :  { %v6281_v40 = vadd.f32 %v2482_v37, %v5585_v63 }
 0x49c   :  { %v2481_v1 = vsel %vm2401_vm13, %v2323_v4, %v4238_v31  ;;  %vm7125_vm13 = vmmov %vm7124_vm15 }
 0x49d   :  { %v6287_v18 = vadd.f32 %v2481_v1, %v5591_v8  ;;  %2819 = vrot.lane.b32.xlu1 %v6281_v40, %s4927_s30  ;;  %v2620_v9 = vrot.slane %v6281_v40, 7  ;;  %v2568_v6 = vrot.slane %v6281_v40, 5  ;;  %v2532_v21 = vrot.slane %v6281_v40, 3 }
 0x49f   :  { %2817 = vrot.lane.b32.xlu0 %v6287_v18, %s4927_s30  ;;  %v2619_v63 = vrot.slane %v6287_v18, 7  ;;  %v2591_v5 = vrot.slane %v6287_v18, 6  ;;  %v2547_v54 = vrot.slane %v6287_v18, 4  ;;  %v2567_v14 = vrot.slane %v6287_v18, 5 }
 0x4a0   :  { %v2531_v46 = vrot.slane %v6287_v18, 3 }
 0x4a1   :  { %v2647_v45 = vsel %vm247_vm4, 0.0, %v2619_v63  ;;  %v2615_v44 = vsel %vm212_vm3, 0.0, %v2591_v5  ;;  %v2621_v57 = vsel %vm247_vm4, %v2619_v63, %v2620_v9  ;;  %v2563_v47 = vsel %vm142_vm0, 0.0, %v2547_v54 }
 0x4a2   :  { %2772 = vrot.lane.b32.xlu1 %v2647_v45, %s4926_s23  ;;  %v4588_v27 = vpop.f32.mrf.mxu0  ;;  %v2569_v50 = vsel %vm177_vm2, %v2567_v14, %v2568_v6  ;;  %v2533_v39 = vsel %vm7124_vm15, %v2531_v46, %v2532_v21  ;;  %v2587_v15 = vsel %vm177_vm2, 0.0, %v2567_v14  ;;  %v2543_v45 = vsel %vm7125_vm13, 0.0, %v2531_v46 }
 0x4a3   :  { %v2338_v0 = vadd.f32 %v4588_v27, %v6258_v36  ;;  %v2548_v27 = vrot.slane %v6281_v40, 4 }
 0x4a4   :  { %v2332_v8 = vpop.f32.mrf.mxu0 }
 0x4a5   :  { %v2420_v22 = vmin.f32 %v2338_v0, 0.0  ;;  %v2333_v28 = vadd.f32 %v6258_v36, %v2332_v8  ;;  %vm2404_vm1 = vcmp.gt.f32.partialorder %v2338_v0, 0.0 }
 0x4a6   :  { %2731 = vrot.lane.b32.xlu1 %v2615_v44, %s4925_s20 }
 0x4a7   :  { %v2439_v34 = vmul.f32 1.442695, %v2420_v22  ;;  %v2419_v48 = vmin.f32 %v2333_v28, 0.0  ;;  %vm2403_vm14 = vcmp.gt.f32.partialorder %v2333_v28, 0.0 }
 0x4a9   :  { %4798 = vpow2.f32 %v2439_v34  ;;  %v2437_v33 = vmul.f32 1.442695, %v2419_v48 }
 0x4aa   :  { %2774 = vrot.lane.b32.xlu1 %v2621_v57, %s4926_s23 }
 0x4ab   :  { %4800 = vpow2.f32 %v2437_v33 }
 0x4ae   :  { %2671 = vrot.lane.b32.xlu1 %v2563_v47, %s4922_s28 }
 0x4b2   :  { %2699 = vrot.lane.b32.xlu1 %v2569_v50, %s4924_s13 }
 0x4b6   :  { %v4799_v55 = vpop.eup %4798  ;;  %2653 = vrot.lane.b32.xlu1 %v2533_v39, %s4923_s29  ;;  %v4591_v3 = vpop.f32.mrf.mxu0 }
 0x4b7   :  { %v4241_v20 = vadd.f32 -1.0, %v4799_v55  ;;  %v2348_v43 = vadd.f32 %v4591_v3, %v6258_v36 }
 0x4b8   :  { %v4801_v61 = vpop.eup %4800  ;;  %v2342_v4 = vpop.f32.mrf.mxu0 }
 0x4b9   :  { %v2484_v29 = vsel %vm2404_vm1, %v2338_v0, %v4241_v20  ;;  %v4240_v16 = vadd.f32 -1.0, %v4801_v61  ;;  %v2422_v56 = vmin.f32 %v2348_v43, 0.0  ;;  %v2343_v58 = vadd.f32 %v6258_v36, %v2342_v4 }
 0x4ba   :  { %v6321_v26 = vadd.f32 %v2484_v29, %v5628_v25  ;;  %vm2406_vm15 = vcmp.gt.f32.partialorder %v2348_v43, 0.0 }
 0x4bb   :  { %v2483_v23 = vsel %vm2403_vm14, %v2333_v28, %v4240_v16  ;;  %v2443_v41 = vmul.f32 1.442695, %v2422_v56  ;;  %v2421_v12 = vmin.f32 %v2343_v58, 0.0  ;;  %v2549_v28 = vsel %vm142_vm0, %v2547_v54, %v2548_v27  ;;  %vm7126_vm14 = vmmov %vm7125_vm13 }
 0x4bc   :  { %v6325_v62 = vadd.f32 %v2483_v23, %v5662_v32  ;;  %2823 = vrot.lane.b32.xlu0 %v6321_v26, %s4927_s30  ;;  %v2592_v32 = vrot.slane %v6281_v40, 6  ;;  %v2624_v19 = vrot.slane %v6321_v26, 7  ;;  %v2572_v44 = vrot.slane %v6321_v26, 5 }
 0x4bd   :  { %4802 = vpow2.f32 %v2443_v41  ;;  %v2441_v59 = vmul.f32 1.442695, %v2421_v12  ;;  %vm2405_vm1 = vcmp.gt.f32.partialorder %v2343_v58, 0.0 }
 0x4be   :  { %2821 = vrot.lane.b32.xlu1 %v6325_v62, %s4927_s30  ;;  %v2570_v25 = vrot.slane %v6325_v62, 5  ;;  %v2622_v37 = vrot.slane %v6325_v62, 7  ;;  %v2593_v31 = vsel %vm212_vm3, %v2591_v5, %v2592_v32  ;;  %v2550_v63 = vrot.slane %v6325_v62, 4 }
 0x4bf   :  { %4804 = vpow2.f32 %v2441_v59  ;;  %v2534_v29 = vrot.slane %v6325_v62, 3 }
 0x4c0   :  { %2697 = vrot.lane.b32.xlu0 %v2587_v15, %s4924_s13  ;;  %v2571_v30 = vsel %vm177_vm2, %v2568_v6, %v2570_v25  ;;  %v2625_v1 = vsel %vm247_vm4, %v2622_v37, %v2624_v19  ;;  %v2551_v5 = vsel %vm142_vm0, %v2548_v27, %v2550_v63  ;;  %v2573_v47 = vsel %vm177_vm2, %v2570_v25, %v2572_v44 }
 0x4c2   :  { %2701 = vrot.lane.b32.xlu1 %v2571_v30, %s4924_s13 }
 0x4c4   :  { %2733 = vrot.lane.b32.xlu0 %v2593_v31, %s4925_s20 }
 0x4c6   :  { %2778 = vrot.lane.b32.xlu1 %v2625_v1, %s4926_s23 }
 0x4c8   :  { %2651 = vrot.lane.b32.xlu0 %v2543_v45, %s4923_s29 }
 0x4ca   :  { %v4803_v0 = vpop.eup %4802  ;;  %2675 = vrot.lane.b32.xlu1 %v2551_v5, %s4922_s28 }
 0x4cb   :  { %v4243_v8 = vadd.f32 -1.0, %v4803_v0  ;;  %v4594_v22 = vpop.f32.mrf.mxu0 }
 0x4cc   :  { %v2358_v34 = vadd.f32 %v4594_v22, %v6258_v36  ;;  %2673 = vrot.lane.b32.xlu0 %v2549_v28, %s4922_s28  ;;  %v4805_v48 = vpop.eup %4804 }
 0x4cd   :  { %v2486_v33 = vsel %vm2406_vm15, %v2348_v43, %v4243_v8  ;;  %v2352_v57 = vpop.f32.mrf.mxu0  ;;  %v4242_v6 = vadd.f32 -1.0, %v4805_v48  ;;  %v2594_v43 = vrot.slane %v6325_v62, 6 }
 0x4ce   :  { %v6357_v14 = vadd.f32 %v2486_v33, %v5687_v10  ;;  %v2424_v50 = vmin.f32 %v2358_v34, 0.0  ;;  %2703 = vrot.lane.b32.xlu1 %v2573_v47, %s4924_s13  ;;  %v2353_v54 = vadd.f32 %v6258_v36, %v2352_v57  ;;  %v2623_v10 = vsel %vm247_vm4, %v2620_v9, %v2622_v37 }
 0x4cf   :  { %v2485_v46 = vsel %vm2405_vm1, %v2343_v58, %v4242_v6  ;;  %v2595_v61 = vsel %vm212_vm3, %v2592_v32, %v2594_v43  ;;  %v2535_v9 = vsel %vm7126_vm14, %v2532_v21, %v2534_v29  ;;  %vm2408_vm13 = vcmp.gt.f32.partialorder %v2358_v34, 0.0 }
 0x4d0   :  { %v2447_v39 = vmul.f32 1.442695, %v2424_v50  ;;  %2827 = vrot.lane.b32.xlu0 %v6357_v14, %s4927_s30  ;;  %v6364_v55 = vadd.f32 %v2485_v46, %v5719_v38  ;;  %v2423_v3 = vmin.f32 %v2353_v54, 0.0  ;;  %v2596_v38 = vrot.slane %v6321_v26, 6 }
 0x4d1   :  { %v2552_v58 = vrot.slane %v6321_v26, 4  ;;  %vm2407_vm15 = vcmp.gt.f32.partialorder %v2353_v54, 0.0  ;;  %v2600_v0 = vrot.slane %v6357_v14, 6 }
 0x4d2   :  { %4806 = vpow2.f32 %v2447_v39  ;;  %v2445_v20 = vmul.f32 1.442695, %v2423_v3  ;;  %2825 = vrot.lane.b32.xlu1 %v6364_v55, %s4927_s30  ;;  %v2597_v4 = vsel %vm212_vm3, %v2594_v43, %v2596_v38  ;;  %v2626_v15 = vrot.slane %v6364_v55, 7 }
 0x4d3   :  { %v2553_v25 = vsel %vm142_vm0, %v2550_v63, %v2552_v58  ;;  %v2574_v21 = vrot.slane %v6364_v55, 5  ;;  %v2598_v31 = vrot.slane %v6364_v55, 6 }
 0x4d4   :  { %2776 = vrot.lane.b32.xlu0 %v2623_v10, %s4926_s23  ;;  %4808 = vpow2.f32 %v2445_v20 }
 0x4d5   :  { %v2575_v45 = vsel %vm177_vm2, %v2572_v44, %v2574_v21  ;;  %v2628_v44 = vrot.slane %v6357_v14, 7 }
 0x4d7   :  { %v2629_v48 = vsel %vm247_vm4, %v2626_v15, %v2628_v44 }
 0x4d8   :  { %2735 = vrot.lane.b32.xlu0 %v2595_v61, %s4925_s20 }
 0x4dc   :  { %2737 = vrot.lane.b32.xlu0 %v2597_v4, %s4925_s20 }
 0x4df   :  { %v4807_v16 = vpop.eup %4806 }
 0x4e0   :  { %v4245_v56 = vadd.f32 -1.0, %v4807_v16  ;;  %2655 = vrot.lane.b32.xlu0 %v2535_v9, %s4923_s29 }
 0x4e1   :  { %v4809_v23 = vpop.eup %4808 }
 0x4e2   :  { %v2488_v41 = vsel %vm2408_vm13, %v2358_v34, %v4245_v56  ;;  %v4244_v59 = vadd.f32 -1.0, %v4809_v23  ;;  %v2730_v23 = vpop.permute.xlu1 %2729 }
 0x4e3   :  { %v6385_v12 = vadd.f32 %v2488_v41, %v5735_v51  ;;  %v2627_v51 = vsel %vm247_vm4, %v2624_v19, %v2626_v15  ;;  %v2599_v19 = vsel %vm212_vm3, %v2596_v38, %v2598_v31  ;;  %v6446_v15 = vsel %vm631_vm9, %v5908_v7, %v2730_v23 }
 0x4e4   :  { %2677 = vrot.lane.b32.xlu0 %v2553_v25, %s4922_s28  ;;  %v2487_v30 = vsel %vm2407_vm15, %v2353_v54, %v4244_v59  ;;  %v2771_v25 = vpop.permute.xlu0 %2770  ;;  %vm7127_vm15 = vcmask 1044480  }
 0x4e5   :  { %2831 = vrot.lane.b32.xlu1 %v6385_v12, %s4927_s30  ;;  %v6399_v1 = vadd.f32 %v2487_v30, %v5765_v13  ;;  %v2601_v13 = vsel %vm212_vm3, %v2598_v31, %v2600_v0 }
 0x4e6   :  { %v4597_v32 = vpop.f32.mrf.mxu0 }
 0x4e7   :  { %v2368_v37 = vadd.f32 %v4597_v32, %v6258_v36  ;;  %v2630_v28 = vrot.slane %v6399_v1, 7 }
 0x4e8   :  { %v2362_v63 = vpop.f32.mrf.mxu0  ;;  %2780 = vrot.lane.b32.xlu0 %v2627_v51, %s4926_s23 }
 0x4e9   :  { %v2426_v27 = vmin.f32 %v2368_v37, 0.0  ;;  %v2363_v5 = vadd.f32 %v6258_v36, %v2362_v63  ;;  %2705 = vrot.lane.b32.xlu1 %v2575_v45, %s4924_s13  ;;  %v2631_v33 = vsel %vm247_vm4, %v2628_v44, %v2630_v28  ;;  %vm2410_vm1 = vcmp.gt.f32.partialorder %v2368_v37, 0.0 }
 0x4eb   :  { %v2451_v8 = vmul.f32 1.442695, %v2426_v27  ;;  %v2425_v22 = vmin.f32 %v2363_v5, 0.0  ;;  %vm2409_vm14 = vcmp.gt.f32.partialorder %v2363_v5, 0.0 }
 0x4ec   :  { %2739 = vrot.lane.b32.xlu0 %v2599_v19, %s4925_s20 }
 0x4ed   :  { %4810 = vpow2.f32 %v2451_v8  ;;  %v2449_v34 = vmul.f32 1.442695, %v2425_v22  ;;  %2741 = vrot.lane.b32.xlu1 %v2601_v13, %s4925_s20 }
 0x4ef   :  { %4812 = vpow2.f32 %v2449_v34 }
 0x4f0   :  { %2782 = vrot.lane.b32.xlu0 %v2629_v48, %s4926_s23 }
 0x4f1   :  { %2784 = vrot.lane.b32.xlu1 %v2631_v33, %s4926_s23 }
 0x4f4   :  { %2829 = vrot.lane.b32.xlu0 %v6399_v1, %s4927_s30 }
 0x4fa   :  { %v4811_v57 = vpop.eup %4810 }
 0x4fb   :  { %v4247_v47 = vadd.f32 -1.0, %v4811_v57 }
 0x4fc   :  { %v4813_v6 = vpop.eup %4812 }
 0x4fd   :  { %v2490_v50 = vsel %vm2410_vm1, %v2368_v37, %v4247_v47  ;;  %v4246_v54 = vadd.f32 -1.0, %v4813_v6  ;;  %v6454_v37 = vsel %vm648_vm10, %v6446_v15, %v2771_v25 }
 0x4fe   :  { %v6419_v46 = vadd.f32 %v2490_v50, %v5793_v35 }
 0x4ff   :  { %v2489_v39 = vsel %vm2409_vm14, %v2363_v5, %v4246_v54  ;;  %vm7128_vm14 = vmmov %vm7127_vm15 }
 0x500   :  { %v6422_v3 = vadd.f32 %v2489_v39, %v5816_v53  ;;  %2835 = vrot.lane.b32.xlu0 %v6419_v46, %s4927_s30  ;;  %v2633_v58 = vrot.slane %v6419_v46, 7  ;;  %v2577_v63 = vrot.slane %v6419_v46, 5  ;;  %v2537_v13 = vrot.slane %v6419_v46, 3 }
 0x502   :  { %v4600_v20 = vpop.f32.mrf.mxu0  ;;  %2833 = vrot.lane.b32.xlu1 %v6422_v3, %s4927_s30  ;;  %v2632_v10 = vrot.slane %v6422_v3, 7  ;;  %v2602_v38 = vrot.slane %v6422_v3, 6  ;;  %v2554_v59 = vrot.slane %v6422_v3, 4  ;;  %v2576_v32 = vrot.slane %v6422_v3, 5 }
 0x503   :  { %v2378_v43 = vadd.f32 %v4600_v20, %v6258_v36  ;;  %v2536_v5 = vrot.slane %v6422_v3, 3 }
 0x504   :  { %v2372_v61 = vpop.f32.mrf.mxu0  ;;  %v2648_v35 = vsel %vm247_vm4, 0.0, %v2632_v10  ;;  %v2616_v9 = vsel %vm212_vm3, 0.0, %v2602_v38  ;;  %v2634_v41 = vsel %vm247_vm4, %v2632_v10, %v2633_v58  ;;  %v2564_v30 = vsel %vm142_vm0, 0.0, %v2554_v59 }
 0x505   :  { %v2428_v4 = vmin.f32 %v2378_v43, 0.0  ;;  %v2373_v53 = vadd.f32 %v6258_v36, %v2372_v61  ;;  %2786 = vrot.lane.b32.xlu0 %v2648_v35, %s4926_s23  ;;  %v2578_v27 = vsel %vm177_vm2, %v2576_v32, %v2577_v63  ;;  %vm2412_vm13 = vcmp.gt.f32.partialorder %v2378_v43, 0.0 }
 0x506   :  { %v2538_v57 = vsel %vm7127_vm15, %v2536_v5, %v2537_v13 }
 0x507   :  { %v2455_v29 = vmul.f32 1.442695, %v2428_v4  ;;  %v2427_v16 = vmin.f32 %v2373_v53, 0.0  ;;  %vm2411_vm1 = vcmp.gt.f32.partialorder %v2373_v53, 0.0 }
 0x509   :  { %4814 = vpow2.f32 %v2455_v29  ;;  %v2453_v56 = vmul.f32 1.442695, %v2427_v16  ;;  %2743 = vrot.lane.b32.xlu0 %v2616_v9, %s4925_s20  ;;  %v2588_v29 = vsel %vm177_vm2, 0.0, %v2576_v32  ;;  %v2603_v16 = vrot.slane %v6419_v46, 6 }
 0x50a   :  { %v2555_v32 = vrot.slane %v6419_v46, 4 }
 0x50b   :  { %4816 = vpow2.f32 %v2453_v56  ;;  %v2604_v56 = vsel %vm212_vm3, %v2602_v38, %v2603_v16 }
 0x50d   :  { %2788 = vrot.lane.b32.xlu0 %v2634_v41, %s4926_s23 }
 0x50f   :  { %v2820_v21 = vpop.permute.xlu1 %2819 }
 0x511   :  { %v2818_v51 = vpop.permute.xlu0 %2817  ;;  %2679 = vrot.lane.b32.xlu0 %v2564_v30, %s4922_s28  ;;  %v2544_v30 = vsel %vm7128_vm14, 0.0, %v2536_v5 }
 0x512   :  { %v2917_v31 = vsel %vm665_vm11, %v6454_v37, %v2818_v51 }
 0x513   :  { %4621 = vmatprep.mubr.msk.f32.mxu1 %vm696_vm12, %v2917_v31 }
 0x514   :  { %v2773_v45 = vpop.permute.xlu1 %2772 }
 0x515   :  { %v2903_v0 = vsel %vm648_vm10, %v6446_v15, %v2773_v45  ;;  %2709 = vrot.lane.b32.xlu0 %v2578_v27, %s4924_s13  ;;  %v2556_v27 = vsel %vm142_vm0, %v2554_v59, %v2555_v32 }
 0x516   :  { %v4815_v8 = vpop.eup %4814  ;;  %v2918_v22 = vsel %vm665_vm11, %v2903_v0, %v2820_v21  ;;  %v4603_v19 = vpop.f32.mrf.mxu0 }
 0x517   :  { %v4249_v28 = vadd.f32 -1.0, %v4815_v8  ;;  %v2388_v34 = vadd.f32 %v4603_v19, %v6258_v36  ;;  %4622 = vmatmul.mubr.msk.f32.vlgmr.msra.gmra.mxu1 %vm696_vm12, %v2918_v22 }
 0x518   :  { %v4817_v44 = vpop.eup %4816  ;;  %v2732_v48 = vpop.permute.xlu1 %2731 }
 0x519   :  { %v2382_v33 = vpop.f32.mrf.mxu0  ;;  %v2492_v47 = vsel %vm2412_vm13, %v2378_v43, %v4249_v28  ;;  %v4248_v6 = vadd.f32 -1.0, %v4817_v44  ;;  %v2430_v50 = vmin.f32 %v2388_v34, 0.0  ;;  %2659 = vrot.lane.b32.xlu0 %v2538_v57, %s4923_s29  ;;  %vm2414_vm13 = vcmp.gt.f32.partialorder %v2388_v34, 0.0 }
 0x51a   :  { %v6475_v54 = vadd.f32 %v2492_v47, %v5833_v2  ;;  %v2383_v39 = vadd.f32 %v6258_v36, %v2382_v33 }
 0x51b   :  { %v2491_v20 = vsel %vm2411_vm1, %v2373_v53, %v4248_v6  ;;  %v2459_v10 = vmul.f32 1.442695, %v2430_v50  ;;  %v2890_v6 = vsel %vm631_vm9, %v5908_v7, %v2732_v48  ;;  %vm7129_vm1 = vmmov %vm7128_vm14 }
 0x51c   :  { %v6479_v61 = vadd.f32 %v2491_v20, %v5881_v52  ;;  %v2429_v35 = vmin.f32 %v2383_v39, 0.0  ;;  %v2775_v4 = vpop.permute.xlu1 %2774  ;;  %2839 = vrot.lane.b32.xlu1 %v6475_v54, %s4927_s30  ;;  %v2637_v23 = vrot.slane %v6475_v54, 7  ;;  %v2581_v5 = vrot.slane %v6475_v54, 5 }
 0x51d   :  { %4818 = vpow2.f32 %v2459_v10  ;;  %vm2413_vm15 = vcmp.gt.f32.partialorder %v2383_v39, 0.0  ;;  %v2904_v20 = vsel %vm648_vm10, %v2890_v6, %v2775_v4 }
 0x51e   :  { %v2457_v43 = vmul.f32 1.442695, %v2429_v35  ;;  %2837 = vrot.lane.b32.xlu0 %v6479_v61, %s4927_s30  ;;  %v2579_v2 = vrot.slane %v6479_v61, 5  ;;  %v2635_v9 = vrot.slane %v6479_v61, 7  ;;  %v2557_v25 = vrot.slane %v6479_v61, 4 }
 0x51f   :  { %v2605_v4 = vrot.slane %v6479_v61, 6 }
 0x520   :  { %4820 = vpow2.f32 %v2457_v43  ;;  %v6487_v53 = vpop.permute.xlu1 %2671  ;;  %2707 = vrot.lane.b32.xlu1 %v2588_v29, %s4924_s13  ;;  %v2580_v52 = vsel %vm177_vm2, %v2577_v63, %v2579_v2  ;;  %v2638_v41 = vsel %vm247_vm4, %v2635_v9, %v2637_v23  ;;  %v2558_v38 = vsel %vm142_vm0, %v2555_v32, %v2557_v25 }
 0x521   :  { %v2582_v33 = vsel %vm177_vm2, %v2579_v2, %v2581_v5  ;;  %v2636_v48 = vsel %vm247_vm4, %v2633_v58, %v2635_v9  ;;  %v2607_v9 = vrot.slane %v6475_v54, 6 }
 0x522   :  { %2711 = vrot.lane.b32.xlu0 %v2580_v52, %s4924_s13 }
 0x524   :  { %2745 = vrot.lane.b32.xlu1 %v2604_v56, %s4925_s20  ;;  %v6503_v21 = vpop.permute.xlu1 %2699 }
 0x526   :  { %2792 = vrot.lane.b32.xlu0 %v2638_v41, %s4926_s23  ;;  %v2606_v41 = vsel %vm212_vm3, %v2603_v16, %v2605_v4 }
 0x528   :  { %2657 = vrot.lane.b32.xlu1 %v2544_v30, %s4923_s29  ;;  %v6520_v0 = vpop.permute.xlu1 %2653 }
 0x52a   :  { %v4819_v51 = vpop.eup %4818  ;;  %v4606_v31 = vpop.f32.mrf.mxu0  ;;  %2683 = vrot.lane.b32.xlu0 %v2558_v38, %s4922_s28 }
 0x52b   :  { %v4251_v63 = vadd.f32 -1.0, %v4819_v51  ;;  %v6514_v45 = vadd.f32 %v4606_v31, %v6258_v36  ;;  %v2608_v51 = vsel %vm212_vm3, %v2605_v4, %v2607_v9  ;;  %v2539_v31 = vrot.slane %v6479_v61, 3 }
 0x52c   :  { %v2392_v8 = vpop.f32.mrf.mxu0  ;;  %2681 = vrot.lane.b32.xlu1 %v2556_v27, %s4922_s28 }
 0x52d   :  { %v4821_v22 = vpop.eup %4820  ;;  %v2494_v19 = vsel %vm2414_vm13, %v2388_v34, %v4251_v63  ;;  %v2432_v28 = vmin.f32 %v6514_v45, 0.0  ;;  %v2393_v44 = vadd.f32 %v6258_v36, %v2392_v8  ;;  %v2540_v16 = vsel %vm7129_vm1, %v2537_v13, %v2539_v31 }
 0x52e   :  { %v6527_v57 = vadd.f32 %v2494_v19, %v5904_v49  ;;  %v4250_v59 = vadd.f32 -1.0, %v4821_v22  ;;  %v6529_v47 = vpop.permute.xlu0 %2823  ;;  %2713 = vrot.lane.b32.xlu0 %v2582_v33, %s4924_s13  ;;  %v2559_v19 = vrot.slane %v6475_v54, 4 }
 0x52f   :  { %v2431_v50 = vmin.f32 %v2393_v44, 0.0  ;;  %v2463_v10 = vmul.f32 1.442695, %v2432_v28  ;;  %vm2415_vm14 = vcmp.gt.f32.partialorder %v2393_v44, 0.0 }
 0x530   :  { %v2493_v34 = vsel %vm2413_vm15, %v2383_v39, %v4250_v59  ;;  %v2822_v36 = vpop.permute.xlu1 %2821  ;;  %2843 = vrot.lane.b32.xlu1 %v6527_v57, %s4927_s30  ;;  %v2611_v58 = vrot.slane %v6527_v57, 6  ;;  %v2560_v59 = vsel %vm142_vm0, %v2557_v25, %v2559_v19  ;;  %vm2416_vm0 = vcmp.gt.f32.partialorder %v6514_v45, 0.0 }
 0x531   :  { %v6538_v49 = vadd.f32 %v2493_v34, %v5978_v11  ;;  %v2461_v35 = vmul.f32 1.442695, %v2431_v50  ;;  %v2919_v43 = vsel %vm665_vm11, %v2904_v20, %v2822_v36 }
 0x532   :  { %v2698_v2 = vpop.permute.xlu0 %2697  ;;  %4624 = vmatprep.mubr.msk.f32.mxu1 %vm696_vm12, %v2919_v43 }
 0x533   :  { %4822 = vpow2.f32 %v2461_v35  ;;  %2841 = vrot.lane.b32.xlu0 %v6538_v49, %s4927_s30  ;;  %v2583_v39 = vrot.slane %v6538_v49, 5  ;;  %v2609_v56 = vrot.slane %v6538_v49, 6  ;;  %v2639_v6 = vrot.slane %v6538_v49, 7 }
 0x534   :  { %4824 = vpow2.f32 %v2463_v10  ;;  %v6549_v11 = vpop.permute.xlu1 %2701  ;;  %2790 = vrot.lane.b32.xlu1 %v2636_v48, %s4926_s23  ;;  %v2879_v34 = vsel %vm614_vm8, %v5895_v60, %v2698_v2 }
 0x535   :  { %v2584_v29 = vsel %vm177_vm2, %v2581_v5, %v2583_v39  ;;  %v2612_v38 = vsel %vm212_vm3, %v2609_v56, %v2611_v58  ;;  %v2871_v39 = vsel %vm597_vm7, %v5888_v24, %v6487_v53 }
 0x536   :  { %v2734_v52 = vpop.permute.xlu0 %2733 }
 0x537   :  { %2715 = vrot.lane.b32.xlu0 %v2584_v29, %s4924_s13  ;;  %v2891_v20 = vsel %vm631_vm9, %v2879_v34, %v2734_v52 }
 0x538   :  { %2747 = vrot.lane.b32.xlu1 %v2606_v41, %s4925_s20  ;;  %v2779_v30 = vpop.permute.xlu1 %2778 }
 0x53a   :  { %v2652_v32 = vpop.permute.xlu0 %2651 }
 0x53b   :  { %2753 = vrot.lane.b32.xlu0 %v2612_v38, %s4925_s20 }
 0x53c   :  { %2749 = vrot.lane.b32.xlu1 %v2608_v51, %s4925_s20  ;;  %v6567_v5 = vpop.permute.xlu1 %2675 }
 0x53e   :  { %v2674_v63 = vpop.permute.xlu0 %2673 }
 0x540   :  { %v4823_v27 = vpop.eup %4822  ;;  %2661 = vrot.lane.b32.xlu1 %v2540_v16, %s4923_s29  ;;  %v2704_v10 = vpop.permute.xlu1 %2703 }
 0x541   :  { %v4825_v8 = vpop.eup %4824  ;;  %v4252_v22 = vadd.f32 -1.0, %v4823_v27 }
 0x542   :  { %v2828_v28 = vpop.permute.xlu0 %2827  ;;  %v4253_v50 = vadd.f32 -1.0, %v4825_v8 }
 0x543   :  { %v2495_v33 = vsel %vm2415_vm14, %v2393_v44, %v4252_v22  ;;  %v2641_v44 = vrot.slane %v6527_v57, 7  ;;  %v2517_v22 = vrot.slane %v6287_v18, 2 }
 0x544   :  { %v6576_v13 = vadd.f32 %v2495_v33, %v6045_v17  ;;  %2685 = vrot.lane.b32.xlu1 %v2560_v59, %s4922_s28  ;;  %v2640_v17 = vsel %vm247_vm4, %v2637_v23, %v2639_v6  ;;  %v2496_v43 = vsel %vm2416_vm0, %v6514_v45, %v4253_v50  ;;  %v2880_v23 = vsel %vm614_vm8, %v2871_v39, %v6503_v21  ;;  %v2826_v52 = vpop.permute.xlu1 %2825 }
 0x545   :  { %v6602_v45 = vadd.f32 %v2496_v43, %v6072_v42  ;;  %v2642_v42 = vsel %vm247_vm4, %v2639_v6, %v2641_v44 }
 0x546   :  { %v2777_v36 = vpop.permute.xlu0 %2776  ;;  %v2643_v35 = vrot.slane %v6576_v13, 7 }
 0x547   :  { %v2905_v25 = vsel %vm648_vm10, %v2891_v20, %v2777_v36 }
 0x548   :  { %2794 = vrot.lane.b32.xlu1 %v2640_v17, %s4926_s23  ;;  %v2920_v2 = vsel %vm665_vm11, %v2905_v25, %v6529_v47  ;;  %v2644_v48 = vsel %vm247_vm4, %v2641_v44, %v2643_v35  ;;  %v2610_v47 = vsel %vm212_vm3, %v2607_v9, %v2609_v56  ;;  %v2865_v56 = vsel %vm580_vm6, 0.0, %v2652_v32 }
 0x549   :  { %4625 = vmatmul.mubr.msk.f32.gmra.mxu1 %vm696_vm12, %v2920_v2  ;;  %2798 = vrot.lane.b32.xlu0 %v2644_v48, %s4926_s23  ;;  %v2872_v9 = vsel %vm597_vm7, %v2865_v56, %v2674_v63  ;;  %v2518_v32 = vrot.slane %v6281_v40, 2 }
 0x54a   :  { %v2736_v4 = vpop.permute.xlu0 %2735  ;;  %v2881_v51 = vsel %vm614_vm8, %v2872_v9, %v6549_v11  ;;  %v2527_v11 = vsel %vm58_vm5, 0.0, %v2517_v22 }
 0x54b   :  { %v2892_v29 = vsel %vm631_vm9, %v2880_v23, %v2736_v4  ;;  %v2519_v59 = vsel %vm58_vm5, %v2517_v22, %v2518_v32  ;;  %v2866_v50 = vsel %vm580_vm6, %v2527_v11, %v6520_v0 }
 0x54c   :  { %v2906_v41 = vsel %vm648_vm10, %v2892_v29, %v2779_v30  ;;  %2751 = vrot.lane.b32.xlu1 %v2610_v47, %s4925_s20 }
 0x54d   :  { %2847 = vrot.lane.b32.xlu0 %v6602_v45, %s4927_s30  ;;  %v2921_v53 = vsel %vm665_vm11, %v2906_v41, %v2826_v52 }
 0x54e   :  { %v2738_v58 = vpop.permute.xlu0 %2737  ;;  %4627 = vmatprep.mubr.msk.f32.mxu1 %vm696_vm12, %v2921_v53 }
 0x54f   :  { %v2893_v31 = vsel %vm631_vm9, %v2881_v51, %v2738_v58 }
 0x550   :  { %2796 = vrot.lane.b32.xlu1 %v2642_v42, %s4926_s23 }
 0x552   :  { %v2656_v21 = vpop.permute.xlu0 %2655 }
 0x553   :  { %v2867_v6 = vsel %vm580_vm6, %v2519_v59, %v2656_v21 }
 0x554   :  { %2845 = vrot.lane.b32.xlu1 %v6576_v13, %s4927_s30 }
 0x556   :  { %v2678_v30 = vpop.permute.xlu0 %2677 }
 0x557   :  { %v2832_v38 = vpop.permute.xlu1 %2831  ;;  %v2874_v34 = vsel %vm597_vm7, %v2867_v6, %v2678_v30 }
 0x55a   :  { %v2781_v16 = vpop.permute.xlu0 %2780 }
 0x55b   :  { %v2907_v27 = vsel %vm648_vm10, %v2893_v31, %v2781_v16  ;;  %v2706_v8 = vpop.permute.xlu1 %2705 }
 0x55c   :  { %v2922_v19 = vsel %vm665_vm11, %v2907_v27, %v2828_v28  ;;  %v2873_v28 = vsel %vm597_vm7, %v2866_v50, %v6567_v5  ;;  %v2883_v36 = vsel %vm614_vm8, %v2874_v34, %v2706_v8 }
 0x55d   :  { %4628 = vmatmul.mubr.msk.f32.gmra.mxu1 %vm696_vm12, %v2922_v19  ;;  %v2882_v35 = vsel %vm614_vm8, %v2873_v28, %v2704_v10  ;;  %v4295_v10 = vld [vmem:[%s7117_s3 + $0x10] sm:$0xff] }
 0x55e   :  { %v2740_v63 = vpop.permute.xlu0 %2739  ;;  %4645 = vmatprep.subr.mxu0 %v4295_v10 }
 0x55f   :  { %v2742_v33 = vpop.permute.xlu1 %2741  ;;  %v2894_v17 = vsel %vm631_vm9, %v2882_v35, %v2740_v63  ;;  %4646 = vmatpush3.msra.mxu0 %v4295_v10 }
 0x560   :  { %v2895_v25 = vsel %vm631_vm9, %v2883_v36, %v2742_v33 }
 0x562   :  { %v2783_v20 = vpop.permute.xlu0 %2782 }
 0x563   :  { %v2785_v44 = vpop.permute.xlu1 %2784  ;;  %v2908_v2 = vsel %vm648_vm10, %v2894_v17, %v2783_v20 }
 0x564   :  { %v2909_v43 = vsel %vm648_vm10, %v2895_v25, %v2785_v44 }
 0x565   :  { %v2924_v5 = vsel %vm665_vm11, %v2909_v43, %v2832_v38 }
 0x566   :  { %v2830_v0 = vpop.permute.xlu0 %2829 }
 0x567   :  { %v2923_v48 = vsel %vm665_vm11, %v2908_v2, %v2830_v0  ;;  %v2520_v0 = vrot.slane %v6422_v3, 2 }
 0x568   :  { %4630 = vmatprep.mubr.msk.f32.mxu1 %vm696_vm12, %v2923_v48 }
 0x569   :  { %4631 = vmatmul.mubr.msk.f32.gmra.mxu1 %vm696_vm12, %v2924_v5 }
 0x572   :  { %v2836_v39 = vpop.permute.xlu0 %2835 }
 0x574   :  { %v2834_v23 = vpop.permute.xlu1 %2833 }
 0x575   :  { %v2925_v4 = vsel %vm665_vm11, %v6454_v37, %v2834_v23  ;;  %v2521_v23 = vrot.slane %v6419_v46, 2 }
 0x576   :  { %4633 = vmatprep.mubr.msk.f32.mxu1 %vm696_vm12, %v2925_v4 }
 0x577   :  { %v2787_v29 = vpop.permute.xlu0 %2786 }
 0x578   :  { %v2910_v47 = vsel %vm648_vm10, %v6446_v15, %v2787_v29  ;;  %v2522_v29 = vsel %vm58_vm5, %v2520_v0, %v2521_v23 }
 0x579   :  { %v2926_v52 = vsel %vm665_vm11, %v2910_v47, %v2836_v39 }
 0x57a   :  { %4634 = vmatmul.mubr.msk.f32.gmra.mxu1 %vm696_vm12, %v2926_v52 }
 0x57b   :  { %v2744_v41 = vpop.permute.xlu0 %2743 }
 0x57c   :  { %v2896_v9 = vsel %vm631_vm9, %v5908_v7, %v2744_v41 }
 0x57f   :  { %v2789_v53 = vpop.permute.xlu0 %2788 }
 0x580   :  { %v2911_v37 = vsel %vm648_vm10, %v2896_v9, %v2789_v53 }
 0x583   :  { %v2680_v58 = vpop.permute.xlu0 %2679 }
 0x584   :  { %v2875_v6 = vsel %vm597_vm7, %v5888_v24, %v2680_v58  ;;  %v2528_v58 = vsel %vm58_vm5, 0.0, %v2520_v0 }
 0x587   :  { %v2710_v42 = vpop.permute.xlu0 %2709 }
 0x588   :  { %v2885_v50 = vsel %vm614_vm8, %v2875_v6, %v2710_v42 }
 0x58b   :  { %v2660_v21 = vpop.permute.xlu0 %2659 }
 0x58c   :  { %v2869_v42 = vsel %vm580_vm6, %v2528_v58, %v2660_v21 }
 0x58e   :  { %v2840_v56 = vpop.permute.xlu1 %2839 }
 0x590   :  { %v2838_v30 = vpop.permute.xlu0 %2837 }
 0x591   :  { %v2927_v38 = vsel %vm665_vm11, %v2911_v37, %v2838_v30 }
 0x592   :  { %v2708_v51 = vpop.permute.xlu1 %2707  ;;  %4636 = vmatprep.mubr.msk.f32.mxu1 %vm696_vm12, %v2927_v38 }
 0x593   :  { %v2884_v32 = vsel %vm614_vm8, %v5895_v60, %v2708_v51 }
 0x594   :  { %v2712_v15 = vpop.permute.xlu0 %2711 }
 0x596   :  { %v2746_v31 = vpop.permute.xlu1 %2745 }
 0x597   :  { %v2897_v7 = vsel %vm631_vm9, %v2884_v32, %v2746_v31 }
 0x598   :  { %v2793_v16 = vpop.permute.xlu0 %2792 }
 0x59a   :  { %v2658_v27 = vpop.permute.xlu1 %2657 }
 0x59b   :  { %v2868_v25 = vsel %vm580_vm6, 0.0, %v2658_v27 }
 0x59c   :  { %v2684_v22 = vpop.permute.xlu0 %2683 }
 0x59d   :  { %v2877_v9 = vsel %vm597_vm7, %v2869_v42, %v2684_v22  ;;  %v6700_v22 = vld [vmem:[%s7118_s2 + $0x2] ss:$0 sm:$0xff] }
 0x59e   :  { %v2682_v8 = vpop.permute.xlu1 %2681 }
 0x59f   :  { %v2876_v24 = vsel %vm597_vm7, %v2868_v25, %v2682_v8 }
 0x5a0   :  { %v2714_v63 = vpop.permute.xlu0 %2713  ;;  %v2886_v2 = vsel %vm614_vm8, %v2876_v24, %v2712_v15 }
 0x5a1   :  { %v2887_v30 = vsel %vm614_vm8, %v2877_v9, %v2714_v63 }
 0x5a2   :  { %v2844_v19 = vpop.permute.xlu1 %2843 }
 0x5a5   :  { %v2842_v28 = vpop.permute.xlu0 %2841 }
 0x5a6   :  { %v2791_v33 = vpop.permute.xlu1 %2790 }
 0x5a7   :  { %v2912_v59 = vsel %vm648_vm10, %v2897_v7, %v2791_v33 }
 0x5a8   :  { %v2928_v11 = vsel %vm665_vm11, %v2912_v59, %v2840_v56 }
 0x5a9   :  { %4637 = vmatmul.mubr.msk.f32.gmra.mxu1 %vm696_vm12, %v2928_v11  ;;  %v2716_v17 = vpop.permute.xlu0 %2715 }
 0x5aa   :  { %v2748_v34 = vpop.permute.xlu1 %2747 }
 0x5ab   :  { %v2898_v20 = vsel %vm631_vm9, %v2885_v50, %v2748_v34 }
 0x5ac   :  { %v2913_v60 = vsel %vm648_vm10, %v2898_v20, %v2793_v16 }
 0x5ad   :  { %v2929_v36 = vsel %vm665_vm11, %v2913_v60, %v2842_v28  ;;  %v2754_v10 = vpop.permute.xlu0 %2753 }
 0x5ae   :  { %v2750_v44 = vpop.permute.xlu1 %2749  ;;  %4639 = vmatprep.mubr.msk.f32.mxu1 %vm696_vm12, %v2929_v36 }
 0x5af   :  { %v2899_v48 = vsel %vm631_vm9, %v2886_v2, %v2750_v44 }
 0x5b2   :  { %v2662_v35 = vpop.permute.xlu1 %2661 }
 0x5b3   :  { %v2870_v52 = vsel %vm580_vm6, %v2522_v29, %v2662_v35 }
 0x5b6   :  { %v2686_v43 = vpop.permute.xlu1 %2685 }
 0x5b7   :  { %v2878_v53 = vsel %vm597_vm7, %v2870_v52, %v2686_v43 }
 0x5b8   :  { %v2888_v37 = vsel %vm614_vm8, %v2878_v53, %v2716_v17 }
 0x5b9   :  { %v2901_v15 = vsel %vm631_vm9, %v2888_v37, %v2754_v10 }
 0x5ba   :  { %v2795_v5 = vpop.permute.xlu1 %2794 }
 0x5bb   :  { %v2914_v39 = vsel %vm648_vm10, %v2899_v48, %v2795_v5  ;;  %v2799_v41 = vpop.permute.xlu0 %2798 }
 0x5bc   :  { %v2930_v4 = vsel %vm665_vm11, %v2914_v39, %v2844_v19  ;;  %v2916_v27 = vsel %vm648_vm10, %v2901_v15, %v2799_v41 }
 0x5bd   :  { %4640 = vmatmul.mubr.msk.f32.gmra.mxu1 %vm696_vm12, %v2930_v4 }
 0x5be   :  { %v2752_v47 = vpop.permute.xlu1 %2751 }
 0x5bf   :  { %v2900_v38 = vsel %vm631_vm9, %v2887_v30, %v2752_v47  ;;  %v2848_v51 = vpop.permute.xlu0 %2847 }
 0x5c0   :  { %v2932_v21 = vsel %vm665_vm11, %v2916_v27, %v2848_v51 }
 0x5c2   :  { %v2797_v56 = vpop.permute.xlu1 %2796 }
 0x5c3   :  { %v2915_v31 = vsel %vm648_vm10, %v2900_v38, %v2797_v56 }
 0x5c6   :  { %v2846_v16 = vpop.permute.xlu1 %2845 }
 0x5c7   :  { %v2931_v8 = vsel %vm665_vm11, %v2915_v31, %v2846_v16 }
 0x5c8   :  { %4642 = vmatprep.mubr.msk.f32.mxu1 %vm696_vm12, %v2931_v8 }
 0x5c9   :  { %4643 = vmatmul.mubr.msk.f32.gmra.mxu1 %vm696_vm12, %v2932_v21 }
 0x5d7   :  { %v4623_v19 = vpop.f32.mrf.mxu1 }
 0x5d8   :  { %v3069_v32 = vadd.f32 %v4623_v19, %v6700_v22 }
 0x5d9   :  { %v3063_v7 = vpop.f32.mrf.mxu1 }
 0x5da   :  { %v3159_v63 = vmin.f32 %v3069_v32, 0.0  ;;  %v3064_v33 = vadd.f32 %v6700_v22, %v3063_v7  ;;  %vm3143_vm10 = vcmp.gt.f32.partialorder %v3069_v32, 0.0 }
 0x5dc   :  { %v3176_v59 = vmul.f32 1.442695, %v3159_v63  ;;  %v3158_v11 = vmin.f32 %v3064_v33, 0.0  ;;  %vm3142_vm5 = vcmp.gt.f32.partialorder %v3064_v33, 0.0 }
 0x5de   :  { %4826 = vpow2.f32 %v3176_v59  ;;  %v3174_v6 = vmul.f32 1.442695, %v3158_v11 }
 0x5e0   :  { %4828 = vpow2.f32 %v3174_v6 }
 0x5eb   :  { %v4827_v50 = vpop.eup %4826 }
 0x5ec   :  { %v4280_v20 = vadd.f32 -1.0, %v4827_v50 }
 0x5ed   :  { %v4829_v34 = vpop.eup %4828 }
 0x5ee   :  { %v4279_v28 = vadd.f32 -1.0, %v4829_v34  ;;  %v3223_v36 = vsel %vm3143_vm10, %v3069_v32, %v4280_v20 }
 0x5f0   :  { %v3222_v60 = vsel %vm3142_vm5, %v3064_v33, %v4279_v28 }
 0x5f1   :  { %4647 = vmatprep.mubr.msk.f32.mxu0 %vm580_vm6, %v3222_v60 }
 0x5f2   :  { %4648 = vmatmul.mubr.msk.f32.vlgmr.msra.gmra.mxu0 %vm580_vm6, %v3223_v36 }
 0x609   :  { %v4626_v44 = vpop.f32.mrf.mxu1 }
 0x60a   :  { %v3079_v35 = vadd.f32 %v4626_v44, %v6700_v22 }
 0x60b   :  { %v3073_v25 = vpop.f32.mrf.mxu1 }
 0x60c   :  { %v3161_v17 = vmin.f32 %v3079_v35, 0.0  ;;  %v3074_v24 = vadd.f32 %v6700_v22, %v3073_v25  ;;  %vm3145_vm12 = vcmp.gt.f32.partialorder %v3079_v35, 0.0 }
 0x60e   :  { %v3180_v43 = vmul.f32 1.442695, %v3161_v17  ;;  %v3160_v2 = vmin.f32 %v3074_v24, 0.0  ;;  %vm3144_vm11 = vcmp.gt.f32.partialorder %v3074_v24, 0.0 }
 0x610   :  { %4830 = vpow2.f32 %v3180_v43  ;;  %v3178_v0 = vmul.f32 1.442695, %v3160_v2 }
 0x612   :  { %4832 = vpow2.f32 %v3178_v0 }
 0x61d   :  { %v4831_v48 = vpop.eup %4830  ;;  %v4629_v5 = vpop.f32.mrf.mxu1 }
 0x61e   :  { %v3089_v10 = vadd.f32 %v4629_v5, %v6700_v22  ;;  %v4282_v4 = vadd.f32 -1.0, %v4831_v48 }
 0x61f   :  { %v4833_v39 = vpop.eup %4832  ;;  %v3083_v23 = vpop.f32.mrf.mxu1 }
 0x620   :  { %v3163_v29 = vmin.f32 %v3089_v10, 0.0  ;;  %v3084_v47 = vadd.f32 %v6700_v22, %v3083_v23  ;;  %v4281_v52 = vadd.f32 -1.0, %v4833_v39  ;;  %v3225_v42 = vsel %vm3145_vm12, %v3079_v35, %v4282_v4 }
 0x621   :  { %vm3147_vm15 = vcmp.gt.f32.partialorder %v3089_v10, 0.0 }
 0x622   :  { %v3184_v41 = vmul.f32 1.442695, %v3163_v29  ;;  %v3162_v53 = vmin.f32 %v3084_v47, 0.0  ;;  %v3224_v58 = vsel %vm3144_vm11, %v3074_v24, %v4281_v52  ;;  %vm3146_vm13 = vcmp.gt.f32.partialorder %v3084_v47, 0.0 }
 0x623   :  { %4650 = vmatprep.mubr.msk.f32.mxu0 %vm580_vm6, %v3224_v58 }
 0x624   :  { %4834 = vpow2.f32 %v3184_v41  ;;  %v3182_v56 = vmul.f32 1.442695, %v3162_v53  ;;  %4651 = vmatmul.mubr.msk.f32.gmra.mxu0 %vm580_vm6, %v3225_v42 }
 0x626   :  { %4836 = vpow2.f32 %v3182_v56 }
 0x629   :  { %v4632_v9 = vpop.f32.mrf.mxu1 }
 0x62a   :  { %v3099_v37 = vadd.f32 %v4632_v9, %v6700_v22 }
 0x62b   :  { %v3093_v30 = vpop.f32.mrf.mxu1 }
 0x62c   :  { %v3165_v38 = vmin.f32 %v3099_v37, 0.0  ;;  %v3094_v51 = vadd.f32 %v6700_v22, %v3093_v30  ;;  %vm3149_vm14 = vcmp.gt.f32.partialorder %v3099_v37, 0.0 }
 0x62e   :  { %v3188_v15 = vmul.f32 1.442695, %v3165_v38  ;;  %v3164_v31 = vmin.f32 %v3094_v51, 0.0  ;;  %vm3148_vm1 = vcmp.gt.f32.partialorder %v3094_v51, 0.0 }
 0x630   :  { %4838 = vpow2.f32 %v3188_v15  ;;  %v3186_v16 = vmul.f32 1.442695, %v3164_v31 }
 0x631   :  { %v4835_v27 = vpop.eup %4834 }
 0x632   :  { %4840 = vpow2.f32 %v3186_v16  ;;  %v4284_v21 = vadd.f32 -1.0, %v4835_v27 }
 0x633   :  { %v4837_v8 = vpop.eup %4836 }
 0x634   :  { %v4283_v19 = vadd.f32 -1.0, %v4837_v8  ;;  %v3227_v7 = vsel %vm3147_vm15, %v3089_v10, %v4284_v21 }
 0x636   :  { %v3226_v32 = vsel %vm3146_vm13, %v3084_v47, %v4283_v19 }
 0x637   :  { %4653 = vmatprep.mubr.msk.f32.mxu0 %vm580_vm6, %v3226_v32 }
 0x638   :  { %4654 = vmatmul.mubr.msk.f32.gmra.mxu0 %vm580_vm6, %v3227_v7 }
 0x63a   :  { %v4635_v63 = vpop.f32.mrf.mxu1 }
 0x63b   :  { %v3109_v33 = vadd.f32 %v4635_v63, %v6700_v22 }
 0x63c   :  { %v3103_v59 = vpop.f32.mrf.mxu1 }
 0x63d   :  { %v4839_v11 = vpop.eup %4838  ;;  %v3167_v6 = vmin.f32 %v3109_v33, 0.0  ;;  %v3104_v50 = vadd.f32 %v6700_v22, %v3103_v59  ;;  %vm3151_vm5 = vcmp.gt.f32.partialorder %v3109_v33, 0.0 }
 0x63e   :  { %v4286_v60 = vadd.f32 -1.0, %v4839_v11 }
 0x63f   :  { %v4841_v34 = vpop.eup %4840  ;;  %v3192_v20 = vmul.f32 1.442695, %v3167_v6  ;;  %v3166_v28 = vmin.f32 %v3104_v50, 0.0  ;;  %vm3150_vm0 = vcmp.gt.f32.partialorder %v3104_v50, 0.0 }
 0x640   :  { %v4285_v36 = vadd.f32 -1.0, %v4841_v34  ;;  %v3229_v25 = vsel %vm3149_vm14, %v3099_v37, %v4286_v60 }
 0x641   :  { %4842 = vpow2.f32 %v3192_v20  ;;  %v3190_v44 = vmul.f32 1.442695, %v3166_v28 }
 0x642   :  { %v3228_v35 = vsel %vm3148_vm1, %v3094_v51, %v4285_v36 }
 0x643   :  { %4844 = vpow2.f32 %v3190_v44  ;;  %4656 = vmatprep.mubr.msk.f32.mxu0 %vm580_vm6, %v3228_v35 }
 0x644   :  { %4657 = vmatmul.mubr.msk.f32.gmra.mxu0 %vm580_vm6, %v3229_v25 }
 0x64e   :  { %v4843_v17 = vpop.eup %4842 }
 0x64f   :  { %v4288_v43 = vadd.f32 -1.0, %v4843_v17  ;;  %v6737_v17 = vld [vmem:[%s7119_s4 + $0x2] ss:$0 sm:$0xff] }
 0x650   :  { %v4845_v24 = vpop.eup %4844 }
 0x651   :  { %v4287_v2 = vadd.f32 -1.0, %v4845_v24  ;;  %v3231_v48 = vsel %vm3151_vm5, %v3109_v33, %v4288_v43 }
 0x653   :  { %v3230_v0 = vsel %vm3150_vm0, %v3104_v50, %v4287_v2 }
 0x654   :  { %4659 = vmatprep.mubr.msk.f32.mxu0 %vm580_vm6, %v3230_v0 }
 0x655   :  { %4660 = vmatmul.mubr.msk.f32.gmra.mxu0 %vm580_vm6, %v3231_v48 }
 0x669   :  { %v4638_v5 = vpop.f32.mrf.mxu1 }
 0x66a   :  { %v3119_v10 = vadd.f32 %v4638_v5, %v6700_v22 }
 0x66b   :  { %v3113_v39 = vpop.f32.mrf.mxu1 }
 0x66c   :  { %v3169_v23 = vmin.f32 %v3119_v10, 0.0  ;;  %v3114_v4 = vadd.f32 %v6700_v22, %v3113_v39  ;;  %vm3153_vm11 = vcmp.gt.f32.partialorder %v3119_v10, 0.0 }
 0x66e   :  { %v3196_v29 = vmul.f32 1.442695, %v3169_v23  ;;  %v3168_v47 = vmin.f32 %v3114_v4, 0.0  ;;  %vm3152_vm10 = vcmp.gt.f32.partialorder %v3114_v4, 0.0 }
 0x670   :  { %4846 = vpow2.f32 %v3196_v29  ;;  %v3194_v52 = vmul.f32 1.442695, %v3168_v47 }
 0x672   :  { %4848 = vpow2.f32 %v3194_v52 }
 0x67d   :  { %v4847_v41 = vpop.eup %4846  ;;  %v4641_v53 = vpop.f32.mrf.mxu1 }
 0x67e   :  { %v3129_v58 = vadd.f32 %v4641_v53, %v6700_v22  ;;  %v4290_v9 = vadd.f32 -1.0, %v4847_v41 }
 0x67f   :  { %v4849_v42 = vpop.eup %4848  ;;  %v3123_v56 = vpop.f32.mrf.mxu1 }
 0x680   :  { %v3171_v37 = vmin.f32 %v3129_v58, 0.0  ;;  %v3124_v30 = vadd.f32 %v6700_v22, %v3123_v56  ;;  %v4289_v38 = vadd.f32 -1.0, %v4849_v42  ;;  %v3233_v16 = vsel %vm3153_vm11, %v3119_v10, %v4290_v9 }
 0x681   :  { %vm3155_vm13 = vcmp.gt.f32.partialorder %v3129_v58, 0.0 }
 0x682   :  { %v3200_v51 = vmul.f32 1.442695, %v3171_v37  ;;  %v3170_v15 = vmin.f32 %v3124_v30, 0.0  ;;  %v3232_v31 = vsel %vm3152_vm10, %v3114_v4, %v4289_v38  ;;  %vm3154_vm12 = vcmp.gt.f32.partialorder %v3124_v30, 0.0 }
 0x683   :  { %4662 = vmatprep.mubr.msk.f32.mxu0 %vm580_vm6, %v3232_v31 }
 0x684   :  { %4850 = vpow2.f32 %v3200_v51  ;;  %v3198_v27 = vmul.f32 1.442695, %v3170_v15  ;;  %4663 = vmatmul.mubr.msk.f32.gmra.mxu0 %vm580_vm6, %v3233_v16 }
 0x686   :  { %4852 = vpow2.f32 %v3198_v27 }
 0x689   :  { %v4644_v8 = vpop.f32.mrf.mxu1 }
 0x68a   :  { %v3139_v21 = vadd.f32 %v4644_v8, %v6700_v22 }
 0x68b   :  { %v3133_v19 = vpop.f32.mrf.mxu1 }
 0x68c   :  { %v3173_v32 = vmin.f32 %v3139_v21, 0.0  ;;  %v3134_v7 = vadd.f32 %v6700_v22, %v3133_v19  ;;  %vm3157_vm1 = vcmp.gt.f32.partialorder %v3139_v21, 0.0 }
 0x68e   :  { %v3204_v63 = vmul.f32 1.442695, %v3173_v32  ;;  %v3172_v33 = vmin.f32 %v3134_v7, 0.0  ;;  %vm3156_vm15 = vcmp.gt.f32.partialorder %v3134_v7, 0.0 }
 0x690   :  { %4854 = vpow2.f32 %v3204_v63  ;;  %v3202_v59 = vmul.f32 1.442695, %v3172_v33 }
 0x691   :  { %v4851_v11 = vpop.eup %4850 }
 0x692   :  { %4856 = vpow2.f32 %v3202_v59  ;;  %v4292_v50 = vadd.f32 -1.0, %v4851_v11 }
 0x693   :  { %v4853_v6 = vpop.eup %4852 }
 0x694   :  { %v4291_v34 = vadd.f32 -1.0, %v4853_v6  ;;  %v3235_v28 = vsel %vm3155_vm13, %v3129_v58, %v4292_v50 }
 0x696   :  { %v3234_v20 = vsel %vm3154_vm12, %v3124_v30, %v4291_v34 }
 0x697   :  { %4665 = vmatprep.mubr.msk.f32.mxu0 %vm580_vm6, %v3234_v20 }
 0x698   :  { %4666 = vmatmul.mubr.msk.f32.gmra.mxu0 %vm580_vm6, %v3235_v28 }
 0x69d   :  { %v4855_v60 = vpop.eup %4854 }
 0x69e   :  { %v4294_v22 = vadd.f32 -1.0, %v4855_v60 }
 0x69f   :  { %v4857_v36 = vpop.eup %4856 }
 0x6a0   :  { %v4293_v44 = vadd.f32 -1.0, %v4857_v36  ;;  %v3237_v25 = vsel %vm3157_vm1, %v3139_v21, %v4294_v22 }
 0x6a2   :  { %v3236_v35 = vsel %vm3156_vm15, %v3134_v7, %v4293_v44 }
 0x6a3   :  { %4668 = vmatprep.mubr.msk.f32.mxu0 %vm580_vm6, %v3236_v35 }
 0x6a4   :  { %4669 = vmatmul.mubr.msk.f32.gmra.mxu0 %vm580_vm6, %v3237_v25 }
 0x6b2   :  { %v4649_v24 = vpop.f32.mrf.mxu0 }
 0x6b3   :  { %v3368_v43 = vadd.f32 %v4649_v24, %v6737_v17 }
 0x6b4   :  { %v3362_v2 = vpop.f32.mrf.mxu0 }
 0x6b5   :  { %v3458_v0 = vmin.f32 %v3368_v43, 0.0  ;;  %v3363_v48 = vadd.f32 %v6737_v17, %v3362_v2  ;;  %vm3442_vm14 = vcmp.gt.f32.partialorder %v3368_v43, 0.0 }
 0x6b7   :  { %v3475_v5 = vmul.f32 1.442695, %v3458_v0  ;;  %v3457_v10 = vmin.f32 %v3363_v48, 0.0  ;;  %vm3441_vm0 = vcmp.gt.f32.partialorder %v3363_v48, 0.0 }
 0x6b9   :  { %4858 = vpow2.f32 %v3475_v5  ;;  %v3473_v39 = vmul.f32 1.442695, %v3457_v10 }
 0x6bb   :  { %4860 = vpow2.f32 %v3473_v39 }
 0x6c6   :  { %v4859_v23 = vpop.eup %4858 }
 0x6c7   :  { %v4315_v4 = vadd.f32 -1.0, %v4859_v23 }
 0x6c8   :  { %v4861_v29 = vpop.eup %4860 }
 0x6c9   :  { %v3522_v47 = vsel %vm3442_vm14, %v3368_v43, %v4315_v4  ;;  %v4314_v52 = vadd.f32 -1.0, %v4861_v29 }
 0x6ca   :  { %v6742_v41 = vadd.f32 %v3522_v47, %v6281_v40 }
 0x6cb   :  { %v3521_v53 = vsel %vm3441_vm0, %v3363_v48, %v4314_v52 }
 0x6cc   :  { %v6745_v58 = vadd.f32 %v3521_v53, %v6287_v18  ;;  %3787 = vrot.lane.b32.xlu0 %v6742_v41, %s4924_s13  ;;  %v3570_v9 = vrot.slane %v6742_v41, 5  ;;  %v3618_v44 = vrot.slane %v6742_v41, 6  ;;  %v3652_v2 = vrot.slane %v6742_v41, 7 }
 0x6ce   :  { %3785 = vrot.lane.b32.xlu1 %v6745_v58, %s4924_s13  ;;  %v3617_v42 = vrot.slane %v6745_v58, 6  ;;  %v3569_v56 = vrot.slane %v6745_v58, 5  ;;  %v3651_v37 = vrot.slane %v6745_v58, 7 }
 0x6d0   :  { %v3649_v40 = vsel %vm212_vm3, 0.0, %v3617_v42  ;;  %v6759_v18 = vsel %vm177_vm2, %v3569_v56, %v3570_v9  ;;  %v3683_v30 = vsel %vm247_vm4, 0.0, %v3651_v37  ;;  %v3619_v24 = vsel %vm212_vm3, %v3617_v42, %v3618_v44 }
 0x6d1   :  { %v3653_v23 = vsel %vm247_vm4, %v3651_v37, %v3652_v2 }
 0x6d2   :  { %3687 = vrot.lane.b32.xlu1 %v3649_v40, %s4923_s29 }
 0x6d6   :  { %3737 = vrot.lane.b32.xlu1 %v3683_v30, %s4922_s28 }
 0x6e4   :  { %v4652_v38 = vpop.f32.mrf.mxu0 }
 0x6e5   :  { %v3378_v51 = vadd.f32 %v4652_v38, %v6737_v17 }
 0x6e6   :  { %v3372_v15 = vpop.f32.mrf.mxu0 }
 0x6e7   :  { %v3460_v31 = vmin.f32 %v3378_v51, 0.0  ;;  %v3373_v16 = vadd.f32 %v6737_v17, %v3372_v15  ;;  %vm3444_vm5 = vcmp.gt.f32.partialorder %v3378_v51, 0.0 }
 0x6e9   :  { %v3479_v27 = vmul.f32 1.442695, %v3460_v31  ;;  %v3459_v8 = vmin.f32 %v3373_v16, 0.0  ;;  %vm3443_vm10 = vcmp.gt.f32.partialorder %v3373_v16, 0.0 }
 0x6eb   :  { %4862 = vpow2.f32 %v3479_v27  ;;  %v3477_v21 = vmul.f32 1.442695, %v3459_v8  ;;  %v3915_v27 = vld [vmem:[%s7120_s5 + $0x18] sm:$0xff] }
 0x6ec   :  { %4671 = vmatprep.subr.mxu1 %v3915_v27 }
 0x6ed   :  { %4864 = vpow2.f32 %v3477_v21  ;;  %4672 = vmatpush3.msra.mxu1 %v3915_v27 }
 0x6f8   :  { %v4863_v19 = vpop.eup %4862  ;;  %v4655_v32 = vpop.f32.mrf.mxu0 }
 0x6f9   :  { %v4317_v7 = vadd.f32 -1.0, %v4863_v19  ;;  %v3388_v63 = vadd.f32 %v4655_v32, %v6737_v17  ;;  %v3913_v32 = vld [vmem:[%s7120_s5 + $0x8] sm:$0xff] }
 0x6fa   :  { %v4865_v33 = vpop.eup %4864  ;;  %v3382_v59 = vpop.f32.mrf.mxu0 }
 0x6fb   :  { %v3524_v11 = vsel %vm3444_vm5, %v3378_v51, %v4317_v7  ;;  %v4316_v6 = vadd.f32 -1.0, %v4865_v33  ;;  %v3462_v50 = vmin.f32 %v3388_v63, 0.0  ;;  %v3383_v20 = vadd.f32 %v6737_v17, %v3382_v59 }
 0x6fc   :  { %v6768_v34 = vadd.f32 %v3524_v11, %v6321_v26  ;;  %vm3446_vm11 = vcmp.gt.f32.partialorder %v3388_v63, 0.0 }
 0x6fd   :  { %v3523_v28 = vsel %vm3443_vm10, %v3373_v16, %v4316_v6  ;;  %v3483_v60 = vmul.f32 1.442695, %v3462_v50  ;;  %v3461_v22 = vmin.f32 %v3383_v20, 0.0  ;;  %vm3445_vm12 = vcmp.gt.f32.partialorder %v3383_v20, 0.0  ;;  %v3912_v6 = vld [vmem:[%s7120_s5] sm:$0xff] }
 0x6fe   :  { %v6772_v36 = vadd.f32 %v3523_v28, %v6325_v62  ;;  %3791 = vrot.lane.b32.xlu0 %v6768_v34, %s4924_s13  ;;  %v3574_v62 = vrot.slane %v6768_v34, 5  ;;  %v3622_v16 = vrot.slane %v6768_v34, 6  ;;  %v3656_v59 = vrot.slane %v6768_v34, 7 }
 0x6ff   :  { %4866 = vpow2.f32 %v3483_v60  ;;  %v3481_v35 = vmul.f32 1.442695, %v3461_v22 }
 0x700   :  { %3789 = vrot.lane.b32.xlu1 %v6772_v36, %s4924_s13  ;;  %v3620_v26 = vrot.slane %v6772_v36, 6  ;;  %v3572_v25 = vrot.slane %v6772_v36, 5  ;;  %v3654_v0 = vrot.slane %v6772_v36, 7 }
 0x701   :  { %4868 = vpow2.f32 %v3481_v35 }
 0x702   :  { %3689 = vrot.lane.b32.xlu0 %v3619_v24, %s4923_s29  ;;  %v3621_v43 = vsel %vm212_vm3, %v3618_v44, %v3620_v26  ;;  %v6788_v48 = vsel %vm177_vm2, %v3570_v9, %v3572_v25  ;;  %v6791_v5 = vsel %vm177_vm2, %v3572_v25, %v3574_v62  ;;  %v3655_v52 = vsel %vm247_vm4, %v3652_v2, %v3654_v0 }
 0x703   :  { %v3623_v21 = vsel %vm212_vm3, %v3620_v26, %v3622_v16  ;;  %v3657_v34 = vsel %vm247_vm4, %v3654_v0, %v3656_v59 }
 0x704   :  { %3691 = vrot.lane.b32.xlu1 %v3621_v43, %s4923_s29  ;;  %v4658_v10 = vpop.f32.mrf.mxu0 }
 0x705   :  { %v6795_v39 = vadd.f32 %v4658_v10, %v6737_v17 }
 0x706   :  { %3739 = vrot.lane.b32.xlu0 %v3653_v23, %s4922_s28  ;;  %v3392_v4 = vpop.f32.mrf.mxu0 }
 0x707   :  { %v3464_v29 = vmin.f32 %v6795_v39, 0.0  ;;  %v6801_v47 = vadd.f32 %v6737_v17, %v3392_v4  ;;  %vm3448_vm13 = vcmp.gt.f32.partialorder %v6795_v39, 0.0 }
 0x708   :  { %3741 = vrot.lane.b32.xlu1 %v3655_v52, %s4922_s28 }
 0x709   :  { %v3487_v41 = vmul.f32 1.442695, %v3464_v29  ;;  %v3463_v53 = vmin.f32 %v6801_v47, 0.0  ;;  %vm3447_vm15 = vcmp.gt.f32.partialorder %v6801_v47, 0.0 }
 0x70b   :  { %4870 = vpow2.f32 %v3487_v41  ;;  %v3485_v42 = vmul.f32 1.442695, %v3463_v53 }
 0x70c   :  { %v4867_v9 = vpop.eup %4866 }
 0x70d   :  { %v4319_v40 = vadd.f32 -1.0, %v4867_v9  ;;  %4872 = vpow2.f32 %v3485_v42 }
 0x70e   :  { %v4869_v37 = vpop.eup %4868 }
 0x70f   :  { %v3526_v30 = vsel %vm3446_vm11, %v3388_v63, %v4319_v40  ;;  %v4318_v51 = vadd.f32 -1.0, %v4869_v37 }
 0x710   :  { %v6807_v38 = vadd.f32 %v3526_v30, %v6357_v14  ;;  %v3914_v14 = vld [vmem:[%s7120_s5 + $0x10] sm:$0xff] }
 0x711   :  { %v3525_v15 = vsel %vm3445_vm12, %v3383_v20, %v4318_v51  ;;  %4673 = vmatprep.subr.mxu1 %v3914_v14 }
 0x712   :  { %3795 = vrot.lane.b32.xlu0 %v6807_v38, %s4924_s13  ;;  %v6812_v31 = vadd.f32 %v3525_v15, %v6364_v55  ;;  %4674 = vmatpush3.msra.mxu1 %v3914_v14  ;;  %v3578_v11 = vrot.slane %v6807_v38, 5  ;;  %v3660_v41 = vrot.slane %v6807_v38, 7 }
 0x713   :  { %4675 = vmatprep.subr.mxu1 %v3913_v32 }
 0x714   :  { %3793 = vrot.lane.b32.xlu1 %v6812_v31, %s4924_s13  ;;  %v3624_v55 = vrot.slane %v6812_v31, 6  ;;  %v3576_v19 = vrot.slane %v6812_v31, 5  ;;  %v3658_v60 = vrot.slane %v6812_v31, 7  ;;  %4676 = vmatpush3.msra.mxu1 %v3913_v32 }
 0x715   :  { %v4661_v8 = vpop.f32.mrf.mxu0  ;;  %4677 = vmatprep.subr.mxu1 %v3912_v6 }
 0x716   :  { %v3408_v7 = vadd.f32 %v4661_v8, %v6737_v17  ;;  %3693 = vrot.lane.b32.xlu0 %v3623_v21, %s4923_s29  ;;  %v3625_v33 = vsel %vm212_vm3, %v3622_v16, %v3624_v55  ;;  %v6840_v36 = vsel %vm177_vm2, %v3574_v62, %v3576_v19  ;;  %v6845_v44 = vsel %vm177_vm2, %v3576_v19, %v3578_v11 }
 0x717   :  { %v3402_v63 = vpop.f32.mrf.mxu0  ;;  %4678 = vmatpush3.msra.mxu1 %v3912_v6  ;;  %v3659_v0 = vsel %vm247_vm4, %v3656_v59, %v3658_v60  ;;  %v3661_v9 = vsel %vm247_vm4, %v3658_v60, %v3660_v41 }
 0x718   :  { %v4871_v50 = vpop.eup %4870  ;;  %v3466_v20 = vmin.f32 %v3408_v7, 0.0  ;;  %v3403_v28 = vadd.f32 %v6737_v17, %v3402_v63  ;;  %3695 = vrot.lane.b32.xlu1 %v3625_v33, %s4923_s29  ;;  %vm3450_vm1 = vcmp.gt.f32.partialorder %v3408_v7, 0.0 }
 0x719   :  { %v4321_v22 = vadd.f32 -1.0, %v4871_v50 }
 0x71a   :  { %v4873_v35 = vpop.eup %4872  ;;  %v3491_v26 = vmul.f32 1.442695, %v3466_v20  ;;  %v3465_v25 = vmin.f32 %v3403_v28, 0.0  ;;  %3743 = vrot.lane.b32.xlu0 %v3657_v34, %s4922_s28  ;;  %vm3449_vm14 = vcmp.gt.f32.partialorder %v3403_v28, 0.0 }
 0x71b   :  { %v3528_v24 = vsel %vm3448_vm13, %v6795_v39, %v4321_v22  ;;  %v4320_v62 = vadd.f32 -1.0, %v4873_v35  ;;  %v3626_v39 = vrot.slane %v6807_v38, 6 }
 0x71c   :  { %v3544_v43 = vadd.f32 %v3528_v24, %v6385_v12  ;;  %4874 = vpow2.f32 %v3491_v26  ;;  %v3489_v2 = vmul.f32 1.442695, %v3465_v25  ;;  %3745 = vrot.lane.b32.xlu1 %v3659_v0, %s4922_s28 }
 0x71d   :  { %v3527_v10 = vsel %vm3447_vm15, %v6801_v47, %v4320_v62  ;;  %v3627_v12 = vsel %vm212_vm3, %v3624_v55, %v3626_v39 }
 0x71e   :  { %v3543_v23 = vadd.f32 %v3527_v10, %v6399_v1  ;;  %4876 = vpow2.f32 %v3489_v2  ;;  %3799 = vrot.lane.b32.xlu0 %v3544_v43, %s4924_s13  ;;  %v3582_v52 = vrot.slane %v3544_v43, 5  ;;  %v3630_v14 = vrot.slane %v3544_v43, 6 }
 0x71f   :  { %v3664_v19 = vrot.slane %v3544_v43, 7 }
 0x720   :  { %v3628_v4 = vrot.slane %v3543_v23, 6  ;;  %v3580_v29 = vrot.slane %v3543_v23, 5  ;;  %3797 = vrot.lane.b32.xlu1 %v3543_v23, %s4924_s13  ;;  %v3662_v42 = vrot.slane %v3543_v23, 7 }
 0x722   :  { %3697 = vrot.lane.b32.xlu0 %v3627_v12, %s4923_s29  ;;  %v3629_v47 = vsel %vm212_vm3, %v3626_v39, %v3628_v4  ;;  %v6864_v1 = vsel %vm177_vm2, %v3578_v11, %v3580_v29  ;;  %v6867_v53 = vsel %vm177_vm2, %v3580_v29, %v3582_v52  ;;  %v3663_v40 = vsel %vm247_vm4, %v3660_v41, %v3662_v42 }
 0x723   :  { %v3631_v55 = vsel %vm212_vm3, %v3628_v4, %v3630_v14  ;;  %v3665_v63 = vsel %vm247_vm4, %v3662_v42, %v3664_v19 }
 0x724   :  { %3699 = vrot.lane.b32.xlu1 %v3629_v47, %s4923_s29 }
 0x726   :  { %3747 = vrot.lane.b32.xlu0 %v3661_v9, %s4922_s28 }
 0x728   :  { %3749 = vrot.lane.b32.xlu1 %v3663_v40, %s4922_s28 }
 0x729   :  { %v4875_v37 = vpop.eup %4874 }
 0x72a   :  { %v4323_v30 = vadd.f32 -1.0, %v4875_v37 }
 0x72b   :  { %v4877_v38 = vpop.eup %4876 }
 0x72c   :  { %v3530_v51 = vsel %vm3450_vm1, %v3408_v7, %v4323_v30  ;;  %v4322_v15 = vadd.f32 -1.0, %v4877_v38 }
 0x72d   :  { %v6875_v31 = vadd.f32 %v3530_v51, %v6419_v46 }
 0x72e   :  { %v3529_v16 = vsel %vm3449_vm14, %v3403_v28, %v4322_v15  ;;  %v3615_v28 = vsel %vm177_vm2, 0.0, %v3569_v56 }
 0x72f   :  { %v6878_v27 = vadd.f32 %v3529_v16, %v6422_v3  ;;  %3803 = vrot.lane.b32.xlu0 %v6875_v31, %s4924_s13  ;;  %v3585_v46 = vrot.slane %v6875_v31, 5  ;;  %v3633_v40 = vrot.slane %v6875_v31, 6  ;;  %v3667_v15 = vrot.slane %v6875_v31, 7 }
 0x731   :  { %3801 = vrot.lane.b32.xlu1 %v6878_v27, %s4924_s13  ;;  %v3632_v8 = vrot.slane %v6878_v27, 6  ;;  %v3584_v21 = vrot.slane %v6878_v27, 5  ;;  %v3666_v32 = vrot.slane %v6878_v27, 7 }
 0x733   :  { %3701 = vrot.lane.b32.xlu0 %v3631_v55, %s4923_s29  ;;  %v3650_v3 = vsel %vm212_vm3, 0.0, %v3632_v8  ;;  %v6894_v7 = vsel %vm177_vm2, %v3584_v21, %v3585_v46  ;;  %v3684_v33 = vsel %vm247_vm4, 0.0, %v3666_v32  ;;  %v3634_v38 = vsel %vm212_vm3, %v3632_v8, %v3633_v40 }
 0x734   :  { %v3668_v19 = vsel %vm247_vm4, %v3666_v32, %v3667_v15 }
 0x735   :  { %3703 = vrot.lane.b32.xlu1 %v3650_v3, %s4923_s29 }
 0x737   :  { %3751 = vrot.lane.b32.xlu0 %v3665_v63, %s4922_s28 }
 0x739   :  { %3753 = vrot.lane.b32.xlu1 %v3684_v33, %s4922_s28 }
 0x740   :  { %v3786_v59 = vpop.permute.xlu1 %3785 }
 0x744   :  { %v3688_v11 = vpop.permute.xlu1 %3687  ;;  %v4664_v6 = vpop.f32.mrf.mxu0 }
 0x745   :  { %v3418_v50 = vadd.f32 %v4664_v6, %v6737_v17  ;;  %v3833_v34 = vsel %vm580_vm6, %v3615_v28, %v3688_v11 }
 0x746   :  { %v3412_v20 = vpop.f32.mrf.mxu0 }
 0x747   :  { %v3468_v60 = vmin.f32 %v3418_v50, 0.0  ;;  %v3413_v22 = vadd.f32 %v6737_v17, %v3412_v20  ;;  %vm3452_vm0 = vcmp.gt.f32.partialorder %v3418_v50, 0.0  ;;  %v3788_v20 = vpop.permute.xlu0 %3787 }
 0x748   :  { %v3738_v35 = vpop.permute.xlu1 %3737 }
 0x749   :  { %v3495_v26 = vmul.f32 1.442695, %v3468_v60  ;;  %v3467_v25 = vmin.f32 %v3413_v22, 0.0  ;;  %v3849_v24 = vsel %vm597_vm7, %v3833_v34, %v3738_v35  ;;  %vm3451_vm5 = vcmp.gt.f32.partialorder %v3413_v22, 0.0 }
 0x74a   :  { %v3865_v62 = vsel %vm614_vm8, %v3849_v24, %v3786_v59 }
 0x74b   :  { %4878 = vpow2.f32 %v3495_v26  ;;  %v3493_v43 = vmul.f32 1.442695, %v3467_v25  ;;  %3881 = vst.msk [vmem:[#allocation2] sm:$0xff] %vm631_vm9, %v3865_v62 }
 0x74d   :  { %4880 = vpow2.f32 %v3493_v43 }
 0x758   :  { %v4879_v58 = vpop.eup %4878  ;;  %v4667_v2 = vpop.f32.mrf.mxu0 }
 0x759   :  { %v4325_v56 = vadd.f32 -1.0, %v4879_v58  ;;  %v3428_v0 = vadd.f32 %v4667_v2, %v6737_v17 }
 0x75a   :  { %v4881_v10 = vpop.eup %4880  ;;  %v3422_v23 = vpop.f32.mrf.mxu0 }
 0x75b   :  { %v3532_v39 = vsel %vm3452_vm0, %v3418_v50, %v4325_v56  ;;  %v4324_v4 = vadd.f32 -1.0, %v4881_v10  ;;  %v3470_v29 = vmin.f32 %v3428_v0, 0.0  ;;  %v3423_v52 = vadd.f32 %v6737_v17, %v3422_v23 }
 0x75c   :  { %v6912_v12 = vadd.f32 %v3532_v39, %v6475_v54  ;;  %vm3454_vm10 = vcmp.gt.f32.partialorder %v3428_v0, 0.0 }
 0x75d   :  { %v3531_v47 = vsel %vm3451_vm5, %v3413_v22, %v4324_v4  ;;  %v3499_v41 = vmul.f32 1.442695, %v3470_v29  ;;  %v3469_v9 = vmin.f32 %v3423_v52, 0.0  ;;  %vm3453_vm11 = vcmp.gt.f32.partialorder %v3423_v52, 0.0 }
 0x75e   :  { %v6916_v42 = vadd.f32 %v3531_v47, %v6479_v61  ;;  %3807 = vrot.lane.b32.xlu0 %v6912_v12, %s4924_s13  ;;  %v3589_v61 = vrot.slane %v6912_v12, 5  ;;  %v3637_v24 = vrot.slane %v6912_v12, 6  ;;  %v3671_v10 = vrot.slane %v6912_v12, 7 }
 0x75f   :  { %4882 = vpow2.f32 %v3499_v41  ;;  %v3497_v37 = vmul.f32 1.442695, %v3469_v9 }
 0x760   :  { %3805 = vrot.lane.b32.xlu1 %v6916_v42, %s4924_s13  ;;  %v3635_v54 = vrot.slane %v6916_v42, 6  ;;  %v3587_v30 = vrot.slane %v6916_v42, 5  ;;  %v3669_v16 = vrot.slane %v6916_v42, 7 }
 0x761   :  { %4884 = vpow2.f32 %v3497_v37 }
 0x762   :  { %3705 = vrot.lane.b32.xlu0 %v3634_v38, %s4923_s29  ;;  %v3636_v51 = vsel %vm212_vm3, %v3633_v40, %v3635_v54  ;;  %v6932_v14 = vsel %vm177_vm2, %v3585_v46, %v3587_v30  ;;  %v6935_v55 = vsel %vm177_vm2, %v3587_v30, %v3589_v61  ;;  %v3670_v59 = vsel %vm247_vm4, %v3667_v15, %v3669_v16 }
 0x763   :  { %v3638_v43 = vsel %vm212_vm3, %v3635_v54, %v3637_v24  ;;  %v3672_v42 = vsel %vm247_vm4, %v3669_v16, %v3671_v10 }
 0x764   :  { %3707 = vrot.lane.b32.xlu1 %v3636_v51, %s4923_s29  ;;  %v4670_v8 = vpop.f32.mrf.mxu0 }
 0x765   :  { %v3438_v3 = vadd.f32 %v4670_v8, %v6737_v17 }
 0x766   :  { %3755 = vrot.lane.b32.xlu0 %v3668_v19, %s4922_s28  ;;  %v3432_v63 = vpop.f32.mrf.mxu0 }
 0x767   :  { %v3472_v33 = vmin.f32 %v3438_v3, 0.0  ;;  %v3433_v31 = vadd.f32 %v6737_v17, %v3432_v63  ;;  %vm3456_vm12 = vcmp.gt.f32.partialorder %v3438_v3, 0.0 }
 0x768   :  { %3757 = vrot.lane.b32.xlu1 %v3670_v59, %s4922_s28 }
 0x769   :  { %v3503_v46 = vmul.f32 1.442695, %v3472_v33  ;;  %v3471_v11 = vmin.f32 %v3433_v31, 0.0  ;;  %vm3455_vm13 = vcmp.gt.f32.partialorder %v3433_v31, 0.0 }
 0x76b   :  { %4886 = vpow2.f32 %v3503_v46  ;;  %v3501_v6 = vmul.f32 1.442695, %v3471_v11 }
 0x76c   :  { %v4883_v50 = vpop.eup %4882 }
 0x76d   :  { %v4327_v28 = vadd.f32 -1.0, %v4883_v50  ;;  %4888 = vpow2.f32 %v3501_v6 }
 0x76e   :  { %v4885_v32 = vpop.eup %4884 }
 0x76f   :  { %v3534_v60 = vsel %vm3454_vm10, %v3428_v0, %v4327_v28  ;;  %v4326_v34 = vadd.f32 -1.0, %v4885_v32 }
 0x770   :  { %v6945_v22 = vadd.f32 %v3534_v60, %v6527_v57  ;;  %v6947_v17 = vpop.permute.xlu0 %3791 }
 0x771   :  { %v3533_v35 = vsel %vm3453_vm11, %v3423_v52, %v4326_v34 }
 0x772   :  { %v3790_v26 = vpop.permute.xlu1 %3789  ;;  %3811 = vrot.lane.b32.xlu0 %v6945_v22, %s4924_s13  ;;  %v3549_v25 = vadd.f32 %v3533_v35, %v6538_v49  ;;  %v3593_v56 = vrot.slane %v6945_v22, 5  ;;  %v3641_v38 = vrot.slane %v6945_v22, 6 }
 0x774   :  { %v3690_v62 = vpop.permute.xlu0 %3689  ;;  %3809 = vrot.lane.b32.xlu1 %v3549_v25, %s4924_s13  ;;  %v3639_v57 = vrot.slane %v3549_v25, 6  ;;  %v3591_v58 = vrot.slane %v3549_v25, 5  ;;  %v3673_v4 = vrot.slane %v3549_v25, 7 }
 0x775   :  { %v3834_v49 = vsel %vm580_vm6, %v6759_v18, %v3690_v62 }
 0x776   :  { %v3692_v2 = vpop.permute.xlu1 %3691  ;;  %3709 = vrot.lane.b32.xlu0 %v3638_v43, %s4923_s29  ;;  %v3640_v0 = vsel %vm212_vm3, %v3637_v24, %v3639_v57  ;;  %v6962_v29 = vsel %vm177_vm2, %v3589_v61, %v3591_v58  ;;  %v6965_v52 = vsel %vm177_vm2, %v3591_v58, %v3593_v56  ;;  %v3674_v51 = vsel %vm247_vm4, %v3671_v10, %v3673_v4 }
 0x777   :  { %v3835_v18 = vsel %vm580_vm6, %v6788_v48, %v3692_v2  ;;  %v3642_v16 = vsel %vm212_vm3, %v3639_v57, %v3641_v38 }
 0x778   :  { %v4887_v23 = vpop.eup %4886  ;;  %v3740_v39 = vpop.permute.xlu0 %3739  ;;  %3711 = vrot.lane.b32.xlu1 %v3640_v0, %s4923_s29 }
 0x779   :  { %v4329_v47 = vadd.f32 -1.0, %v4887_v23  ;;  %v3850_v41 = vsel %vm597_vm7, %v3834_v49, %v3740_v39 }
 0x77a   :  { %v4889_v12 = vpop.eup %4888  ;;  %v3866_v9 = vsel %vm614_vm8, %v3850_v41, %v3788_v20  ;;  %v3742_v40 = vpop.permute.xlu1 %3741  ;;  %3759 = vrot.lane.b32.xlu0 %v3672_v42, %s4922_s28 }
 0x77b   :  { %v3536_v37 = vsel %vm3456_vm12, %v3438_v3, %v4329_v47  ;;  %v4328_v54 = vadd.f32 -1.0, %v4889_v12  ;;  %3882 = vst.msk [vmem:[#allocation2 + $0x8] sm:$0xff] %vm631_vm9, %v3866_v9  ;;  %v3851_v30 = vsel %vm597_vm7, %v3835_v18, %v3742_v40  ;;  %v3675_v3 = vrot.slane %v6945_v22, 7 }
 0x77c   :  { %v3867_v61 = vsel %vm614_vm8, %v3851_v30, %v3790_v26  ;;  %v3552_v48 = vadd.f32 %v3536_v37, %v6602_v45  ;;  %3761 = vrot.lane.b32.xlu1 %v3674_v51, %s4922_s28 }
 0x77d   :  { %v3535_v15 = vsel %vm3455_vm13, %v3433_v31, %v4328_v54  ;;  %3883 = vst.msk [vmem:[#allocation2 + $0x10] sm:$0xff] %vm631_vm9, %v3867_v61  ;;  %v3676_v33 = vsel %vm247_vm4, %v3673_v4, %v3675_v3  ;;  %v3616_v54 = vsel %vm177_vm2, 0.0, %v3584_v21 }
 0x77e   :  { %v3551_v8 = vadd.f32 %v3535_v15, %v6576_v13  ;;  %3713 = vrot.lane.b32.xlu0 %v3642_v16, %s4923_s29  ;;  %v3597_v59 = vrot.slane %v3552_v48, 5  ;;  %v3645_v13 = vrot.slane %v3552_v48, 6  ;;  %v3679_v60 = vrot.slane %v3552_v48, 7 }
 0x780   :  { %v3643_v19 = vrot.slane %v3551_v8, 6  ;;  %v3595_v63 = vrot.slane %v3551_v8, 5  ;;  %v3677_v46 = vrot.slane %v3551_v8, 7 }
 0x782   :  { %3763 = vrot.lane.b32.xlu0 %v3676_v33, %s4922_s28  ;;  %v3644_v45 = vsel %vm212_vm3, %v3641_v38, %v3643_v19  ;;  %v3897_v31 = vld [vmem:[#allocation2] ss:$2 sm:$0xff]  ;;  %v6992_v11 = vsel %vm177_vm2, %v3593_v56, %v3595_v63  ;;  %v6995_v6 = vsel %vm177_vm2, %v3595_v63, %v3597_v59  ;;  %v3646_v20 = vsel %vm212_vm3, %v3643_v19, %v3645_v13 }
 0x783   :  { %3715 = vrot.lane.b32.xlu1 %v3644_v45, %s4923_s29  ;;  %4679 = vmatprep.mubr.msk.f32.mxu1 %vm631_vm9, %v3897_v31  ;;  %v3678_v28 = vsel %vm247_vm4, %v3675_v3, %v3677_v46  ;;  %v3680_v34 = vsel %vm247_vm4, %v3677_v46, %v3679_v60 }
 0x784   :  { %v3796_v50 = vpop.permute.xlu0 %3795 }
 0x786   :  { %3717 = vrot.lane.b32.xlu0 %v3646_v20, %s4923_s29  ;;  %v3794_v32 = vpop.permute.xlu1 %3793 }
 0x787   :  { %3765 = vrot.lane.b32.xlu1 %v3678_v28, %s4922_s28 }
 0x788   :  { %v3694_v22 = vpop.permute.xlu0 %3693 }
 0x789   :  { %v3836_v26 = vsel %vm580_vm6, %v6791_v5, %v3694_v22 }
 0x78a   :  { %3767 = vrot.lane.b32.xlu0 %v3680_v34, %s4922_s28  ;;  %v3696_v35 = vpop.permute.xlu1 %3695 }
 0x78b   :  { %3813 = vrot.lane.b32.xlu1 %v3551_v8, %s4924_s13  ;;  %v3837_v43 = vsel %vm580_vm6, %v6840_v36, %v3696_v35 }
 0x78c   :  { %v3744_v25 = vpop.permute.xlu0 %3743 }
 0x78d   :  { %v3852_v24 = vsel %vm597_vm7, %v3836_v26, %v3744_v25 }
 0x78e   :  { %v3868_v62 = vsel %vm614_vm8, %v3852_v24, %v6947_v17  ;;  %3815 = vrot.lane.b32.xlu0 %v3552_v48, %s4924_s13  ;;  %v3746_v57 = vpop.permute.xlu1 %3745 }
 0x78f   :  { %3884 = vst.msk [vmem:[#allocation2 + $0x18] sm:$0xff] %vm631_vm9, %v3868_v62  ;;  %v3853_v58 = vsel %vm597_vm7, %v3837_v43, %v3746_v57 }
 0x790   :  { %v3800_v2 = vpop.permute.xlu0 %3799  ;;  %v3869_v56 = vsel %vm614_vm8, %v3853_v58, %v3794_v32 }
 0x791   :  { %3885 = vst.msk [vmem:[#allocation2 + $0x20] sm:$0xff] %vm631_vm9, %v3869_v56 }
 0x792   :  { %v3798_v5 = vpop.permute.xlu1 %3797 }
 0x794   :  { %v3698_v0 = vpop.permute.xlu0 %3697 }
 0x795   :  { %v3838_v17 = vsel %vm580_vm6, %v6845_v44, %v3698_v0 }
 0x796   :  { %v3899_v10 = vld [vmem:[#allocation2 + $0x10] ss:$2 sm:$0xff]  ;;  %v3700_v23 = vpop.permute.xlu1 %3699 }
 0x797   :  { %4680 = vmatmul.mubr.msk.f32.vlgmr.msra.gmra.mxu1 %vm631_vm9, %v3899_v10  ;;  %v3839_v4 = vsel %vm580_vm6, %v6864_v1, %v3700_v23 }
 0x798   :  { %v3748_v36 = vpop.permute.xlu0 %3747 }
 0x799   :  { %v3854_v49 = vsel %vm597_vm7, %v3838_v17, %v3748_v36 }
 0x79a   :  { %v3870_v39 = vsel %vm614_vm8, %v3854_v49, %v3796_v50  ;;  %v3750_v47 = vpop.permute.xlu1 %3749 }
 0x79b   :  { %3886 = vst.msk [vmem:[#allocation2 + $0x28] sm:$0xff] %vm631_vm9, %v3870_v39  ;;  %v3855_v41 = vsel %vm597_vm7, %v3839_v4, %v3750_v47  ;;  %v4330_v47 = vld [vmem:[%s7121_s6] ss:$0 sm:$0xff] }
 0x79c   :  { %v3871_v42 = vsel %vm614_vm8, %v3855_v41, %v3798_v5 }
 0x79d   :  { %3887 = vst.msk [vmem:[#allocation2 + $0x30] sm:$0xff] %vm631_vm9, %v3871_v42 }
 0x7a1   :  { %v3804_v12 = vpop.permute.xlu0 %3803 }
 0x7a2   :  { %v3901_v18 = vld [vmem:[#allocation2 + $0x20] ss:$2 sm:$0xff] }
 0x7a3   :  { %v3802_v44 = vpop.permute.xlu1 %3801  ;;  %4682 = vmatprep.mubr.msk.f32.mxu1 %vm631_vm9, %v3901_v18 }
 0x7a5   :  { %v3702_v9 = vpop.permute.xlu0 %3701 }
 0x7a6   :  { %v3840_v37 = vsel %vm580_vm6, %v6867_v53, %v3702_v9 }
 0x7a7   :  { %v3704_v40 = vpop.permute.xlu1 %3703 }
 0x7a8   :  { %v3841_v38 = vsel %vm580_vm6, %v3616_v54, %v3704_v40 }
 0x7a9   :  { %v3752_v1 = vpop.permute.xlu0 %3751 }
 0x7aa   :  { %v3856_v30 = vsel %vm597_vm7, %v3840_v37, %v3752_v1 }
 0x7ab   :  { %v3872_v61 = vsel %vm614_vm8, %v3856_v30, %v3800_v2  ;;  %v3754_v51 = vpop.permute.xlu1 %3753 }
 0x7ac   :  { %3888 = vst.msk [vmem:[#allocation2 + $0x38] sm:$0xff] %vm631_vm9, %v3872_v61  ;;  %v3857_v48 = vsel %vm597_vm7, %v3841_v38, %v3754_v51 }
 0x7ad   :  { %v3873_v15 = vsel %vm614_vm8, %v3857_v48, %v3802_v44 }
 0x7ae   :  { %3889 = vst.msk [vmem:[#allocation2 + $0x40] sm:$0xff] %vm631_vm9, %v3873_v15 }
 0x7b3   :  { %v3903_v53 = vld [vmem:[#allocation2 + $0x30] ss:$2 sm:$0xff] }
 0x7b4   :  { %4683 = vmatmul.mubr.msk.f32.gmra.mxu1 %vm631_vm9, %v3903_v53 }
 0x7d0   :  { %v3808_v27 = vpop.permute.xlu0 %3807 }
 0x7d2   :  { %v3806_v21 = vpop.permute.xlu1 %3805 }
 0x7d4   :  { %v3706_v16 = vpop.permute.xlu0 %3705 }
 0x7d5   :  { %v3842_v3 = vsel %vm580_vm6, %v6894_v7, %v3706_v16 }
 0x7d6   :  { %v3708_v8 = vpop.permute.xlu1 %3707 }
 0x7d7   :  { %v3843_v33 = vsel %vm580_vm6, %v6932_v14, %v3708_v8 }
 0x7d8   :  { %v3756_v19 = vpop.permute.xlu0 %3755 }
 0x7d9   :  { %v3858_v63 = vsel %vm597_vm7, %v3842_v3, %v3756_v19 }
 0x7da   :  { %v3874_v59 = vsel %vm614_vm8, %v3858_v63, %v3804_v12  ;;  %v3758_v45 = vpop.permute.xlu1 %3757 }
 0x7db   :  { %3890 = vst.msk [vmem:[#allocation2 + $0x48] sm:$0xff] %vm631_vm9, %v3874_v59  ;;  %v3859_v31 = vsel %vm597_vm7, %v3843_v33, %v3758_v45 }
 0x7dc   :  { %v3875_v46 = vsel %vm614_vm8, %v3859_v31, %v3806_v21 }
 0x7dd   :  { %3891 = vst.msk [vmem:[#allocation2 + $0x50] sm:$0xff] %vm631_vm9, %v3875_v46 }
 0x7e2   :  { %v3905_v13 = vld [vmem:[#allocation2 + $0x40] ss:$2 sm:$0xff] }
 0x7e3   :  { %4685 = vmatprep.mubr.msk.f32.mxu1 %vm631_vm9, %v3905_v13 }
 0x7e4   :  { %v3812_v7 = vpop.permute.xlu0 %3811 }
 0x7e6   :  { %v3810_v50 = vpop.permute.xlu1 %3809 }
 0x7e8   :  { %v3710_v20 = vpop.permute.xlu0 %3709 }
 0x7e9   :  { %v3844_v14 = vsel %vm580_vm6, %v6935_v55, %v3710_v20 }
 0x7ea   :  { %v3712_v28 = vpop.permute.xlu1 %3711 }
 0x7eb   :  { %v3845_v34 = vsel %vm580_vm6, %v6962_v29, %v3712_v28 }
 0x7ec   :  { %v3760_v32 = vpop.permute.xlu0 %3759 }
 0x7ed   :  { %v3860_v60 = vsel %vm597_vm7, %v3844_v14, %v3760_v32 }
 0x7ee   :  { %v3876_v22 = vsel %vm614_vm8, %v3860_v60, %v3808_v27  ;;  %v3762_v35 = vpop.permute.xlu1 %3761 }
 0x7ef   :  { %3892 = vst.msk [vmem:[#allocation2 + $0x58] sm:$0xff] %vm631_vm9, %v3876_v22  ;;  %v3861_v26 = vsel %vm597_vm7, %v3845_v34, %v3762_v35 }
 0x7f0   :  { %v3714_v25 = vpop.permute.xlu0 %3713  ;;  %v3877_v24 = vsel %vm614_vm8, %v3861_v26, %v3810_v50 }
 0x7f1   :  { %3893 = vst.msk [vmem:[#allocation2 + $0x60] sm:$0xff] %vm631_vm9, %v3877_v24  ;;  %v3846_v55 = vsel %vm580_vm6, %v6965_v52, %v3714_v25 }
 0x7f4   :  { %v3764_v62 = vpop.permute.xlu0 %3763 }
 0x7f5   :  { %v3862_v43 = vsel %vm597_vm7, %v3846_v55, %v3764_v62  ;;  %v3716_v57 = vpop.permute.xlu1 %3715 }
 0x7f6   :  { %v3878_v58 = vsel %vm614_vm8, %v3862_v43, %v3812_v7  ;;  %v3907_v29 = vld [vmem:[#allocation2 + $0x50] ss:$2 sm:$0xff]  ;;  %v3847_v5 = vsel %vm580_vm6, %v6992_v11, %v3716_v57 }
 0x7f7   :  { %3894 = vst.msk [vmem:[#allocation2 + $0x68] sm:$0xff] %vm631_vm9, %v3878_v58  ;;  %4686 = vmatmul.mubr.msk.f32.gmra.mxu1 %vm631_vm9, %v3907_v29 }
 0x7f8   :  { %v3718_v2 = vpop.permute.xlu0 %3717 }
 0x7f9   :  { %v3766_v56 = vpop.permute.xlu1 %3765  ;;  %v3848_v36 = vsel %vm580_vm6, %v6995_v6, %v3718_v2 }
 0x7fa   :  { %v3863_v10 = vsel %vm597_vm7, %v3847_v5, %v3766_v56 }
 0x7fc   :  { %v3768_v0 = vpop.permute.xlu0 %3767 }
 0x7fd   :  { %v3814_v52 = vpop.permute.xlu1 %3813  ;;  %v3864_v49 = vsel %vm597_vm7, %v3848_v36, %v3768_v0 }
 0x7fe   :  { %v3879_v23 = vsel %vm614_vm8, %v3863_v10, %v3814_v52  ;;  %v3909_v17 = vld [vmem:[#allocation2 + $0x60] ss:$2 sm:$0xff] }
 0x7ff   :  { %3895 = vst.msk [vmem:[#allocation2 + $0x70] sm:$0xff] %vm631_vm9, %v3879_v23  ;;  %4688 = vmatprep.mubr.msk.f32.mxu1 %vm631_vm9, %v3909_v17 }
 0x800   :  { %v3816_v39 = vpop.permute.xlu0 %3815 }
 0x801   :  { %v3880_v4 = vsel %vm614_vm8, %v3864_v49, %v3816_v39 }
 0x802   :  { %3896 = vst.msk [vmem:[#allocation2 + $0x78] sm:$0xff] %vm631_vm9, %v3880_v4 }
 0x809   :  { %v3911_v11 = vld [vmem:[#allocation2 + $0x70] ss:$2 sm:$0xff] }
 0x80a   :  { %4689 = vmatmul.mubr.msk.f32.gmra.mxu1 %vm631_vm9, %v3911_v11 }
 0x857   :  { %v4681_v41 = vpop.f32.mrf.mxu1 }
 0x858   :  { %v4019_v6 = vadd.f32 %v4681_v41, %v4330_v47 }
 0x859   :  { %v4013_v42 = vpop.f32.mrf.mxu1 }
 0x85a   :  { %v4061_v12 = vmin.f32 %v4019_v6, 0.0  ;;  %v4014_v18 = vadd.f32 %v4330_v47, %v4013_v42  ;;  %vm4053_vm2 = vcmp.gt.f32.partialorder %v4019_v6, 0.0 }
 0x85c   :  { %v4070_v44 = vmul.f32 1.442695, %v4061_v12  ;;  %v4060_v9 = vmin.f32 %v4014_v18, 0.0  ;;  %vm4052_vm3 = vcmp.gt.f32.partialorder %v4014_v18, 0.0 }
 0x85e   :  { %4890 = vpow2.f32 %v4070_v44  ;;  %v4068_v40 = vmul.f32 1.442695, %v4060_v9 }
 0x860   :  { %4892 = vpow2.f32 %v4068_v40 }
 0x86b   :  { %v4891_v37 = vpop.eup %4890 }
 0x86c   :  { %v4340_v1 = vadd.f32 -1.0, %v4891_v37 }
 0x86d   :  { %v4893_v54 = vpop.eup %4892 }
 0x86e   :  { %v4093_v30 = vsel %vm4053_vm2, %v4019_v6, %v4340_v1  ;;  %v4339_v38 = vadd.f32 -1.0, %v4893_v54 }
 0x86f   :  { %4101 = vst.msk [vmem:[%s7122_s7 + $0x8] sm:$0xff] %vm597_vm7, %v4093_v30 }
 0x870   :  { %v4092_v61 = vsel %vm4052_vm3, %v4014_v18, %v4339_v38 }
 0x871   :  { %4100 = vst.msk [vmem:[%s7122_s7] sm:$0xff] %vm597_vm7, %v4092_v61 }
 0x874   :  { %v4684_v51 = vpop.f32.mrf.mxu1 }
 0x875   :  { %v4029_v48 = vadd.f32 %v4684_v51, %v4330_v47 }
 0x876   :  { %v4023_v15 = vpop.f32.mrf.mxu1 }
 0x877   :  { %v4063_v53 = vmin.f32 %v4029_v48, 0.0  ;;  %v4024_v27 = vadd.f32 %v4330_v47, %v4023_v15  ;;  %vm4055_vm4 = vcmp.gt.f32.partialorder %v4029_v48, 0.0 }
 0x879   :  { %v4074_v21 = vmul.f32 1.442695, %v4063_v53  ;;  %v4062_v16 = vmin.f32 %v4024_v27, 0.0  ;;  %vm4054_vm6 = vcmp.gt.f32.partialorder %v4024_v27, 0.0 }
 0x87b   :  { %4894 = vpow2.f32 %v4074_v21  ;;  %v4072_v8 = vmul.f32 1.442695, %v4062_v16 }
 0x87d   :  { %4896 = vpow2.f32 %v4072_v8 }
 0x888   :  { %v4895_v3 = vpop.eup %4894 }
 0x889   :  { %v4342_v19 = vadd.f32 -1.0, %v4895_v3 }
 0x88a   :  { %v4897_v63 = vpop.eup %4896 }
 0x88b   :  { %v4095_v33 = vsel %vm4055_vm4, %v4029_v48, %v4342_v19  ;;  %v4341_v59 = vadd.f32 -1.0, %v4897_v63 }
 0x88c   :  { %4103 = vst.msk [vmem:[%s7122_s7 + $0x18] sm:$0xff] %vm597_vm7, %v4095_v33 }
 0x88d   :  { %v4094_v45 = vsel %vm4054_vm6, %v4024_v27, %v4341_v59 }
 0x88e   :  { %4102 = vst.msk [vmem:[%s7122_s7 + $0x10] sm:$0xff] %vm597_vm7, %v4094_v45 }
 0x8b7   :  { %v4687_v31 = vpop.f32.mrf.mxu1 }
 0x8b8   :  { %v4039_v46 = vadd.f32 %v4687_v31, %v4330_v47 }
 0x8b9   :  { %v4033_v13 = vpop.f32.mrf.mxu1 }
 0x8ba   :  { %v4065_v7 = vmin.f32 %v4039_v46, 0.0  ;;  %v4034_v50 = vadd.f32 %v4330_v47, %v4033_v13  ;;  %vm4057_vm8 = vcmp.gt.f32.partialorder %v4039_v46, 0.0 }
 0x8bc   :  { %v4078_v20 = vmul.f32 1.442695, %v4065_v7  ;;  %v4064_v28 = vmin.f32 %v4034_v50, 0.0  ;;  %vm4056_vm9 = vcmp.gt.f32.partialorder %v4034_v50, 0.0 }
 0x8be   :  { %4898 = vpow2.f32 %v4078_v20  ;;  %v4076_v14 = vmul.f32 1.442695, %v4064_v28 }
 0x8c0   :  { %4900 = vpow2.f32 %v4076_v14 }
 0x8ca   :  { %v4690_v32 = vpop.f32.mrf.mxu1 }
 0x8cb   :  { %v4899_v60 = vpop.eup %4898  ;;  %v4049_v22 = vadd.f32 %v4690_v32, %v4330_v47 }
 0x8cc   :  { %v4344_v34 = vadd.f32 -1.0, %v4899_v60  ;;  %v4043_v35 = vpop.f32.mrf.mxu1 }
 0x8cd   :  { %v4901_v26 = vpop.eup %4900  ;;  %v4067_v25 = vmin.f32 %v4049_v22, 0.0  ;;  %v4044_v24 = vadd.f32 %v4330_v47, %v4043_v35  ;;  %vm4059_vm15 = vcmp.gt.f32.partialorder %v4049_v22, 0.0 }
 0x8ce   :  { %v4097_v55 = vsel %vm4057_vm8, %v4039_v46, %v4344_v34  ;;  %v4343_v62 = vadd.f32 -1.0, %v4901_v26 }
 0x8cf   :  { %4105 = vst.msk [vmem:[%s7122_s7 + $0x28] sm:$0xff] %vm597_vm7, %v4097_v55  ;;  %v4082_v43 = vmul.f32 1.442695, %v4067_v25  ;;  %v4066_v57 = vmin.f32 %v4044_v24, 0.0  ;;  %vm4058_vm1 = vcmp.gt.f32.partialorder %v4044_v24, 0.0 }
 0x8d0   :  { %v4096_v58 = vsel %vm4056_vm9, %v4034_v50, %v4343_v62 }
 0x8d1   :  { %4104 = vst.msk [vmem:[%s7122_s7 + $0x20] sm:$0xff] %vm597_vm7, %v4096_v58  ;;  %4902 = vpow2.f32 %v4082_v43  ;;  %v4080_v29 = vmul.f32 1.442695, %v4066_v57 }
 0x8d3   :  { %4904 = vpow2.f32 %v4080_v29 }
 0x8de   :  { %v4903_v2 = vpop.eup %4902 }
 0x8df   :  { %v4346_v56 = vadd.f32 -1.0, %v4903_v2 }
 0x8e0   :  { %v4905_v5 = vpop.eup %4904 }
 0x8e1   :  { %v4099_v0 = vsel %vm4059_vm15, %v4049_v22, %v4346_v56  ;;  %v4345_v10 = vadd.f32 -1.0, %v4905_v5 }
 0x8e2   :  { %4107 = vst.msk [vmem:[%s7122_s7 + $0x38] sm:$0xff] %vm597_vm7, %v4099_v0 }
 0x8e3   :  { %v4098_v52 = vsel %vm4058_vm1, %v4044_v24, %v4345_v10 }
 0x8e4   :  { %4106 = vst.msk [vmem:[%s7122_s7 + $0x30] sm:$0xff] %vm597_vm7, %v4098_v52 }

</bundles_post_ra>
